<compile_context>
chip_gen: v6e
topology: v6e:2x2x1
jax: 0.10.0
libtpu: 0.0.40
codegen_flags: <defaults>
</compile_context>

<pallas_src>
import numpy as np
import jax
import jax.numpy as jnp
from jax.experimental import pallas as pl
from jax.experimental.pallas import tpu as pltpu

C_Z = 128                      # pair channel dim
C = 32                         # per-head hidden dim
N_HEAD = 4                     # number of heads (C * N_HEAD == C_Z)
N = 16                         # sequence length == r (linear_b out_features)
HC = N_HEAD * C                # 128: width of one role slab (q | k | v | g)
LN_EPS = 1e-5
INV_SQRT_C = 1.0 / float(np.sqrt(C))
USE_BF16_MATMUL_OPERANDS = True   # bf16 MXU operands, f32 accumulate/elementwise


def _layernorm(x):
    """LayerNorm without affine (gamma/beta are folded into the projections)."""
    mu = jnp.mean(x, axis=-1, keepdims=True)
    var = jnp.mean(jnp.square(x - mu), axis=-1, keepdims=True)
    return (x - mu) * jax.lax.rsqrt(var + LN_EPS)


def _attention_body(pr2, pc2, perm_ref, wqkvg_ref, bqkvg_ref, wb_ref, bb_ref,
                    wout_ref, bout_ref, out_ref, proj_ref, *, tile_i):
    rows = tile_i * N
    mm_dtype = wqkvg_ref.dtype

    # Fused q/k/v/g projection for all heads: one (rows,128)@(128,512) MXU
    # matmul.  Columns are role-major: [q(all heads)|k|v|g], 128 lanes each.
    proj_ref[...] = (jnp.dot(pr2.astype(mm_dtype), wqkvg_ref[...],
                             preferred_element_type=jnp.float32)
                     + bqkvg_ref[...])

    # sigmoid ONCE over the full, vreg-aligned 128-lane gate slab (in place).
    proj_ref[:, 3 * HC:4 * HC] = jax.nn.sigmoid(proj_ref[:, 3 * HC:4 * HC])

    # b for all heads from the pair *column* view (rows ordered (j, ii)), then
    # reorder rows to (ii, j) with a host-precomputed 0/1 permutation constant
    # (exact; one small MXU matmul, no in-kernel iota/compare/cast).
    bcol = (jnp.dot(pc2.astype(mm_dtype), wb_ref[...],
                    preferred_element_type=jnp.float32) + bb_ref[...])
    bt = jnp.dot(perm_ref[...], bcol.astype(perm_ref.dtype),
                 preferred_element_type=jnp.float32)            # (rows, H*N)

    # Per-head attention.  The 32-lane per-head operand slices are inherent to
    # the per-head contraction; each head's gated output is folded straight
    # into the output projection (no concat scratch / masked-store round trip).
    # 1/sqrt(C) is already folded into the q weights.
    out_acc = jnp.zeros((rows, C_Z), jnp.float32)
    for h in range(N_HEAD):
        q = proj_ref[:, 0 * HC + h * C:0 * HC + (h + 1) * C].reshape(tile_i, N, C)
        k = proj_ref[:, 1 * HC + h * C:1 * HC + (h + 1) * C].reshape(tile_i, N, C)
        v = proj_ref[:, 2 * HC + h * C:2 * HC + (h + 1) * C].reshape(tile_i, N, C)
        g = proj_ref[:, 3 * HC + h * C:3 * HC + (h + 1) * C]      # (rows, C), gated
        bt_h = bt[:, h * N:(h + 1) * N].reshape(tile_i, N, N)

        logits = jnp.einsum('ijd,ikd->ijk', q, k,
                            preferred_element_type=jnp.float32) + bt_h
        m = jnp.max(logits, axis=-1, keepdims=True)
        e = jnp.exp(logits - m)
        a = e * pl.reciprocal(jnp.sum(e, axis=-1, keepdims=True), approx=True)
        o_h = jnp.einsum('ijk,ikd->ijd', a, v,
                         preferred_element_type=jnp.float32).reshape(rows, C)
        o_h = g * o_h
        out_acc = out_acc + jnp.dot(o_h.astype(wout_ref.dtype),
                                    wout_ref[h * C:(h + 1) * C, :],
                                    preferred_element_type=jnp.float32)

    out_ref[...] = (out_acc + bout_ref[...]).reshape(tile_i, N, C_Z)


def _make_kernel(tile_i, share_pair):
    rows = tile_i * N

    if share_pair:
        # Single grid step: the row block IS the full pair, so the column view
        # is the same data -> pair DMA'd once, LayerNorm computed once.
        def kernel(pr_ref, perm_ref, wqkvg_ref, bqkvg_ref, wb_ref, bb_ref,
                   wout_ref, bout_ref, out_ref, proj_ref):
            pr2 = _layernorm(pr_ref[...].reshape(rows, C_Z))
            _attention_body(pr2, pr2, perm_ref, wqkvg_ref, bqkvg_ref, wb_ref,
                            bb_ref, wout_ref, bout_ref, out_ref, proj_ref,
                            tile_i=tile_i)
    else:
        def kernel(pr_ref, pc_ref, perm_ref, wqkvg_ref, bqkvg_ref, wb_ref,
                   bb_ref, wout_ref, bout_ref, out_ref, proj_ref):
            pr2 = _layernorm(pr_ref[...].reshape(rows, C_Z))
            pc2 = _layernorm(pc_ref[...].reshape(rows, C_Z))
            _attention_body(pr2, pc2, perm_ref, wqkvg_ref, bqkvg_ref, wb_ref,
                            bb_ref, wout_ref, bout_ref, out_ref, proj_ref,
                            tile_i=tile_i)
    return kernel


def _pick_tile_i():
    # Single-TensorCore v5e/v6e: one grid step (no per-step overhead, weights
    # buffered once).  Multi-core parts (v7x 2xTC, v4/v5p megacore): keep a
    # 2-way "parallel" grid so each core gets one output-row tile.
    try:
        kind = jax.devices()[0].device_kind.lower()
    except Exception:
        kind = ""
    single_tc = any(t in kind for t in ("v5 lite", "v5lite", "v5e", "v6 lite", "v6e"))
    return N if single_tc else N // 2


def fold_params(P, mm_dtype):
    """Fold per-head LayerNorm affine and the 1/sqrt(c) logits scale into the
    projections, lay the q/k/v/g weight columns out role-major, and pre-cast
    the matmul operands."""
    gamma, beta = P["gamma"], P["beta"]                      # (H, C_Z)

    def fold(w, b):                                          # w: (H,C_Z,X), b: (H,X)|None
        w_eff = gamma[:, :, None] * w
        b_eff = jnp.einsum('hc,hcx->hx', beta, w)
        if b is not None:
            b_eff = b_eff + b
        return w_eff, b_eff

    wq, bq = fold(P["wq"], P["bq"])
    wq, bq = INV_SQRT_C * wq, INV_SQRT_C * bq                # fold the logits scale
    wk, bk = fold(P["wk"], P["bk"])
    wv, bv = fold(P["wv"], P["bv"])
    wg, bg = fold(P["wg"], P["bg"])
    wb, bb = fold(P["wb"], None)

    # Role-major columns: [q(all heads) | k | v | g], each H*C = 128 lanes.
    w4 = jnp.stack([wq, wk, wv, wg], axis=0)                 # (4, H, C_Z, C)
    w_qkvg = jnp.transpose(w4, (2, 0, 1, 3)).reshape(C_Z, 4 * HC)
    b_qkvg = jnp.stack([bq, bk, bv, bg], axis=0).reshape(1, 4 * HC)

    w_b = jnp.transpose(wb, (1, 0, 2)).reshape(C_Z, N_HEAD * N)   # cols: [head][k]
    b_b = bb.reshape(1, N_HEAD * N)

    return {"w_qkvg": w_qkvg.astype(mm_dtype), "b_qkvg": b_qkvg,
            "w_b": w_b.astype(mm_dtype), "b_b": b_b,
            "w_out": P["wout"].astype(mm_dtype),
            "b_out": P["bout"].reshape(1, C_Z)}


def triangular_attention_starting_node(pair, params, tile_i=None):
    if tile_i is None:
        tile_i = _pick_tile_i()
    assert N % tile_i == 0
    share_pair = (tile_i == N)
    rows = tile_i * N
    mm_dtype = jnp.bfloat16 if USE_BF16_MATMUL_OPERANDS else jnp.float32
    fp = fold_params(params, mm_dtype)

    # Host-precomputed 0/1 row permutation: bt[ii*N + j] = bcol[j*tile_i + ii].
    rb = np.arange(rows)
    perm_np = np.zeros((rows, rows), np.float32)
    perm_np[rb, (rb % N) * tile_i + rb // N] = 1.0
    perm = jnp.asarray(perm_np).astype(mm_dtype)             # exact for 0/1 values

    const_specs = [
        pl.BlockSpec((rows, rows), lambda i: (0, 0)),         # perm (constant)
        pl.BlockSpec((C_Z, 4 * HC), lambda i: (0, 0)),        # W_qkvg (role-major)
        pl.BlockSpec((1, 4 * HC), lambda i: (0, 0)),          # bias qkvg
        pl.BlockSpec((C_Z, N_HEAD * N), lambda i: (0, 0)),    # W_b
        pl.BlockSpec((1, N_HEAD * N), lambda i: (0, 0)),      # bias b
        pl.BlockSpec((HC, C_Z), lambda i: (0, 0)),            # W_out
        pl.BlockSpec((1, C_Z), lambda i: (0, 0)),             # b_out
    ]
    row_spec = pl.BlockSpec((tile_i, N, C_Z), lambda i: (i, 0, 0))
    col_spec = pl.BlockSpec((N, tile_i, C_Z), lambda i: (0, i, 0))

    if share_pair:
        in_specs = [row_spec] + const_specs
        args = (pair,)
    else:
        in_specs = [row_spec, col_spec] + const_specs
        args = (pair, pair)
    args = args + (perm, fp["w_qkvg"], fp["b_qkvg"], fp["w_b"], fp["b_b"],
                   fp["w_out"], fp["b_out"])

    return pl.pallas_call(
        _make_kernel(tile_i, share_pair),
        out_shape=jax.ShapeDtypeStruct((N, N, C_Z), jnp.float32),
        grid=(N // tile_i,),
        in_specs=in_specs,
        out_specs=row_spec,
        scratch_shapes=[pltpu.VMEM((rows, 4 * HC), jnp.float32)],  # fused q/k/v/g proj
        compiler_params=pltpu.CompilerParams(dimension_semantics=("parallel",)),
    )(*args)


def reference(pair, P):
    """Pure-JAX f32 mirror of the PyTorch forward (raw, unfolded parameters)."""
    outs = []
    for h in range(N_HEAD):
        mu = pair.mean(-1, keepdims=True)
        var = ((pair - mu) ** 2).mean(-1, keepdims=True)
        p = (pair - mu) / jnp.sqrt(var + LN_EPS) * P["gamma"][h] + P["beta"][h]
        q = p @ P["wq"][h] + P["bq"][h]
        k = p @ P["wk"][h] + P["bk"][h]
        v = p @ P["wv"][h] + P["bv"][h]
        b = p @ P["wb"][h]
        g = jax.nn.sigmoid(p @ P["wg"][h] + P["bg"][h])
        logits = INV_SQRT_C * jnp.einsum('ijd,ikd->ijk', q, k) + jnp.transpose(b, (1, 0, 2))
        a = jax.nn.softmax(logits, axis=-1)
        outs.append(g * jnp.einsum('ijk,ikd->ijd', a, v))
    out = jnp.concatenate(outs, axis=-1)                     # (N, N, c*N_head)
    return out @ P["wout"] + P["bout"]


def make_params(key):
    ks = jax.random.split(key, 13)
    s_in = 1.0 / np.sqrt(C_Z)
    s_out = 1.0 / np.sqrt(N_HEAD * C)
    H = N_HEAD
    return {
        "gamma": 1.0 + 0.1 * jax.random.normal(ks[0], (H, C_Z), jnp.float32),
        "beta": 0.1 * jax.random.normal(ks[1], (H, C_Z), jnp.float32),
        "wq": s_in * jax.random.normal(ks[2], (H, C_Z, C), jnp.float32),
        "bq": 0.1 * jax.random.normal(ks[3], (H, C), jnp.float32),
        "wk": s_in * jax.random.normal(ks[4], (H, C_Z, C), jnp.float32),
        "bk": 0.1 * jax.random.normal(ks[5], (H, C), jnp.float32),
        "wv": s_in * jax.random.normal(ks[6], (H, C_Z, C), jnp.float32),
        "bv": 0.1 * jax.random.normal(ks[7], (H, C), jnp.float32),
        "wb": s_in * jax.random.normal(ks[8], (H, C_Z, N), jnp.float32),
        "wg": s_in * jax.random.normal(ks[9], (H, C_Z, C), jnp.float32),
        "bg": 0.1 * jax.random.normal(ks[10], (H, C), jnp.float32),
        "wout": s_out * jax.random.normal(ks[11], (H * C, C_Z), jnp.float32),
        "bout": 0.1 * jax.random.normal(ks[12], (C_Z,), jnp.float32),
    }


if __name__ == "__main__":
    key = jax.random.PRNGKey(0)
    k_pair, k_params = jax.random.split(key)
    pair = jax.random.normal(k_pair, (N, N, C_Z), jnp.float32)
    params = make_params(k_params)

    out = jax.block_until_ready(triangular_attention_starting_node(pair, params))
    ref = jax.block_until_ready(reference(pair, params))

    assert out.shape == (N, N, C_Z) and out.dtype == jnp.float32
    err = float(jnp.max(jnp.abs(out - ref)))
    # bf16 MXU operands (review-requested) loosen parity vs. the f32 reference;
    # elementwise/accumulation stay f32 so 5e-2 max-abs has comfortable margin.
    tol = 5e-2 if USE_BF16_MATMUL_OPERANDS else 5e-3
    assert err < tol, f"mismatch vs f32 reference: {err} (tol {tol})"
    print("KERNEL_OK")
</pallas_src>

<mosaic_0001>
module attributes {stable_mosaic.version = 11 : i64} {
  func.func @kernel(%arg0: i32, %arg1: memref<8x16x128xf32, #tpu.memory_space<vmem>>, %arg2: memref<16x8x128xf32, #tpu.memory_space<vmem>>, %arg3: memref<128x128xbf16, #tpu.memory_space<vmem>>, %arg4: memref<128x512xbf16, #tpu.memory_space<vmem>>, %arg5: memref<1x512xf32, #tpu.memory_space<vmem>>, %arg6: memref<128x64xbf16, #tpu.memory_space<vmem>>, %arg7: memref<1x64xf32, #tpu.memory_space<vmem>>, %arg8: memref<128x128xbf16, #tpu.memory_space<vmem>>, %arg9: memref<1x128xf32, #tpu.memory_space<vmem>>, %arg10: memref<8x16x128xf32, #tpu.memory_space<vmem>>, %arg11: memref<128x512xf32, #tpu.memory_space<vmem>>) attributes {dimension_semantics = [#tpu.dimension_semantics<parallel>], iteration_bounds = array<i64: 2>, scalar_prefetch = 0 : i64, scratch_operands = 1 : i64, tpu.core_type = #tpu.core_type<tc>, window_params = [{transform_indices = @transform_0, window_bounds = array<i64: 8, 16, 128>}, {transform_indices = @transform_1, window_bounds = array<i64: 16, 8, 128>}, {pipeline_mode = #tpu.pipeline_mode<synchronous>, transform_indices = @transform_2, window_bounds = array<i64: 128, 128>}, {pipeline_mode = #tpu.pipeline_mode<synchronous>, transform_indices = @transform_3, window_bounds = array<i64: 128, 512>}, {pipeline_mode = #tpu.pipeline_mode<synchronous>, transform_indices = @transform_4, window_bounds = array<i64: 1, 512>}, {pipeline_mode = #tpu.pipeline_mode<synchronous>, transform_indices = @transform_5, window_bounds = array<i64: 128, 64>}, {pipeline_mode = #tpu.pipeline_mode<synchronous>, transform_indices = @transform_6, window_bounds = array<i64: 1, 64>}, {pipeline_mode = #tpu.pipeline_mode<synchronous>, transform_indices = @transform_7, window_bounds = array<i64: 128, 128>}, {pipeline_mode = #tpu.pipeline_mode<synchronous>, transform_indices = @transform_8, window_bounds = array<i64: 1, 128>}, {transform_indices = @transform_9, window_bounds = array<i64: 8, 16, 128>}]} {
    %c0 = arith.constant 0 : index
    %c0_0 = arith.constant 0 : index
    %c0_1 = arith.constant 0 : index
    %0 = vector.load %arg1[%c0, %c0_0, %c0_1] : memref<8x16x128xf32, #tpu.memory_space<vmem>>, vector<8x16x128xf32>
    %1 = vector.shape_cast %0 : vector<8x16x128xf32> to vector<128x128xf32>
    %cst = arith.constant dense<0.000000e+00> : vector<128xf32>
    %2 = vector.multi_reduction <add>, %1, %cst [1] : vector<128x128xf32> to vector<128xf32>
    %3 = vector.shape_cast %2 : vector<128xf32> to vector<128x1xf32>
    %cst_2 = arith.constant 1.280000e+02 : f32
    %4 = vector.broadcast %cst_2 : f32 to vector<128x1xf32>
    %5 = arith.divf %3, %4 : vector<128x1xf32>
    %6 = vector.broadcast %5 : vector<128x1xf32> to vector<128x128xf32>
    %7 = arith.subf %1, %6 : vector<128x128xf32>
    %8 = arith.mulf %7, %7 : vector<128x128xf32>
    %cst_3 = arith.constant dense<0.000000e+00> : vector<128xf32>
    %9 = vector.multi_reduction <add>, %8, %cst_3 [1] : vector<128x128xf32> to vector<128xf32>
    %10 = vector.shape_cast %9 : vector<128xf32> to vector<128x1xf32>
    %cst_4 = arith.constant 1.280000e+02 : f32
    %11 = vector.broadcast %cst_4 : f32 to vector<128x1xf32>
    %12 = arith.divf %10, %11 : vector<128x1xf32>
    %13 = vector.broadcast %5 : vector<128x1xf32> to vector<128x128xf32>
    %14 = arith.subf %1, %13 : vector<128x128xf32>
    %cst_5 = arith.constant 9.99999974E-6 : f32
    %15 = vector.broadcast %cst_5 : f32 to vector<128x1xf32>
    %16 = arith.addf %12, %15 : vector<128x1xf32>
    %17 = math.rsqrt %16 : vector<128x1xf32>
    %18 = vector.broadcast %17 : vector<128x1xf32> to vector<128x128xf32>
    %19 = arith.mulf %14, %18 : vector<128x128xf32>
    %c0_6 = arith.constant 0 : index
    %c0_7 = arith.constant 0 : index
    %c0_8 = arith.constant 0 : index
    %20 = vector.load %arg2[%c0_6, %c0_7, %c0_8] : memref<16x8x128xf32, #tpu.memory_space<vmem>>, vector<16x8x128xf32>
    %21 = vector.shape_cast %20 : vector<16x8x128xf32> to vector<128x128xf32>
    %cst_9 = arith.constant dense<0.000000e+00> : vector<128xf32>
    %22 = vector.multi_reduction <add>, %21, %cst_9 [1] : vector<128x128xf32> to vector<128xf32>
    %23 = vector.shape_cast %22 : vector<128xf32> to vector<128x1xf32>
    %cst_10 = arith.constant 1.280000e+02 : f32
    %24 = vector.broadcast %cst_10 : f32 to vector<128x1xf32>
    %25 = arith.divf %23, %24 : vector<128x1xf32>
    %26 = vector.broadcast %25 : vector<128x1xf32> to vector<128x128xf32>
    %27 = arith.subf %21, %26 : vector<128x128xf32>
    %28 = arith.mulf %27, %27 : vector<128x128xf32>
    %cst_11 = arith.constant dense<0.000000e+00> : vector<128xf32>
    %29 = vector.multi_reduction <add>, %28, %cst_11 [1] : vector<128x128xf32> to vector<128xf32>
    %30 = vector.shape_cast %29 : vector<128xf32> to vector<128x1xf32>
    %cst_12 = arith.constant 1.280000e+02 : f32
    %31 = vector.broadcast %cst_12 : f32 to vector<128x1xf32>
    %32 = arith.divf %30, %31 : vector<128x1xf32>
    %33 = vector.broadcast %25 : vector<128x1xf32> to vector<128x128xf32>
    %34 = arith.subf %21, %33 : vector<128x128xf32>
    %cst_13 = arith.constant 9.99999974E-6 : f32
    %35 = vector.broadcast %cst_13 : f32 to vector<128x1xf32>
    %36 = arith.addf %32, %35 : vector<128x1xf32>
    %37 = math.rsqrt %36 : vector<128x1xf32>
    %38 = vector.broadcast %37 : vector<128x1xf32> to vector<128x128xf32>
    %39 = arith.mulf %34, %38 : vector<128x128xf32>
    %40 = arith.truncf %19 : vector<128x128xf32> to vector<128x128xbf16>
    %c0_14 = arith.constant 0 : index
    %c0_15 = arith.constant 0 : index
    %41 = vector.load %arg4[%c0_14, %c0_15] : memref<128x512xbf16, #tpu.memory_space<vmem>>, vector<128x512xbf16>
    %cst_16 = arith.constant dense<0.000000e+00> : vector<128x512xf32>
    %42 = tpu.matmul %40, %41, %cst_16 {dimension_numbers = #tpu.dot_dimension_numbers<[1], [0], [0], [1], [0, 0, 1, 1], [], []>} : vector<128x128xbf16>, vector<128x512xbf16>, vector<128x512xf32> -> vector<128x512xf32>
    %c0_17 = arith.constant 0 : index
    %c0_18 = arith.constant 0 : index
    %43 = vector.load %arg5[%c0_17, %c0_18] : memref<1x512xf32, #tpu.memory_space<vmem>>, vector<1x512xf32>
    %44 = vector.broadcast %43 : vector<1x512xf32> to vector<128x512xf32>
    %45 = arith.addf %42, %44 : vector<128x512xf32>
    %c0_19 = arith.constant 0 : index
    %c0_20 = arith.constant 0 : index
    %46 = vector.load %arg11[%c0_19, %c0_20] : memref<128x512xf32, #tpu.memory_space<vmem>>, vector<128x512xf32>
    tpu.vector_store %arg11[%c0_19, %c0_20], %45 {strides = array<i32>} : memref<128x512xf32, #tpu.memory_space<vmem>>, vector<128x512xf32>,
    %c0_21 = arith.constant 0 : index
    %c384 = arith.constant 384 : index
    %47 = vector.load %arg11[%c0_21, %c384] : memref<128x512xf32, #tpu.memory_space<vmem>>, vector<128x128xf32>
    %48 = arith.negf %47 : vector<128x128xf32>
    %49 = math.exp %48 : vector<128x128xf32>
    %cst_22 = arith.constant 1.000000e+00 : f32
    %50 = vector.broadcast %cst_22 : f32 to vector<128x128xf32>
    %51 = arith.addf %50, %49 : vector<128x128xf32>
    %52 = arith.divf %50, %51 : vector<128x128xf32>
    %c0_23 = arith.constant 0 : index
    %c384_24 = arith.constant 384 : index
    %53 = vector.load %arg11[%c0_23, %c384_24] : memref<128x512xf32, #tpu.memory_space<vmem>>, vector<128x128xf32>
    tpu.vector_store %arg11[%c0_23, %c384_24], %52 {strides = array<i32>} : memref<128x512xf32, #tpu.memory_space<vmem>>, vector<128x128xf32>,
    %54 = arith.truncf %39 : vector<128x128xf32> to vector<128x128xbf16>
    %c0_25 = arith.constant 0 : index
    %c0_26 = arith.constant 0 : index
    %55 = vector.load %arg6[%c0_25, %c0_26] : memref<128x64xbf16, #tpu.memory_space<vmem>>, vector<128x64xbf16>
    %cst_27 = arith.constant dense<0.000000e+00> : vector<128x64xf32>
    %56 = tpu.matmul %54, %55, %cst_27 {dimension_numbers = #tpu.dot_dimension_numbers<[1], [0], [0], [1], [0, 0, 1, 1], [], []>} : vector<128x128xbf16>, vector<128x64xbf16>, vector<128x64xf32> -> vector<128x64xf32>
    %c0_28 = arith.constant 0 : index
    %c0_29 = arith.constant 0 : index
    %57 = vector.load %arg7[%c0_28, %c0_29] : memref<1x64xf32, #tpu.memory_space<vmem>>, vector<1x64xf32>
    %58 = vector.broadcast %57 : vector<1x64xf32> to vector<128x64xf32>
    %59 = arith.addf %56, %58 : vector<128x64xf32>
    %c0_30 = arith.constant 0 : index
    %c0_31 = arith.constant 0 : index
    %60 = vector.load %arg3[%c0_30, %c0_31] : memref<128x128xbf16, #tpu.memory_space<vmem>>, vector<128x128xbf16>
    %61 = arith.truncf %59 : vector<128x64xf32> to vector<128x64xbf16>
    %cst_32 = arith.constant dense<0.000000e+00> : vector<128x64xf32>
    %62 = tpu.matmul %60, %61, %cst_32 {dimension_numbers = #tpu.dot_dimension_numbers<[1], [0], [0], [1], [0, 0, 1, 1], [], []>} : vector<128x128xbf16>, vector<128x64xbf16>, vector<128x64xf32> -> vector<128x64xf32>
    %cst_33 = arith.constant 0.000000e+00 : f32
    %63 = vector.broadcast %cst_33 : f32 to vector<128x128xf32>
    %c0_34 = arith.constant 0 : index
    %c0_35 = arith.constant 0 : index
    %64 = vector.load %arg11[%c0_34, %c0_35] : memref<128x512xf32, #tpu.memory_space<vmem>>, vector<128x32xf32>
    %65 = vector.shape_cast %64 : vector<128x32xf32> to vector<8x16x32xf32>
    %c0_36 = arith.constant 0 : index
    %c128 = arith.constant 128 : index
    %66 = vector.load %arg11[%c0_36, %c128] : memref<128x512xf32, #tpu.memory_space<vmem>>, vector<128x32xf32>
    %67 = vector.shape_cast %66 : vector<128x32xf32> to vector<8x16x32xf32>
    %c0_37 = arith.constant 0 : index
    %c256 = arith.constant 256 : index
    %68 = vector.load %arg11[%c0_37, %c256] : memref<128x512xf32, #tpu.memory_space<vmem>>, vector<128x32xf32>
    %69 = vector.shape_cast %68 : vector<128x32xf32> to vector<8x16x32xf32>
    %c0_38 = arith.constant 0 : index
    %c384_39 = arith.constant 384 : index
    %70 = vector.load %arg11[%c0_38, %c384_39] : memref<128x512xf32, #tpu.memory_space<vmem>>, vector<128x32xf32>
    %71 = vector.extract_strided_slice %62 {offsets = [0, 0], sizes = [128, 16], strides = [1, 1]} : vector<128x64xf32> to vector<128x16xf32>
    %72 = vector.shape_cast %71 : vector<128x16xf32> to vector<8x16x16xf32>
    "tpu.trace_start"() <{level = 10 : i32, message = "ijd,ikd->ijk"}> : () -> ()
    %cst_40 = arith.constant dense<0.000000e+00> : vector<8x16x16xf32>
    %73 = tpu.matmul %65, %67, %cst_40 {dimension_numbers = #tpu.dot_dimension_numbers<[2], [2], [1], [1], [0, 0, 0, 1, 1, 1], [0], [0]>} : vector<8x16x32xf32>, vector<8x16x32xf32>, vector<8x16x16xf32> -> vector<8x16x16xf32>
    "tpu.trace_stop"() : () -> ()
    %74 = arith.addf %73, %72 : vector<8x16x16xf32>
    %cst_41 = arith.constant dense<0xFF800000> : vector<8x16xf32>
    %75 = vector.multi_reduction <maximumf>, %74, %cst_41 [2] : vector<8x16x16xf32> to vector<8x16xf32>
    %76 = vector.shape_cast %75 : vector<8x16xf32> to vector<8x16x1xf32>
    %77 = vector.broadcast %76 : vector<8x16x1xf32> to vector<8x16x16xf32>
    %78 = arith.subf %74, %77 : vector<8x16x16xf32>
    %79 = math.exp %78 : vector<8x16x16xf32>
    %cst_42 = arith.constant dense<0.000000e+00> : vector<8x16xf32>
    %80 = vector.multi_reduction <add>, %79, %cst_42 [2] : vector<8x16x16xf32> to vector<8x16xf32>
    %81 = vector.shape_cast %80 : vector<8x16xf32> to vector<8x16x1xf32>
    %82 = tpu.reciprocal %81 {approx = true} : vector<8x16x1xf32> -> vector<8x16x1xf32>
    %83 = vector.broadcast %82 : vector<8x16x1xf32> to vector<8x16x16xf32>
    %84 = arith.mulf %79, %83 : vector<8x16x16xf32>
    "tpu.trace_start"() <{level = 10 : i32, message = "ijk,ikd->ijd"}> : () -> ()
    %cst_43 = arith.constant dense<0.000000e+00> : vector<8x16x32xf32>
    %85 = tpu.matmul %84, %69, %cst_43 {dimension_numbers = #tpu.dot_dimension_numbers<[2], [1], [1], [2], [0, 0, 0, 1, 1, 2], [0], [0]>} : vector<8x16x16xf32>, vector<8x16x32xf32>, vector<8x16x32xf32> -> vector<8x16x32xf32>
    "tpu.trace_stop"() : () -> ()
    %86 = vector.shape_cast %85 : vector<8x16x32xf32> to vector<128x32xf32>
    %87 = arith.mulf %70, %86 : vector<128x32xf32>
    %88 = arith.truncf %87 : vector<128x32xf32> to vector<128x32xbf16>
    %c0_44 = arith.constant 0 : index
    %c0_45 = arith.constant 0 : index
    %89 = vector.load %arg8[%c0_44, %c0_45] : memref<128x128xbf16, #tpu.memory_space<vmem>>, vector<32x128xbf16>
    %cst_46 = arith.constant dense<0.000000e+00> : vector<128x128xf32>
    %90 = tpu.matmul %88, %89, %cst_46 {dimension_numbers = #tpu.dot_dimension_numbers<[1], [0], [0], [1], [0, 0, 1, 1], [], []>} : vector<128x32xbf16>, vector<32x128xbf16>, vector<128x128xf32> -> vector<128x128xf32>
    %91 = arith.addf %63, %90 : vector<128x128xf32>
    %c0_47 = arith.constant 0 : index
    %c32 = arith.constant 32 : index
    %92 = vector.load %arg11[%c0_47, %c32] : memref<128x512xf32, #tpu.memory_space<vmem>>, vector<128x32xf32>
    %93 = vector.shape_cast %92 : vector<128x32xf32> to vector<8x16x32xf32>
    %c0_48 = arith.constant 0 : index
    %c160 = arith.constant 160 : index
    %94 = vector.load %arg11[%c0_48, %c160] : memref<128x512xf32, #tpu.memory_space<vmem>>, vector<128x32xf32>
    %95 = vector.shape_cast %94 : vector<128x32xf32> to vector<8x16x32xf32>
    %c0_49 = arith.constant 0 : index
    %c288 = arith.constant 288 : index
    %96 = vector.load %arg11[%c0_49, %c288] : memref<128x512xf32, #tpu.memory_space<vmem>>, vector<128x32xf32>
    %97 = vector.shape_cast %96 : vector<128x32xf32> to vector<8x16x32xf32>
    %c0_50 = arith.constant 0 : index
    %c416 = arith.constant 416 : index
    %98 = vector.load %arg11[%c0_50, %c416] : memref<128x512xf32, #tpu.memory_space<vmem>>, vector<128x32xf32>
    %99 = vector.extract_strided_slice %62 {offsets = [0, 16], sizes = [128, 16], strides = [1, 1]} : vector<128x64xf32> to vector<128x16xf32>
    %100 = vector.shape_cast %99 : vector<128x16xf32> to vector<8x16x16xf32>
    "tpu.trace_start"() <{level = 10 : i32, message = "ijd,ikd->ijk"}> : () -> ()
    %cst_51 = arith.constant dense<0.000000e+00> : vector<8x16x16xf32>
    %101 = tpu.matmul %93, %95, %cst_51 {dimension_numbers = #tpu.dot_dimension_numbers<[2], [2], [1], [1], [0, 0, 0, 1, 1, 1], [0], [0]>} : vector<8x16x32xf32>, vector<8x16x32xf32>, vector<8x16x16xf32> -> vector<8x16x16xf32>
    "tpu.trace_stop"() : () -> ()
    %102 = arith.addf %101, %100 : vector<8x16x16xf32>
    %cst_52 = arith.constant dense<0xFF800000> : vector<8x16xf32>
    %103 = vector.multi_reduction <maximumf>, %102, %cst_52 [2] : vector<8x16x16xf32> to vector<8x16xf32>
    %104 = vector.shape_cast %103 : vector<8x16xf32> to vector<8x16x1xf32>
    %105 = vector.broadcast %104 : vector<8x16x1xf32> to vector<8x16x16xf32>
    %106 = arith.subf %102, %105 : vector<8x16x16xf32>
    %107 = math.exp %106 : vector<8x16x16xf32>
    %cst_53 = arith.constant dense<0.000000e+00> : vector<8x16xf32>
    %108 = vector.multi_reduction <add>, %107, %cst_53 [2] : vector<8x16x16xf32> to vector<8x16xf32>
    %109 = vector.shape_cast %108 : vector<8x16xf32> to vector<8x16x1xf32>
    %110 = tpu.reciprocal %109 {approx = true} : vector<8x16x1xf32> -> vector<8x16x1xf32>
    %111 = vector.broadcast %110 : vector<8x16x1xf32> to vector<8x16x16xf32>
    %112 = arith.mulf %107, %111 : vector<8x16x16xf32>
    "tpu.trace_start"() <{level = 10 : i32, message = "ijk,ikd->ijd"}> : () -> ()
    %cst_54 = arith.constant dense<0.000000e+00> : vector<8x16x32xf32>
    %113 = tpu.matmul %112, %97, %cst_54 {dimension_numbers = #tpu.dot_dimension_numbers<[2], [1], [1], [2], [0, 0, 0, 1, 1, 2], [0], [0]>} : vector<8x16x16xf32>, vector<8x16x32xf32>, vector<8x16x32xf32> -> vector<8x16x32xf32>
    "tpu.trace_stop"() : () -> ()
    %114 = vector.shape_cast %113 : vector<8x16x32xf32> to vector<128x32xf32>
    %115 = arith.mulf %98, %114 : vector<128x32xf32>
    %116 = arith.truncf %115 : vector<128x32xf32> to vector<128x32xbf16>
    %c32_55 = arith.constant 32 : index
    %c0_56 = arith.constant 0 : index
    %117 = vector.load %arg8[%c32_55, %c0_56] : memref<128x128xbf16, #tpu.memory_space<vmem>>, vector<32x128xbf16>
    %cst_57 = arith.constant dense<0.000000e+00> : vector<128x128xf32>
    %118 = tpu.matmul %116, %117, %cst_57 {dimension_numbers = #tpu.dot_dimension_numbers<[1], [0], [0], [1], [0, 0, 1, 1], [], []>} : vector<128x32xbf16>, vector<32x128xbf16>, vector<128x128xf32> -> vector<128x128xf32>
    %119 = arith.addf %91, %118 : vector<128x128xf32>
    %c0_58 = arith.constant 0 : index
    %c64 = arith.constant 64 : index
    %120 = vector.load %arg11[%c0_58, %c64] : memref<128x512xf32, #tpu.memory_space<vmem>>, vector<128x32xf32>
    %121 = vector.shape_cast %120 : vector<128x32xf32> to vector<8x16x32xf32>
    %c0_59 = arith.constant 0 : index
    %c192 = arith.constant 192 : index
    %122 = vector.load %arg11[%c0_59, %c192] : memref<128x512xf32, #tpu.memory_space<vmem>>, vector<128x32xf32>
    %123 = vector.shape_cast %122 : vector<128x32xf32> to vector<8x16x32xf32>
    %c0_60 = arith.constant 0 : index
    %c320 = arith.constant 320 : index
    %124 = vector.load %arg11[%c0_60, %c320] : memref<128x512xf32, #tpu.memory_space<vmem>>, vector<128x32xf32>
    %125 = vector.shape_cast %124 : vector<128x32xf32> to vector<8x16x32xf32>
    %c0_61 = arith.constant 0 : index
    %c448 = arith.constant 448 : index
    %126 = vector.load %arg11[%c0_61, %c448] : memref<128x512xf32, #tpu.memory_space<vmem>>, vector<128x32xf32>
    %127 = vector.extract_strided_slice %62 {offsets = [0, 32], sizes = [128, 16], strides = [1, 1]} : vector<128x64xf32> to vector<128x16xf32>
    %128 = vector.shape_cast %127 : vector<128x16xf32> to vector<8x16x16xf32>
    "tpu.trace_start"() <{level = 10 : i32, message = "ijd,ikd->ijk"}> : () -> ()
    %cst_62 = arith.constant dense<0.000000e+00> : vector<8x16x16xf32>
    %129 = tpu.matmul %121, %123, %cst_62 {dimension_numbers = #tpu.dot_dimension_numbers<[2], [2], [1], [1], [0, 0, 0, 1, 1, 1], [0], [0]>} : vector<8x16x32xf32>, vector<8x16x32xf32>, vector<8x16x16xf32> -> vector<8x16x16xf32>
    "tpu.trace_stop"() : () -> ()
    %130 = arith.addf %129, %128 : vector<8x16x16xf32>
    %cst_63 = arith.constant dense<0xFF800000> : vector<8x16xf32>
    %131 = vector.multi_reduction <maximumf>, %130, %cst_63 [2] : vector<8x16x16xf32> to vector<8x16xf32>
    %132 = vector.shape_cast %131 : vector<8x16xf32> to vector<8x16x1xf32>
    %133 = vector.broadcast %132 : vector<8x16x1xf32> to vector<8x16x16xf32>
    %134 = arith.subf %130, %133 : vector<8x16x16xf32>
    %135 = math.exp %134 : vector<8x16x16xf32>
    %cst_64 = arith.constant dense<0.000000e+00> : vector<8x16xf32>
    %136 = vector.multi_reduction <add>, %135, %cst_64 [2] : vector<8x16x16xf32> to vector<8x16xf32>
    %137 = vector.shape_cast %136 : vector<8x16xf32> to vector<8x16x1xf32>
    %138 = tpu.reciprocal %137 {approx = true} : vector<8x16x1xf32> -> vector<8x16x1xf32>
    %139 = vector.broadcast %138 : vector<8x16x1xf32> to vector<8x16x16xf32>
    %140 = arith.mulf %135, %139 : vector<8x16x16xf32>
    "tpu.trace_start"() <{level = 10 : i32, message = "ijk,ikd->ijd"}> : () -> ()
    %cst_65 = arith.constant dense<0.000000e+00> : vector<8x16x32xf32>
    %141 = tpu.matmul %140, %125, %cst_65 {dimension_numbers = #tpu.dot_dimension_numbers<[2], [1], [1], [2], [0, 0, 0, 1, 1, 2], [0], [0]>} : vector<8x16x16xf32>, vector<8x16x32xf32>, vector<8x16x32xf32> -> vector<8x16x32xf32>
    "tpu.trace_stop"() : () -> ()
    %142 = vector.shape_cast %141 : vector<8x16x32xf32> to vector<128x32xf32>
    %143 = arith.mulf %126, %142 : vector<128x32xf32>
    %144 = arith.truncf %143 : vector<128x32xf32> to vector<128x32xbf16>
    %c64_66 = arith.constant 64 : index
    %c0_67 = arith.constant 0 : index
    %145 = vector.load %arg8[%c64_66, %c0_67] : memref<128x128xbf16, #tpu.memory_space<vmem>>, vector<32x128xbf16>
    %cst_68 = arith.constant dense<0.000000e+00> : vector<128x128xf32>
    %146 = tpu.matmul %144, %145, %cst_68 {dimension_numbers = #tpu.dot_dimension_numbers<[1], [0], [0], [1], [0, 0, 1, 1], [], []>} : vector<128x32xbf16>, vector<32x128xbf16>, vector<128x128xf32> -> vector<128x128xf32>
    %147 = arith.addf %119, %146 : vector<128x128xf32>
    %c0_69 = arith.constant 0 : index
    %c96 = arith.constant 96 : index
    %148 = vector.load %arg11[%c0_69, %c96] : memref<128x512xf32, #tpu.memory_space<vmem>>, vector<128x32xf32>
    %149 = vector.shape_cast %148 : vector<128x32xf32> to vector<8x16x32xf32>
    %c0_70 = arith.constant 0 : index
    %c224 = arith.constant 224 : index
    %150 = vector.load %arg11[%c0_70, %c224] : memref<128x512xf32, #tpu.memory_space<vmem>>, vector<128x32xf32>
    %151 = vector.shape_cast %150 : vector<128x32xf32> to vector<8x16x32xf32>
    %c0_71 = arith.constant 0 : index
    %c352 = arith.constant 352 : index
    %152 = vector.load %arg11[%c0_71, %c352] : memref<128x512xf32, #tpu.memory_space<vmem>>, vector<128x32xf32>
    %153 = vector.shape_cast %152 : vector<128x32xf32> to vector<8x16x32xf32>
    %c0_72 = arith.constant 0 : index
    %c480 = arith.constant 480 : index
    %154 = vector.load %arg11[%c0_72, %c480] : memref<128x512xf32, #tpu.memory_space<vmem>>, vector<128x32xf32>
    %155 = vector.extract_strided_slice %62 {offsets = [0, 48], sizes = [128, 16], strides = [1, 1]} : vector<128x64xf32> to vector<128x16xf32>
    %156 = vector.shape_cast %155 : vector<128x16xf32> to vector<8x16x16xf32>
    "tpu.trace_start"() <{level = 10 : i32, message = "ijd,ikd->ijk"}> : () -> ()
    %cst_73 = arith.constant dense<0.000000e+00> : vector<8x16x16xf32>
    %157 = tpu.matmul %149, %151, %cst_73 {dimension_numbers = #tpu.dot_dimension_numbers<[2], [2], [1], [1], [0, 0, 0, 1, 1, 1], [0], [0]>} : vector<8x16x32xf32>, vector<8x16x32xf32>, vector<8x16x16xf32> -> vector<8x16x16xf32>
    "tpu.trace_stop"() : () -> ()
    %158 = arith.addf %157, %156 : vector<8x16x16xf32>
    %cst_74 = arith.constant dense<0xFF800000> : vector<8x16xf32>
    %159 = vector.multi_reduction <maximumf>, %158, %cst_74 [2] : vector<8x16x16xf32> to vector<8x16xf32>
    %160 = vector.shape_cast %159 : vector<8x16xf32> to vector<8x16x1xf32>
    %161 = vector.broadcast %160 : vector<8x16x1xf32> to vector<8x16x16xf32>
    %162 = arith.subf %158, %161 : vector<8x16x16xf32>
    %163 = math.exp %162 : vector<8x16x16xf32>
    %cst_75 = arith.constant dense<0.000000e+00> : vector<8x16xf32>
    %164 = vector.multi_reduction <add>, %163, %cst_75 [2] : vector<8x16x16xf32> to vector<8x16xf32>
    %165 = vector.shape_cast %164 : vector<8x16xf32> to vector<8x16x1xf32>
    %166 = tpu.reciprocal %165 {approx = true} : vector<8x16x1xf32> -> vector<8x16x1xf32>
    %167 = vector.broadcast %166 : vector<8x16x1xf32> to vector<8x16x16xf32>
    %168 = arith.mulf %163, %167 : vector<8x16x16xf32>
    "tpu.trace_start"() <{level = 10 : i32, message = "ijk,ikd->ijd"}> : () -> ()
    %cst_76 = arith.constant dense<0.000000e+00> : vector<8x16x32xf32>
    %169 = tpu.matmul %168, %153, %cst_76 {dimension_numbers = #tpu.dot_dimension_numbers<[2], [1], [1], [2], [0, 0, 0, 1, 1, 2], [0], [0]>} : vector<8x16x16xf32>, vector<8x16x32xf32>, vector<8x16x32xf32> -> vector<8x16x32xf32>
    "tpu.trace_stop"() : () -> ()
    %170 = vector.shape_cast %169 : vector<8x16x32xf32> to vector<128x32xf32>
    %171 = arith.mulf %154, %170 : vector<128x32xf32>
    %172 = arith.truncf %171 : vector<128x32xf32> to vector<128x32xbf16>
    %c96_77 = arith.constant 96 : index
    %c0_78 = arith.constant 0 : index
    %173 = vector.load %arg8[%c96_77, %c0_78] : memref<128x128xbf16, #tpu.memory_space<vmem>>, vector<32x128xbf16>
    %cst_79 = arith.constant dense<0.000000e+00> : vector<128x128xf32>
    %174 = tpu.matmul %172, %173, %cst_79 {dimension_numbers = #tpu.dot_dimension_numbers<[1], [0], [0], [1], [0, 0, 1, 1], [], []>} : vector<128x32xbf16>, vector<32x128xbf16>, vector<128x128xf32> -> vector<128x128xf32>
    %175 = arith.addf %147, %174 : vector<128x128xf32>
    %c0_80 = arith.constant 0 : index
    %c0_81 = arith.constant 0 : index
    %176 = vector.load %arg9[%c0_80, %c0_81] : memref<1x128xf32, #tpu.memory_space<vmem>>, vector<1x128xf32>
    %177 = vector.broadcast %176 : vector<1x128xf32> to vector<128x128xf32>
    %178 = arith.addf %175, %177 : vector<128x128xf32>
    %179 = vector.shape_cast %178 : vector<128x128xf32> to vector<8x16x128xf32>
    %c0_82 = arith.constant 0 : index
    %c0_83 = arith.constant 0 : index
    %c0_84 = arith.constant 0 : index
    %180 = vector.load %arg10[%c0_82, %c0_83, %c0_84] : memref<8x16x128xf32, #tpu.memory_space<vmem>>, vector<8x16x128xf32>
    tpu.vector_store %arg10[%c0_82, %c0_83, %c0_84], %179 {strides = array<i32>} : memref<8x16x128xf32, #tpu.memory_space<vmem>>, vector<8x16x128xf32>,
    return
  }
  func.func @transform_0(%arg0: i32) -> (i32, i32, i32) {
    %c0_i32 = arith.constant 0 : i32
    %c0_i32_0 = arith.constant 0 : i32
    %c0_i32_1 = arith.constant 0 : i32
    return %arg0, %c0_i32, %c0_i32_0 : i32, i32, i32
  }
  func.func @transform_1(%arg0: i32) -> (i32, i32, i32) {
    %c0_i32 = arith.constant 0 : i32
    %c0_i32_0 = arith.constant 0 : i32
    %c0_i32_1 = arith.constant 0 : i32
    return %c0_i32, %arg0, %c0_i32_0 : i32, i32, i32
  }
  func.func @transform_2(%arg0: i32) -> (i32, i32) {
    %c0_i32 = arith.constant 0 : i32
    %c0_i32_0 = arith.constant 0 : i32
    %c0_i32_1 = arith.constant 0 : i32
    return %c0_i32, %c0_i32_0 : i32, i32
  }
  func.func @transform_3(%arg0: i32) -> (i32, i32) {
    %c0_i32 = arith.constant 0 : i32
    %c0_i32_0 = arith.constant 0 : i32
    %c0_i32_1 = arith.constant 0 : i32
    return %c0_i32, %c0_i32_0 : i32, i32
  }
  func.func @transform_4(%arg0: i32) -> (i32, i32) {
    %c0_i32 = arith.constant 0 : i32
    %c0_i32_0 = arith.constant 0 : i32
    %c0_i32_1 = arith.constant 0 : i32
    return %c0_i32, %c0_i32_0 : i32, i32
  }
  func.func @transform_5(%arg0: i32) -> (i32, i32) {
    %c0_i32 = arith.constant 0 : i32
    %c0_i32_0 = arith.constant 0 : i32
    %c0_i32_1 = arith.constant 0 : i32
    return %c0_i32, %c0_i32_0 : i32, i32
  }
  func.func @transform_6(%arg0: i32) -> (i32, i32) {
    %c0_i32 = arith.constant 0 : i32
    %c0_i32_0 = arith.constant 0 : i32
    %c0_i32_1 = arith.constant 0 : i32
    return %c0_i32, %c0_i32_0 : i32, i32
  }
  func.func @transform_7(%arg0: i32) -> (i32, i32) {
    %c0_i32 = arith.constant 0 : i32
    %c0_i32_0 = arith.constant 0 : i32
    %c0_i32_1 = arith.constant 0 : i32
    return %c0_i32, %c0_i32_0 : i32, i32
  }
  func.func @transform_8(%arg0: i32) -> (i32, i32) {
    %c0_i32 = arith.constant 0 : i32
    %c0_i32_0 = arith.constant 0 : i32
    %c0_i32_1 = arith.constant 0 : i32
    return %c0_i32, %c0_i32_0 : i32, i32
  }
  func.func @transform_9(%arg0: i32) -> (i32, i32, i32) {
    %c0_i32 = arith.constant 0 : i32
    %c0_i32_0 = arith.constant 0 : i32
    %c0_i32_1 = arith.constant 0 : i32
    return %arg0, %c0_i32, %c0_i32_0 : i32, i32, i32
  }
}

</mosaic_0001>

<bundles_post_ra>
// kernel: tpu_custom_call.1
= control target key start
LH: loop header
LB: loop body
LE: loop exit
PB: predicated region body
PF: predicated region fallthrough
CT: control target
= control target key end

     0   :  { %s14747_s0 = inlined_call_operand.hbm [shape: f32[16,16,128], index: 0, kind: input, shape index: {}]   ;;  %s14748_s1 = inlined_call_operand.hbm [shape: f32[16,16,128], index: 1, kind: input, shape index: {}]   ;;  %s14749_s2 = inlined_call_operand.vmem [shape: bf16[128,128], index: 2, kind: input, shape index: {}]   ;;  %s14750_s3 = inlined_call_operand.hbm [shape: bf16[128,512], index: 3, kind: input, shape index: {}]   ;;  %s14751_s4 = inlined_call_operand.vmem [shape: f32[1,512], index: 4, kind: input, shape index: {}]   ;;  %s14752_s5 = inlined_call_operand.vmem [shape: bf16[128,64], index: 5, kind: input, shape index: {}]   ;;  %s14753_s6 = inlined_call_operand.vmem [shape: f32[1,64], index: 6, kind: input, shape index: {}]   ;;  %s14754_s7 = inlined_call_operand.hbm [shape: bf16[128,128], index: 7, kind: input, shape index: {}]   ;;  %s14755_s8 = inlined_call_operand.vmem [shape: f32[1,128], index: 8, kind: input, shape index: {}]   ;;  %s14756_s9 = inlined_call_operand.hbm [shape: f32[16,16,128], index: 9, kind: output, shape index: {}]  }
   0x1   :  { %14936 = sst [smem:[#allocation114_spill]] %s14747_s0 }
   0x2   :  { %14937 = sst [smem:[#allocation115_spill]] %s14750_s3 }
   0x3   :  { %14938 = sst [smem:[#allocation116_spill]] %s14754_s7 }
   0x4   :  { %14 = vsyncpa [#allocation4], 0 }
   0x5   :  { %16 = vsyncpa [#allocation4 + $0x1], 0 }
   0x6   :  { %17 = vsyncpa [#allocation7], 0 }
   0x7   :  { %19 = vsyncpa [#allocation7 + $0x1], 0 }
   0x8   :  { %20 = vsyncpa [#allocation10], 0 }
   0x9   :  { %21 = vsyncpa [#allocation5], 0 }
   0xa   :  { %23 = vsyncpa [#allocation5 + $0x1], 0  ;;  %s11830_s30 = smov 0   ;;  %s11832_s10 = smov 0  }
   0xb   :  { %s11834_s11 = smov 0   ;;  %s11836_s12 = smov 0  }
   0xc LB: > { %14939 = sst [smem:[#allocation17_spill]] %s11755_s11  ;;  %s11851_s13 = sadd.s32 4294967295, %s11759_s12   ;;  %s11759_s12 = sphi %s11836_s12, %s15279_s12   ;;  %s11755_s11 = sphi %s11834_s11, %s15284_s11   ;;  %s11751_s10 = sphi %s11832_s10, %s15283_s10   ;;  %s11747_s30 = sphi %s11830_s30, %s15282_s30  }
   0xd   : > { %s9784_s14 = sadd.s32 4294967294, %s11759_s12   ;;  %p49_p0 = scmp.ne.s32.totalorder %s11751_s10, %s11747_s30 }
   0xe   : > { %p14757_p1 = scmp.eq.s32.totalorder %s11851_s13, 0  ;;  %p246_p2 = scmp.eq.s32.totalorder %s11851_s13, 1 }
   0xf   : > { %p252_p3 = scmp.eq.s32.totalorder %s9784_s14, 1  ;;  %p9785_p5 = scmp.ge.s32.totalorder %s11759_s12, 1 }
  0x10   : > { %p11860_p4 = por %p14757_p1, %p49_p0  ;;  %p259_p7 = scmp.lt.s32.totalorder %s11759_s12, 3 }
  0x11   : > { %p11865_p6 = por %p252_p3, %p49_p0  ;;  %s11761_s18 = smov [#allocation8]  }
  0x12   : > { %s14940_s15 = scalar_select %p11860_p4, 1, 0 }
  0x13   : > { %s14941_s16 = scalar_select %p11865_p6, 1, 0 }
  0x14   : > { %p11870_p8 = pnand %p9785_p5, %p259_p7  ;;  %s274_s19 = sshll.u32 %s11761_s18, 4  ;;  %s275_s19 = int_to_ptr.vmem [resolvable:$true] %s274_s19 }
  0x15   : > { %s11762_s21 = smov [#allocation9]   ;;  %s11586_s23 = scalar_lea.vmem %s275_s19, 4096 }
  0x16   : > { %p11047_p9 = pneg %p11870_p8  ;;  %s296_s22 = sshll.u32 %s11762_s21, 4  ;;  %s297_s22 = int_to_ptr.vmem [resolvable:$true] %s296_s22 }
  0x17   : > { %p11587_p13 = scmp.ne.s32.totalorder %s275_s19, %s11586_s23  ;;  %p11594_p5 = scmp.lt.s32.totalorder %s275_s19, %s275_s19 }
  0x18   : > { %p11879_p11 = pnand %p11047_p9, %p14757_p1  ;;  %p11595_p7 = scmp.lt.s32.totalorder %s11586_s23, %s11586_s23 }
  0x1a   : > { %p11577_p12 = pneg %p11879_p11  ;;  %p11596_p10 = por %p11595_p7, %p11594_p5 }
  0x1c   : > { %p11589_p0 = pnand %p11587_p13, %p11577_p12 }
  0x1e   : > { %p11590_p3 = pneg %p11589_p0 }
  0x20   : > { %p11597_p9 = pnand %p11596_p10, %p11590_p3 }
  0x22   : > { %11600 = shalt.err (!%p11597_p9)
}
  0x23   : > { %s14758_s24 = smov 256   ;;  %s11764_s25 = smov 16  }
  0x24   : > { %s14944_s3 = sld [smem:[#allocation115_spill]]  ;;  %s11612_s28 = scalar_lea.vmem %s297_s22, 1024 }
  0x25   : > { %p11613_p1 = scmp.ne.s32.totalorder %s297_s22, %s11612_s28  ;;  %p11620_p5 = scmp.lt.s32.totalorder %s297_s22, %s297_s22 }
  0x26   : > { %p11621_p10 = scmp.lt.s32.totalorder %s11612_s28, %s11612_s28 }
  0x27   : > { %p11615_p13 = pnand %p11613_p1, %p11577_p12 }
  0x28   : > { %p11622_p3 = por %p11621_p10, %p11620_p5 }
  0x29   : > { %p11616_p0 = pneg %p11615_p13 }
  0x2a   : > { %11050 = dma.hbm_to_vmem [thread:$0]  (!%p11879_p11), %s14944_s3, 4096, %s275_s19, [#allocation7], %s14758_s24, %s14758_s24, %s11764_s25  }
  0x2b   : > { %p11623_p7 = pnand %p11622_p3, %p11616_p0 }
  0x2d   : > { %11626 = shalt.err (!%p11623_p7)
}
  0x2e   : > { %s11765_s29 = smov 64   ;;  %s11766_s14 = smov 4  }
  0x2f   : > { %s14945_s7 = sld [smem:[#allocation116_spill]]  ;;  %s11904_s21 = sadd.s32 1, %s11759_s12  }
  0x30   : > { %14946 = sst [smem:[#allocation18_spill]] %s11904_s21  ;;  %s33_s23 = ssub.s32 %s11759_s12, %s11904_s21 }
  0x31   : > { %p34_p1 = scmp.eq.s32.totalorder %s33_s23, 0  ;;  %s36_s25 = sadd.s32 1, %s11755_s11 }
  0x32   : > { %p43_p12 = scmp.ne.s32.totalorder %s11755_s11, %s11751_s10  ;;  %p44_p9 = scmp.eq.s32.totalorder %s11759_s12, 0 }
  0x33   : > { %s11913_s26 = scalar_select %p34_p1, %s11755_s11, %s36_s25  }
  0x34   : > { %p45_p13 = por %p44_p9, %p43_p12  ;;  %p11917_p0 = por %p246_p2, %p43_p12 }
  0x35   : > { %11053 = dma.hbm_to_vmem [thread:$0]  (!%p11879_p11), %s14945_s7, 1024, %s297_s22, [#allocation10], %s11765_s29, %s11765_s29, %s11766_s14  }
  0x36   : > { %14947 = sst [smem:[#allocation19_spill]] %s11913_s26  ;;  %p11067_p5 = scmp.lt.s32.totalorder %s11759_s12, 2 }
  0x37   : > { %s14948_s27 = scalar_select %p11917_p0, 1, 0 }
  0x38   : > { %s313_s20 = sand.u32 1, %s11755_s11   ;;  %s10106_s22 = sshll.u32 %s11759_s12, 11 }
  0x39   : > { %s11923_s28 = sshll.u32 %s313_s20, 7  ;;  %s14949_s0 = sld [smem:[#allocation114_spill]] }
  0x3a   : > { %s317_s19 = scalar_lea.vmem [#allocation3], %s11923_s28  ;;  %p11934_p2 = pnand %p11067_p5, %p45_p13 }
  0x3b   : > { %s325_s23 = sshll.u32 %s317_s19, 4  ;;  %s11938_s24 = scalar_lea.sflag [#allocation4], %s313_s20  ;;  %s11932_s23 = int_to_ptr.vmem [resolvable:$true] %s325_s23 }
  0x3c   : > { %p11629_p10 = pneg %p11934_p2 }
  0x3f   : > { %s11929_s18 = scalar_lea.hbm %s14949_s0, %s10106_s22  ;;  %s11632_s14 = scalar_lea.hbm %s14949_s0, 4096 }
  0x40   : > { %s11627_s3 = scalar_lea.hbm %s11929_s18, 2048  ;;  %p11633_p1 = scmp.lt.s32.totalorder %s11929_s18, %s14949_s0 }
  0x41   : > { %p11628_p11 = scmp.ne.s32.totalorder %s11929_s18, %s11627_s3  ;;  %p11634_p12 = scmp.lt.s32.totalorder %s11632_s14, %s11627_s3 }
  0x43   : > { %p11630_p3 = pnand %p11629_p10, %p11628_p11  ;;  %p11635_p9 = por %p11634_p12, %p11633_p1 }
  0x45   : > { %p11631_p7 = pneg %p11630_p3 }
  0x47   : > { %p11636_p13 = pnand %p11635_p9, %p11631_p7 }
  0x49   : > { %11639 = shalt.err (!%p11636_p13)
}
  0x4a   : > { %s11640_s20 = scalar_lea.vmem %s11932_s23, 2048  ;;  %s11767_s22 = smov [#allocation3]  }
  0x4b   : > { %p11641_p5 = scmp.ne.s32.totalorder %s11932_s23, %s11640_s20  ;;  %s11645_s29 = sshll.u32 %s11767_s22, 4  ;;  %s11646_s29 = int_to_ptr.vmem [resolvable:$false] %s11645_s29 }
  0x4c   : > { %s11647_s26 = scalar_lea.vmem %s11646_s29, 4096  ;;  %p11648_p6 = scmp.lt.s32.totalorder %s11932_s23, %s11646_s29 }
  0x4d   : > { %p11643_p11 = pnand %p11641_p5, %p11629_p10  ;;  %p11649_p0 = scmp.lt.s32.totalorder %s11647_s26, %s11640_s20 }
  0x4f   : > { %p11644_p3 = pneg %p11643_p11  ;;  %p11650_p4 = por %p11649_p0, %p11648_p6 }
  0x51   : > { %p11651_p1 = pnand %p11650_p4, %p11644_p3 }
  0x53   : > { %11654 = shalt.err (!%p11651_p1)
}
  0x54   : > { %s11768_s3 = smov 128   ;;  %s11769_s7 = smov 8  }
  0x55   : > { %11057 = dma.hbm_to_vmem [thread:$0]  (!%p11934_p2), %s11929_s18, 2048, %s11932_s23, %s11938_s24, %s11768_s3, %s11768_s3, %s11769_s7  }
  0x56   : > { %s339_s14 = scalar_lea.vmem [#allocation6], %s11923_s28  ;;  %s335_s19 = sand.u32 1, %s11759_s12  }
  0x57   : > { %s345_s26 = sshll.u32 %s339_s14, 4  ;;  %s9794_s20 = sshll.u32 %s11759_s12, 7  ;;  %s11970_s26 = int_to_ptr.vmem [resolvable:$true] %s345_s26 }
  0x58   : > { %s11976_s0 = scalar_lea.hbm %s14748_s1, %s9794_s20  ;;  %s336_s11 = scalar_lea.sflag [#allocation7], %s335_s19 }
  0x59   : > { %s11655_s21 = scalar_lea.hbm %s11976_s0, 2048  ;;  %s11660_s18 = scalar_lea.hbm %s14748_s1, 4096 }
  0x5a   : > { %p11656_p4 = scmp.ne.s32.totalorder %s11976_s0, %s11655_s21  ;;  %p11661_p7 = scmp.lt.s32.totalorder %s11976_s0, %s14748_s1 }
  0x5b   : > { %p11662_p12 = scmp.lt.s32.totalorder %s11660_s18, %s11655_s21 }
  0x5c   : > { %p11658_p6 = pnand %p11656_p4, %p11629_p10 }
  0x5d   : > { %p11663_p9 = por %p11662_p12, %p11661_p7 }
  0x5e   : > { %p11659_p0 = pneg %p11658_p6 }
  0x60   : > { %p11664_p13 = pnand %p11663_p9, %p11659_p0 }
  0x62   : > { %11667 = shalt.err (!%p11664_p13)
}
  0x63   : > { %s11668_s19 = scalar_lea.vmem %s11970_s26, 2048  ;;  %s11770_s20 = smov [#allocation6]  }
  0x64   : > { %p11669_p5 = scmp.ne.s32.totalorder %s11970_s26, %s11668_s19  ;;  %s11673_s22 = sshll.u32 %s11770_s20, 4  ;;  %s11674_s22 = int_to_ptr.vmem [resolvable:$false] %s11673_s22 }
  0x65   : > { %s11675_s29 = scalar_lea.vmem %s11674_s22, 4096  ;;  %p11676_p1 = scmp.lt.s32.totalorder %s11970_s26, %s11674_s22 }
  0x66   : > { %p11671_p11 = pnand %p11669_p5, %p11629_p10  ;;  %p11677_p4 = scmp.lt.s32.totalorder %s11675_s29, %s11668_s19 }
  0x68   : > { %p11672_p3 = pneg %p11671_p11  ;;  %p11678_p6 = por %p11677_p4, %p11676_p1 }
  0x6a   : > { %p11679_p7 = pnand %p11678_p6, %p11672_p3 }
  0x6c   : > { %11682 = shalt.err (!%p11679_p7)
}
  0x6d   : > { %s14951_s21 = smov 256   ;;  %357 = sbr.rel (%p11870_p8) target bundleno = 4774 (0x12a6), region = 56 }
  0x6e   : > { %11060 = dma.hbm_to_vmem [thread:$0]  (!%p11934_p2), %s11976_s0, 2048, %s11970_s26, %s336_s11, %s14951_s21, %s11768_s3, %s11769_s7  }
  0x72   : > { %s12006_s24 = sand.u32 1, %s11751_s10   ;;  %p14952_p10 = scmp.ne.s32.totalorder %s14940_s15, 0 }
  0x73   : > { %s12009_s28 = sshll.u32 %s12006_s24, 7  ;;  %s360_s18 = scalar_lea.sflag [#allocation4], %s12006_s24 }
  0x74   : > { %s12013_s25 = scalar_lea.vmem [#allocation3], %s12009_s28 }
  0x75   : > { %11726 = dma.done.wait (%p14952_p10), %s360_s18, 2048  }
  0x76   : > { %11728 = vsyncadd (%p14952_p10), %s360_s18, 4294965248  ;;  %s368_s0 = sand.u32 1, %s11851_s13   ;;  %s12021_s17 = scalar_lea.vmem [#allocation6], %s12009_s28 }
  0x77   : > { %s369_s11 = scalar_lea.sflag [#allocation7], %s368_s0 }
  0x78   : > { %11730 = dma.done.wait (%p14952_p10), %s369_s11, 2048  }
  0x79   : > { %11732 = vsyncadd (%p14952_p10), %s369_s11, 4294965248  ;;  %p14953_p8 = scmp.eq.s32.totalorder %s11851_s13, 0 }
  0x7b   : > { %11734 = dma.done.wait (%p14953_p8), [#allocation7], 4096   ;;  %p14954_p2 = pmov %p14953_p8 }
  0x7d   : > { %11736 = vsyncadd (%p14954_p2), [#allocation7], 4294963200  ;;  %p14955_p0 = pmov %p14954_p2 }
  0x7f   : > { %11738 = dma.done.wait (%p14955_p0), [#allocation10], 1024   ;;  %p14956_p12 = pmov %p14955_p0 }
  0x80   : > { %v12036_v0 = vld [vmem:[%s12013_s25] sm:$0xff]  ;;  %v12039_v1 = vld [vmem:[%s12013_s25 + $0x10] sm:$0xff]  ;;  %v12044_v2 = vld [vmem:[%s12013_s25 + $0x8] sm:$0xff]  ;;  %vm1857_vm0 = vcmask 261120   ;;  %s11772_s7 = smov 96   ;;  %vm2554_vm1 = vcmask 130048  }
  0x81   : > { %11740 = vsyncadd (%p14956_p12), [#allocation10], 4294966272  ;;  %439 = vadd.xlane.f32.xlu0 %v12036_v0  ;;  %443 = vadd.xlane.f32.xlu1 %v12039_v1  ;;  %v12047_v3 = vld [vmem:[%s12013_s25 + $0x18] sm:$0xff]  ;;  %v12052_v4 = vld [vmem:[%s12013_s25 + $0x20] sm:$0xff]  ;;  %s11773_s19 = smov 112   ;;  %s11774_s20 = smov 32  }
  0x82   : > { %v12055_v5 = vld [vmem:[%s12013_s25 + $0x28] sm:$0xff]  ;;  %v12058_v6 = vld [vmem:[%s12013_s25 + $0x30] sm:$0xff]  ;;  %v12063_v7 = vld [vmem:[%s12013_s25 + $0x38] sm:$0xff]  ;;  %s11775_s22 = smov 64   ;;  %s11776_s29 = smov 80  }
  0x83   : > { %v12066_v8 = vld [vmem:[%s12013_s25 + $0x40] sm:$0xff]  ;;  %v12069_v9 = vld [vmem:[%s12013_s25 + $0x48] sm:$0xff]  ;;  %v12074_v10 = vld [vmem:[%s12013_s25 + $0x50] sm:$0xff]  ;;  %s14650_s18 = scalar_lea.vmem [#allocation11], %s12009_s28  ;;  %s10108_s28 = sshll.u32 %s11851_s13, 11 }
  0x84   : > { %v12079_v11 = vld [vmem:[%s12013_s25 + $0x58] sm:$0xff]  ;;  %v12082_v12 = vld [vmem:[%s12013_s25 + $0x60] sm:$0xff]  ;;  %v12085_v13 = vld [vmem:[%s12013_s25 + $0x68] sm:$0xff]  ;;  %s9655_s13 = scalar_lea.sflag [#allocation5], %s12006_s24  ;;  %p15276_p13 = scmp.ne.s32.totalorder %s14948_s27, 0 }
  0x85   : > { %441 = vadd.xlane.f32.xlu0 %v12044_v2  ;;  %445 = vadd.xlane.f32.xlu1 %v12047_v3  ;;  %v12090_v14 = vld [vmem:[%s12013_s25 + $0x70] sm:$0xff]  ;;  %v12095_v15 = vld [vmem:[%s12013_s25 + $0x78] sm:$0xff]  ;;  %v12098_v16 = vld [vmem:[%s12021_s17] sm:$0xff]  ;;  %s9669_s25 = sshll.u32 %s14650_s18, 4  ;;  %s11777_s3 = smov [#allocation11]   ;;  %s14701_s25 = int_to_ptr.vmem [resolvable:$true] %s9669_s25 }
  0x86   : > { %v12103_v17 = vld [vmem:[%s12021_s17 + $0x8] sm:$0xff]  ;;  %v12106_v18 = vld [vmem:[%s12021_s17 + $0x10] sm:$0xff]  ;;  %v12109_v19 = vld [vmem:[%s12021_s17 + $0x18] sm:$0xff]  ;;  %s11683_s15 = scalar_lea.vmem %s14701_s25, 2048  ;;  %s11687_s26 = sshll.u32 %s11777_s3, 4  ;;  %s11688_s26 = int_to_ptr.vmem [resolvable:$false] %s11687_s26 }
  0x87   : > { %v12116_v20 = vld [vmem:[%s12021_s17 + $0x20] sm:$0xff]  ;;  %v12119_v21 = vld [vmem:[%s12021_s17 + $0x28] sm:$0xff]  ;;  %v12124_v22 = vld [vmem:[%s12021_s17 + $0x30] sm:$0xff]  ;;  %p11684_p9 = scmp.ne.s32.totalorder %s14701_s25, %s11683_s15  ;;  %s11689_s23 = scalar_lea.vmem %s11688_s26, 4096 }
  0x88   : > { %v12127_v23 = vld [vmem:[%s12021_s17 + $0x38] sm:$0xff]  ;;  %v12132_v24 = vld [vmem:[%s12021_s17 + $0x40] sm:$0xff]  ;;  %v12135_v25 = vld [vmem:[%s12021_s17 + $0x48] sm:$0xff]  ;;  %p11690_p3 = scmp.lt.s32.totalorder %s14701_s25, %s11688_s26  ;;  %p11691_p1 = scmp.lt.s32.totalorder %s11689_s23, %s11683_s15 }
  0x89   : > { %447 = vadd.xlane.f32.xlu0 %v12052_v4  ;;  %449 = vadd.xlane.f32.xlu1 %v12055_v5  ;;  %v12140_v26 = vld [vmem:[%s12021_s17 + $0x50] sm:$0xff]  ;;  %v12143_v27 = vld [vmem:[%s12021_s17 + $0x58] sm:$0xff]  ;;  %v12159_v48 = vld [vmem:[%s12021_s17 + $0x60] sm:$0xff]  ;;  %p11685_p5 = pnand %p11684_p9, %p15276_p13 }
  0x8a   : > { %v11119_v28 = vld [vmem:[#allocation8 + $0xe4] ss:$16 sps:$4 sm:$0xff]   ;;  %v11121_v29 = vld [vmem:[#allocation8 + $0xec] ss:$16 sps:$4 sm:$0xff]   ;;  %v11123_v30 = vld [vmem:[#allocation8 + $0xe0] ss:$16 sps:$4 sm:$0xff]   ;;  %p11692_p4 = por %p11691_p1, %p11690_p3 }
  0x8b   : > { %v11124_v31 = vld [vmem:[#allocation8 + $0xe8] ss:$16 sps:$4 sm:$0xff]   ;;  %v11125_v32 = vld [vmem:[#allocation8 + $0xc4] ss:$16 sps:$4 sm:$0xff]   ;;  %v11127_v33 = vld [vmem:[#allocation8 + $0xcc] ss:$16 sps:$4 sm:$0xff]   ;;  %1030 = vmatprep.subr.bf16.mxu0 %v11119_v28  ;;  %1143 = vmatprep.subr.bf16.mxu1 %v11121_v29  ;;  %p11686_p11 = pneg %p11685_p5 }
  0x8c   : > { %1031 = vmatpush1.bf16.msra.mxu0 %v11123_v30  ;;  %1144 = vmatpush1.bf16.msra.mxu1 %v11124_v31  ;;  %v11129_v34 = vld [vmem:[#allocation8 + $0xc0] ss:$16 sps:$4 sm:$0xff]   ;;  %v11130_v35 = vld [vmem:[#allocation8 + $0xc8] ss:$16 sps:$4 sm:$0xff]  }
  0x8d   : > { %451 = vadd.xlane.f32.xlu0 %v12058_v6  ;;  %453 = vadd.xlane.f32.xlu1 %v12063_v7  ;;  %v12170_v55 = vld [vmem:[%s12021_s17 + $0x68] sm:$0xff]  ;;  %v12179_v62 = vld [vmem:[%s12021_s17 + $0x70] sm:$0xff]  ;;  %p11693_p6 = pnand %p11692_p4, %p11686_p11 }
  0x8e   : > { %1032 = vmatprep.subr.bf16.mxu0 %v11125_v32  ;;  %1145 = vmatprep.subr.bf16.mxu1 %v11127_v33  ;;  %v11135_v28 = vld [vmem:[#allocation8 + $0xa0] ss:$16 sps:$4 sm:$0xff]   ;;  %v11136_v29 = vld [vmem:[#allocation8 + $0xa8] ss:$16 sps:$4 sm:$0xff]  }
  0x8f   : > { %v12191_v33 = vld [vmem:[%s12021_s17 + $0x78] sm:$0xff]  ;;  %s14699_s17 = scalar_lea.hbm %s14756_s9, %s10108_s28 }
  0x90   : > { %1033 = vmatpush1.bf16.msra.mxu0 %v11129_v34  ;;  %1146 = vmatpush1.bf16.msra.mxu1 %v11130_v35 }
  0x91   : > { %455 = vadd.xlane.f32.xlu0 %v12066_v8  ;;  %457 = vadd.xlane.f32.xlu1 %v12069_v9 }
  0x95   : > { %459 = vadd.xlane.f32.xlu0 %v12074_v10  ;;  %461 = vadd.xlane.f32.xlu1 %v12079_v11 }
  0x99   : > { %463 = vadd.xlane.f32.xlu0 %v12082_v12  ;;  %465 = vadd.xlane.f32.xlu1 %v12085_v13 }
  0x9d   : > { %467 = vadd.xlane.f32.xlu0 %v12090_v14  ;;  %469 = vadd.xlane.f32.xlu1 %v12095_v15 }
  0xa1   : > { %632 = vadd.xlane.f32.xlu0 %v12098_v16  ;;  %634 = vadd.xlane.f32.xlu1 %v12103_v17 }
  0xa5   : > { %636 = vadd.xlane.f32.xlu0 %v12106_v18  ;;  %638 = vadd.xlane.f32.xlu1 %v12109_v19 }
  0xa9   : > { %640 = vadd.xlane.f32.xlu0 %v12116_v20  ;;  %642 = vadd.xlane.f32.xlu1 %v12119_v21 }
  0xad   : > { %644 = vadd.xlane.f32.xlu0 %v12124_v22  ;;  %646 = vadd.xlane.f32.xlu1 %v12127_v23 }
  0xb1   : > { %648 = vadd.xlane.f32.xlu0 %v12132_v24  ;;  %650 = vadd.xlane.f32.xlu1 %v12135_v25 }
  0xb5   : > { %652 = vadd.xlane.f32.xlu0 %v12140_v26  ;;  %654 = vadd.xlane.f32.xlu1 %v12143_v27 }
 0x10a   : > { %v440_v36 = vpop.xlane.xlu0 %439  ;;  %v444_v37 = vpop.xlane.xlu1 %443 }
 0x10b   : > { %v472_v38 = vmul.f32 0.0078125, %v440_v36  ;;  %v474_v40 = vmul.f32 0.0078125, %v444_v37  ;;  %v11139_v36 = vld [vmem:[#allocation8 + $0x8c] ss:$16 sps:$4 sm:$0xff]  }
 0x10d   : > { %v12148_v39 = vsub.f32 %v12036_v0, %v472_v38  ;;  %v12156_v47 = vsub.f32 %v12039_v1, %v474_v40  ;;  %v11131_v1 = vld [vmem:[#allocation8 + $0xa4] ss:$16 sps:$4 sm:$0xff]   ;;  %v11141_v40 = vld [vmem:[#allocation8 + $0x80] ss:$16 sps:$4 sm:$0xff]  }
 0x10e   : > { %v442_v41 = vpop.xlane.xlu0 %441  ;;  %v446_v42 = vpop.xlane.xlu1 %445  ;;  %1034 = vmatprep.subr.bf16.mxu0 %v11131_v1 }
 0x10f   : > { %v473_v43 = vmul.f32 0.0078125, %v442_v41  ;;  %v504_v44 = vmul.f32 %v12148_v39, %v12148_v39  ;;  %v475_v46 = vmul.f32 0.0078125, %v446_v42  ;;  %v506_v52 = vmul.f32 %v12156_v47, %v12156_v47  ;;  %1035 = vmatpush1.bf16.msra.mxu0 %v11135_v28  ;;  %v11142_v41 = vld [vmem:[#allocation8 + $0x88] ss:$16 sps:$4 sm:$0xff]   ;;  %v11153_v28 = vld [vmem:[#allocation8 + $0x40] ss:$16 sps:$4 sm:$0xff]  }
 0x111   : > { %520 = vadd.xlane.f32.xlu0 %v504_v44  ;;  %v12153_v45 = vsub.f32 %v12044_v2, %v473_v43  ;;  %v12167_v54 = vsub.f32 %v12047_v3, %v475_v46  ;;  %v11133_v2 = vld [vmem:[#allocation8 + $0xac] ss:$16 sps:$4 sm:$0xff]  }
 0x112   : > { %v448_v49 = vpop.xlane.xlu0 %447  ;;  %v450_v50 = vpop.xlane.xlu1 %449  ;;  %1147 = vmatprep.subr.bf16.mxu1 %v11133_v2 }
 0x113   : > { %v505_v51 = vmul.f32 %v12153_v45, %v12153_v45  ;;  %v476_v53 = vmul.f32 0.0078125, %v448_v49  ;;  %v477_v58 = vmul.f32 0.0078125, %v450_v50  ;;  %v507_v59 = vmul.f32 %v12167_v54, %v12167_v54  ;;  %1148 = vmatpush1.bf16.msra.mxu1 %v11136_v29  ;;  %v11143_v50 = vld [vmem:[#allocation8 + $0x64] ss:$16 sps:$4 sm:$0xff]   ;;  %v11154_v29 = vld [vmem:[#allocation8 + $0x48] ss:$16 sps:$4 sm:$0xff]  }
 0x114   : > { %1149 = vmatprep.subr.bf16.mxu1 %v11139_v36 }
 0x115   : > { %656 = vadd.xlane.f32.xlu0 %v12159_v48  ;;  %522 = vadd.xlane.f32.xlu1 %v505_v51  ;;  %v12176_v61 = vsub.f32 %v12052_v4, %v476_v53  ;;  %v12182_v3 = vsub.f32 %v12055_v5, %v477_v58  ;;  %v11137_v5 = vld [vmem:[#allocation8 + $0x84] ss:$16 sps:$4 sm:$0xff]   ;;  %v11145_v51 = vld [vmem:[#allocation8 + $0x6c] ss:$16 sps:$4 sm:$0xff]  }
 0x116   : > { %v452_v56 = vpop.xlane.xlu0 %451  ;;  %v454_v57 = vpop.xlane.xlu1 %453  ;;  %1036 = vmatprep.subr.bf16.mxu0 %v11137_v5  ;;  %v11157_v5 = vld [vmem:[#allocation8 + $0x2c] ss:$16 sps:$4 sm:$0xff]  }
 0x117   : > { %v478_v60 = vmul.f32 0.0078125, %v452_v56  ;;  %v508_v30 = vmul.f32 %v12176_v61, %v12176_v61  ;;  %v479_v31 = vmul.f32 0.0078125, %v454_v57  ;;  %v509_v37 = vmul.f32 %v12182_v3, %v12182_v3  ;;  %1037 = vmatpush1.bf16.msra.mxu0 %v11141_v40  ;;  %1150 = vmatpush1.bf16.msra.mxu1 %v11142_v41  ;;  %v11147_v56 = vld [vmem:[#allocation8 + $0x60] ss:$16 sps:$4 sm:$0xff]   ;;  %v11148_v57 = vld [vmem:[#allocation8 + $0x68] ss:$16 sps:$4 sm:$0xff]  }
 0x118   : > { %1038 = vmatprep.subr.bf16.mxu0 %v11143_v50  ;;  %1151 = vmatprep.subr.bf16.mxu1 %v11145_v51  ;;  %v11160_v40 = vld [vmem:[#allocation8 + $0x28] ss:$16 sps:$4 sm:$0xff]  }
 0x119   : > { %524 = vadd.xlane.f32.xlu0 %v506_v52  ;;  %658 = vadd.xlane.f32.xlu1 %v12170_v55  ;;  %v12188_v32 = vsub.f32 %v12058_v6, %v478_v60  ;;  %v12199_v43 = vsub.f32 %v12063_v7, %v479_v31 }
 0x11a   : > { %v456_v63 = vpop.xlane.xlu0 %455  ;;  %v458_v0 = vpop.xlane.xlu1 %457 }
 0x11b   : > { %v480_v4 = vmul.f32 0.0078125, %v456_v63  ;;  %v481_v38 = vmul.f32 0.0078125, %v458_v0  ;;  %v510_v6 = vmul.f32 %v12188_v32, %v12188_v32  ;;  %v511_v7 = vmul.f32 %v12199_v43, %v12199_v43  ;;  %1039 = vmatpush1.bf16.msra.mxu0 %v11147_v56  ;;  %1152 = vmatpush1.bf16.msra.mxu1 %v11148_v57  ;;  %v11151_v0 = vld [vmem:[#allocation8 + $0x4c] ss:$16 sps:$4 sm:$0xff]  }
 0x11c   : > { %1153 = vmatprep.subr.bf16.mxu1 %v11151_v0  ;;  %v11163_v56 = vld [vmem:[#allocation8 + $0xc] ss:$16 sps:$4 sm:$0xff]  }
 0x11d   : > { %660 = vadd.xlane.f32.xlu0 %v12179_v62  ;;  %526 = vadd.xlane.f32.xlu1 %v507_v59  ;;  %v12202_v44 = vsub.f32 %v12066_v8, %v480_v4  ;;  %v12205_v53 = vsub.f32 %v12069_v9, %v481_v38  ;;  %v11149_v9 = vld [vmem:[#allocation8 + $0x44] ss:$16 sps:$4 sm:$0xff]   ;;  %v11159_v38 = vld [vmem:[#allocation8 + $0x20] ss:$16 sps:$4 sm:$0xff]  }
 0x11e   : > { %v460_v34 = vpop.xlane.xlu0 %459  ;;  %v462_v35 = vpop.xlane.xlu1 %461  ;;  %1040 = vmatprep.subr.bf16.mxu0 %v11149_v9 }
 0x11f   : > { %v482_v42 = vmul.f32 0.0078125, %v460_v34  ;;  %v483_v52 = vmul.f32 0.0078125, %v462_v35  ;;  %v512_v8 = vmul.f32 %v12202_v44, %v12202_v44  ;;  %v513_v1 = vmul.f32 %v12205_v53, %v12205_v53  ;;  %1041 = vmatpush1.bf16.msra.mxu0 %v11153_v28  ;;  %1154 = vmatpush1.bf16.msra.mxu1 %v11154_v29 }
 0x120   : > { %1155 = vmatprep.subr.bf16.mxu1 %v11157_v5 }
 0x121   : > { %662 = vadd.xlane.f32.xlu1 %v12191_v33  ;;  %528 = vadd.xlane.f32.xlu0 %v508_v30  ;;  %v12212_v59 = vsub.f32 %v12074_v10, %v482_v42  ;;  %v12217_v2 = vsub.f32 %v12079_v11, %v483_v52  ;;  %v11155_v11 = vld [vmem:[#allocation8 + $0x24] ss:$16 sps:$4 sm:$0xff]  }
 0x122   : > { %v464_v46 = vpop.xlane.xlu0 %463  ;;  %v466_v49 = vpop.xlane.xlu1 %465  ;;  %1042 = vmatprep.subr.bf16.mxu0 %v11155_v11  ;;  %v11161_v52 = vld [vmem:[#allocation8 + $0x4] ss:$16 sps:$4 sm:$0xff]  }
 0x123   : > { %v484_v58 = vmul.f32 0.0078125, %v464_v46  ;;  %v514_v10 = vmul.f32 %v12212_v59, %v12212_v59  ;;  %v485_v30 = vmul.f32 0.0078125, %v466_v49  ;;  %v515_v36 = vmul.f32 %v12217_v2, %v12217_v2  ;;  %1043 = vmatpush1.bf16.msra.mxu0 %v11159_v38  ;;  %1156 = vmatpush1.bf16.msra.mxu1 %v11160_v40 }
 0x124   : > { %1044 = vmatprep.subr.bf16.mxu0 %v11161_v52  ;;  %1157 = vmatprep.subr.bf16.mxu1 %v11163_v56 }
 0x125   : > { %530 = vadd.xlane.f32.xlu1 %v509_v37  ;;  %532 = vadd.xlane.f32.xlu0 %v510_v6  ;;  %v12222_v4 = vsub.f32 %v12082_v12, %v484_v58  ;;  %v12229_v6 = vsub.f32 %v12085_v13, %v485_v30  ;;  %v11166_v58 = vld [vmem:[#allocation8 + $0x8] ss:$16 sps:$4 sm:$0xff]   ;;  %v11771_v30 = vmov 0  }
 0x126   : > { %v468_v60 = vpop.xlane.xlu0 %467  ;;  %v470_v63 = vpop.xlane.xlu1 %469  ;;  %1062 = vmatprep.mubr.bf16.mxu0 %v11771_v30  ;;  %1175 = vmatprep.mubr.bf16.mxu1 %v11771_v30 }
 0x127   : > { %v486_v31 = vmul.f32 0.0078125, %v468_v60  ;;  %v487_v37 = vmul.f32 0.0078125, %v470_v63  ;;  %v516_v12 = vmul.f32 %v12222_v4, %v12222_v4  ;;  %v517_v13 = vmul.f32 %v12229_v6, %v12229_v6  ;;  %1158 = vmatpush1.bf16.msra.mxu1 %v11166_v58 }
 0x129   : > { %534 = vadd.xlane.f32.xlu1 %v511_v7  ;;  %536 = vadd.xlane.f32.xlu0 %v512_v8  ;;  %v12232_v42 = vsub.f32 %v12090_v14, %v486_v31  ;;  %v12235_v51 = vsub.f32 %v12095_v15, %v487_v37  ;;  %v11165_v8 = vld [vmem:[#allocation8] ss:$16 sps:$4 sm:$0xff]  }
 0x12a   : > { %v633_v34 = vpop.xlane.xlu0 %632  ;;  %v635_v35 = vpop.xlane.xlu1 %634  ;;  %1045 = vmatpush1.bf16.msra.mxu0 %v11165_v8 }
 0x12b   : > { %v664_v41 = vmul.f32 0.0078125, %v633_v34  ;;  %v665_v50 = vmul.f32 0.0078125, %v635_v35  ;;  %v518_v14 = vmul.f32 %v12232_v42, %v12232_v42  ;;  %v519_v15 = vmul.f32 %v12235_v51, %v12235_v51 }
 0x12d   : > { %538 = vadd.xlane.f32.xlu1 %v513_v1  ;;  %540 = vadd.xlane.f32.xlu0 %v514_v10  ;;  %v12242_v7 = vsub.f32 %v12098_v16, %v664_v41  ;;  %v12247_v9 = vsub.f32 %v12103_v17, %v665_v50 }
 0x12e   : > { %v637_v46 = vpop.xlane.xlu0 %636  ;;  %v639_v49 = vpop.xlane.xlu1 %638 }
 0x12f   : > { %v666_v57 = vmul.f32 0.0078125, %v637_v46  ;;  %v696_v16 = vmul.f32 %v12242_v7, %v12242_v7  ;;  %v667_v0 = vmul.f32 0.0078125, %v639_v49  ;;  %v697_v17 = vmul.f32 %v12247_v9, %v12247_v9 }
 0x131   : > { %542 = vadd.xlane.f32.xlu1 %v515_v36  ;;  %544 = vadd.xlane.f32.xlu0 %v516_v12  ;;  %v12252_v28 = vsub.f32 %v12106_v18, %v666_v57  ;;  %v12261_v18 = vsub.f32 %v12109_v19, %v667_v0 }
 0x132   : > { %v641_v60 = vpop.xlane.xlu0 %640  ;;  %v643_v63 = vpop.xlane.xlu1 %642 }
 0x133   : > { %v668_v1 = vmul.f32 0.0078125, %v641_v60  ;;  %v669_v31 = vmul.f32 0.0078125, %v643_v63  ;;  %v698_v34 = vmul.f32 %v12252_v28, %v12252_v28  ;;  %v699_v40 = vmul.f32 %v12261_v18, %v12261_v18 }
 0x135   : > { %546 = vadd.xlane.f32.xlu1 %v517_v13  ;;  %548 = vadd.xlane.f32.xlu0 %v518_v14  ;;  %v12264_v11 = vsub.f32 %v12116_v20, %v668_v1  ;;  %v12267_v37 = vsub.f32 %v12119_v21, %v669_v31 }
 0x136   : > { %v645_v29 = vpop.xlane.xlu0 %644  ;;  %v647_v10 = vpop.xlane.xlu1 %646 }
 0x137   : > { %v670_v35 = vmul.f32 0.0078125, %v645_v29  ;;  %v671_v36 = vmul.f32 0.0078125, %v647_v10  ;;  %v700_v12 = vmul.f32 %v12264_v11, %v12264_v11  ;;  %v701_v46 = vmul.f32 %v12267_v37, %v12267_v37 }
 0x139   : > { %550 = vadd.xlane.f32.xlu1 %v519_v15  ;;  %712 = vadd.xlane.f32.xlu0 %v696_v16  ;;  %v12274_v19 = vsub.f32 %v12124_v22, %v670_v35  ;;  %v12279_v21 = vsub.f32 %v12127_v23, %v671_v36 }
 0x13a   : > { %v649_v5 = vpop.xlane.xlu0 %648  ;;  %v651_v38 = vpop.xlane.xlu1 %650 }
 0x13b   : > { %v672_v41 = vmul.f32 0.0078125, %v649_v5  ;;  %v702_v49 = vmul.f32 %v12274_v19, %v12274_v19  ;;  %v673_v50 = vmul.f32 0.0078125, %v651_v38  ;;  %v703_v22 = vmul.f32 %v12279_v21, %v12279_v21 }
 0x13d   : > { %714 = vadd.xlane.f32.xlu1 %v697_v17  ;;  %716 = vadd.xlane.f32.xlu0 %v698_v34  ;;  %v12284_v56 = vsub.f32 %v12132_v24, %v672_v41  ;;  %v12291_v57 = vsub.f32 %v12135_v25, %v673_v50 }
 0x13e   : > { %v653_v20 = vpop.xlane.xlu0 %652  ;;  %v655_v13 = vpop.xlane.xlu1 %654 }
 0x13f   : > { %v674_v52 = vmul.f32 0.0078125, %v653_v20  ;;  %v704_v23 = vmul.f32 %v12284_v56, %v12284_v56  ;;  %v675_v14 = vmul.f32 0.0078125, %v655_v13  ;;  %v705_v24 = vmul.f32 %v12291_v57, %v12291_v57 }
 0x141   : > { %718 = vadd.xlane.f32.xlu1 %v699_v40  ;;  %720 = vadd.xlane.f32.xlu0 %v700_v12  ;;  %v12294_v8 = vsub.f32 %v12140_v26, %v674_v52  ;;  %v12301_v60 = vsub.f32 %v12143_v27, %v675_v14  ;;  %v12308_v26 = vld [vmem:[%s14752_s5 + $0x38] sm:$0xff]  }
 0x142   : > { %10437 = vmatprep.subr.bf16.mxu0 %v12308_v26 }
 0x143   : > { %v706_v58 = vmul.f32 %v12294_v8, %v12294_v8  ;;  %v707_v25 = vmul.f32 %v12301_v60, %v12301_v60 }
 0x145   : > { %722 = vadd.xlane.f32.xlu1 %v701_v46  ;;  %724 = vadd.xlane.f32.xlu0 %v702_v49 }
 0x149   : > { %726 = vadd.xlane.f32.xlu1 %v703_v22  ;;  %728 = vadd.xlane.f32.xlu0 %v704_v23 }
 0x14d   : > { %730 = vadd.xlane.f32.xlu1 %v705_v24  ;;  %732 = vadd.xlane.f32.xlu0 %v706_v58 }
 0x151   : > { %734 = vadd.xlane.f32.xlu1 %v707_v25 }
 0x19a   : > { %v521_v63 = vpop.xlane.xlu0 %520 }
 0x19b   : > { %v552_v15 = vmul.f32 0.0078125, %v521_v63 }
 0x19d   : > { %v568_v16 = vadd.f32 1e-05, %v552_v15 }
 0x19e   : > { %v523_v0 = vpop.xlane.xlu1 %522  ;;  %v657_v1 = vpop.xlane.xlu0 %656 }
 0x19f   : > { %v553_v27 = vmul.f32 0.0078125, %v523_v0  ;;  %v676_v29 = vmul.f32 0.0078125, %v657_v1  ;;  %11191 = vrsqrt.f32 %v568_v16 }
 0x1a1   : > { %v569_v10 = vadd.f32 1e-05, %v553_v27  ;;  %v12312_v17 = vsub.f32 %v12159_v48, %v676_v29 }
 0x1a2   : > { %v659_v31 = vpop.xlane.xlu1 %658  ;;  %v525_v34 = vpop.xlane.xlu0 %524 }
 0x1a3   : > { %11193 = vrsqrt.f32 %v569_v10  ;;  %v677_v35 = vmul.f32 0.0078125, %v659_v31  ;;  %v554_v5 = vmul.f32 0.0078125, %v525_v34  ;;  %v708_v36 = vmul.f32 %v12312_v17, %v12312_v17 }
 0x1a5   : > { %v570_v38 = vadd.f32 1e-05, %v554_v5  ;;  %736 = vadd.xlane.f32.xlu0 %v708_v36  ;;  %v12317_v40 = vsub.f32 %v12170_v55, %v677_v35  ;;  %v11168_v35 = vld [vmem:[%s14752_s5 + $0x30] sm:$0xff]  }
 0x1a6   : > { %v527_v12 = vpop.xlane.xlu1 %526  ;;  %v661_v41 = vpop.xlane.xlu0 %660 }
 0x1a7   : > { %v555_v20 = vmul.f32 0.0078125, %v527_v12  ;;  %v678_v46 = vmul.f32 0.0078125, %v661_v41  ;;  %v709_v48 = vmul.f32 %v12317_v40, %v12317_v40  ;;  %11195 = vrsqrt.f32 %v570_v38 }
 0x1a9   : > { %v571_v49 = vadd.f32 1e-05, %v555_v20  ;;  %738 = vadd.xlane.f32.xlu1 %v709_v48  ;;  %v12322_v50 = vsub.f32 %v12179_v62, %v678_v46  ;;  %v11169_v20 = vld [vmem:[%s14752_s5 + $0x28] sm:$0xff]  }
 0x1aa   : > { %v663_v52 = vpop.xlane.xlu1 %662  ;;  %v529_v13 = vpop.xlane.xlu0 %528 }
 0x1ab   : > { %11197 = vrsqrt.f32 %v571_v49  ;;  %v679_v22 = vmul.f32 0.0078125, %v663_v52  ;;  %v556_v23 = vmul.f32 0.0078125, %v529_v13  ;;  %v710_v55 = vmul.f32 %v12322_v50, %v12322_v50 }
 0x1ac   : > { %v11192_v14 = vpop.eup %11191 }
 0x1ad   : > { %v572_v24 = vadd.f32 1e-05, %v556_v23  ;;  %740 = vadd.xlane.f32.xlu0 %v710_v55  ;;  %v12327_v58 = vsub.f32 %v12191_v33, %v679_v22  ;;  %v600_v0 = vmul.f32 %v11192_v14, %v12148_v39 }
 0x1ae   : > { %v531_v25 = vpop.xlane.xlu1 %530  ;;  %v533_v63 = vpop.xlane.xlu0 %532 }
 0x1af   : > { %v557_v15 = vmul.f32 0.0078125, %v531_v25  ;;  %v711_v62 = vmul.f32 %v12327_v58, %v12327_v58  ;;  %11199 = vrsqrt.f32 %v572_v24  ;;  %v558_v27 = vmul.f32 0.0078125, %v533_v63  ;;  %v11171_v25 = vld [vmem:[%s14752_s5 + $0x18] sm:$0xff]  }
 0x1b0   : > { %v11194_v16 = vpop.eup %11193 }
 0x1b1   : > { %v573_v1 = vadd.f32 1e-05, %v557_v15  ;;  %742 = vadd.xlane.f32.xlu1 %v711_v62  ;;  %v601_v29 = vmul.f32 %v11194_v16, %v12153_v45  ;;  %v574_v5 = vadd.f32 1e-05, %v558_v27 }
 0x1b2   : > { %v535_v10 = vpop.xlane.xlu1 %534  ;;  %v537_v31 = vpop.xlane.xlu0 %536 }
 0x1b3   : > { %11201 = vrsqrt.f32 %v573_v1  ;;  %v559_v33 = vmul.f32 0.0078125, %v535_v10  ;;  %v808_v34 = vpack.c.bf16 %v601_v29, %v600_v0  ;;  %v560_v46 = vmul.f32 0.0078125, %v537_v31  ;;  %v11172_v10 = vld [vmem:[%s14752_s5 + $0x10] sm:$0xff]  }
 0x1b4   : > { %v11196_v39 = vpop.eup %11195 }
 0x1b5   : > { %v575_v36 = vadd.f32 1e-05, %v559_v33  ;;  %1063 = vmatmul.mubr.bf16.vlgmr.msra.gmra.mxu0 %v808_v34  ;;  %1176 = vmatmul.mubr.bf16.vlgmr.msra.gmra.mxu1 %v808_v34  ;;  %v602_v48 = vmul.f32 %v11196_v39, %v12156_v47  ;;  %v576_v55 = vadd.f32 1e-05, %v560_v46 }
 0x1b6   : > { %v539_v38 = vpop.xlane.xlu1 %538  ;;  %v541_v12 = vpop.xlane.xlu0 %540  ;;  %1072 = vmatprep.mubr.bf16.mxu0 %v11771_v30  ;;  %1185 = vmatprep.mubr.bf16.mxu1 %v11771_v30 }
 0x1b7   : > { %11203 = vrsqrt.f32 %v575_v36  ;;  %v561_v45 = vmul.f32 0.0078125, %v539_v38  ;;  %10438 = vmatpush3.bf16.msra.mxu0 %v12308_v26  ;;  %v11170_v26 = vld [vmem:[%s14752_s5 + $0x20] sm:$0xff]   ;;  %v562_v63 = vmul.f32 0.0078125, %v541_v12 }
 0x1b8   : > { %v11198_v41 = vpop.eup %11197  ;;  %10439 = vmatprep.subr.bf16.mxu0 %v11168_v35  ;;  %11205 = vrsqrt.f32 %v574_v5  ;;  %v11173_v5 = vld [vmem:[%s14752_s5 + $0x8] sm:$0xff]  }
 0x1b9   : > { %v603_v49 = vmul.f32 %v11198_v41, %v12167_v54  ;;  %v577_v13 = vadd.f32 1e-05, %v561_v45  ;;  %v578_v31 = vadd.f32 1e-05, %v562_v63 }
 0x1ba   : > { %v543_v52 = vpop.xlane.xlu1 %542  ;;  %v545_v22 = vpop.xlane.xlu0 %544 }
 0x1bb   : > { %v809_v23 = vpack.c.bf16 %v603_v49, %v602_v48  ;;  %10440 = vmatpush3.bf16.msra.mxu0 %v11168_v35  ;;  %11207 = vrsqrt.f32 %v577_v13  ;;  %v563_v47 = vmul.f32 0.0078125, %v543_v52  ;;  %v564_v36 = vmul.f32 0.0078125, %v545_v22 }
 0x1bc   : > { %10441 = vmatprep.subr.bf16.mxu0 %v11169_v20  ;;  %v11200_v14 = vpop.eup %11199  ;;  %11209 = vrsqrt.f32 %v576_v55 }
 0x1bd   : > { %1073 = vmatmul.mubr.bf16.gmra.mxu0 %v809_v23  ;;  %1186 = vmatmul.mubr.bf16.gmra.mxu1 %v809_v23  ;;  %v604_v62 = vmul.f32 %v11200_v14, %v12176_v61  ;;  %v579_v1 = vadd.f32 1e-05, %v563_v47 }
 0x1be   : > { %v547_v24 = vpop.xlane.xlu1 %546  ;;  %1082 = vmatprep.mubr.bf16.mxu0 %v11771_v30  ;;  %1195 = vmatprep.mubr.bf16.mxu1 %v11771_v30  ;;  %v549_v15 = vpop.xlane.xlu0 %548 }
 0x1bf   : > { %10442 = vmatpush3.bf16.msra.mxu0 %v11169_v20  ;;  %11211 = vrsqrt.f32 %v579_v1  ;;  %v565_v61 = vmul.f32 0.0078125, %v547_v24  ;;  %v580_v20 = vadd.f32 1e-05, %v564_v36  ;;  %v566_v13 = vmul.f32 0.0078125, %v549_v15 }
 0x1c0   : > { %v11202_v54 = vpop.eup %11201  ;;  %10443 = vmatprep.subr.bf16.mxu0 %v11170_v26  ;;  %11213 = vrsqrt.f32 %v578_v31 }
 0x1c1   : > { %v605_v16 = vmul.f32 %v11202_v54, %v12182_v3  ;;  %v581_v38 = vadd.f32 1e-05, %v565_v61 }
 0x1c2   : > { %v551_v0 = vpop.xlane.xlu1 %550  ;;  %v713_v3 = vpop.xlane.xlu0 %712 }
 0x1c3   : > { %v810_v27 = vpack.c.bf16 %v605_v16, %v604_v62  ;;  %10444 = vmatpush3.bf16.msra.mxu0 %v11170_v26  ;;  %11215 = vrsqrt.f32 %v581_v38  ;;  %v744_v26 = vmul.f32 0.0078125, %v713_v3 }
 0x1c4   : > { %v11204_v29 = vpop.eup %11203  ;;  %10445 = vmatprep.subr.bf16.mxu0 %v11171_v25  ;;  %11217 = vrsqrt.f32 %v580_v20 }
 0x1c5   : > { %1083 = vmatmul.mubr.bf16.gmra.mxu0 %v810_v27  ;;  %1196 = vmatmul.mubr.bf16.gmra.mxu1 %v810_v27  ;;  %v11206_v33 = vpop.eup %11205  ;;  %v607_v35 = vmul.f32 %v11204_v29, %v12199_v43  ;;  %v11174_v43 = vld [vmem:[%s14752_s5] sm:$0xff]  }
 0x1c6   : > { %v715_v34 = vpop.xlane.xlu1 %714  ;;  %1092 = vmatprep.mubr.bf16.mxu0 %v11771_v30  ;;  %1205 = vmatprep.mubr.bf16.mxu1 %v11771_v30  ;;  %v606_v39 = vmul.f32 %v11206_v33, %v12188_v32  ;;  %v717_v46 = vpop.xlane.xlu0 %716  ;;  %v567_v32 = vmul.f32 0.0078125, %v551_v0 }
 0x1c7   : > { %10446 = vmatpush3.bf16.msra.mxu0 %v11171_v25  ;;  %v745_v52 = vmul.f32 0.0078125, %v715_v34  ;;  %v582_v25 = vadd.f32 1e-05, %v566_v13  ;;  %v746_v0 = vmul.f32 0.0078125, %v717_v46 }
 0x1c8   : > { %10447 = vmatprep.subr.bf16.mxu0 %v11172_v10  ;;  %v811_v45 = vpack.c.bf16 %v607_v35, %v606_v39  ;;  %v11208_v41 = vpop.eup %11207  ;;  %v583_v55 = vadd.f32 1e-05, %v567_v32 }
 0x1c9   : > { %v11210_v48 = vpop.eup %11209  ;;  %v609_v49 = vmul.f32 %v11208_v41, %v12205_v53  ;;  %v761_v54 = vadd.f32 1e-05, %v745_v52  ;;  %v760_v53 = vadd.f32 1e-05, %v744_v26  ;;  %v762_v61 = vadd.f32 1e-05, %v746_v0 }
 0x1ca   : > { %v719_v12 = vpop.xlane.xlu1 %718  ;;  %v608_v23 = vmul.f32 %v11210_v48, %v12202_v44  ;;  %v721_v14 = vpop.xlane.xlu0 %720  ;;  %11219 = vrsqrt.f32 %v583_v55 }
 0x1cb   : > { %10448 = vmatpush3.bf16.msra.mxu0 %v11172_v10  ;;  %v747_v15 = vmul.f32 0.0078125, %v719_v12  ;;  %11221 = vrsqrt.f32 %v761_v54  ;;  %v748_v29 = vmul.f32 0.0078125, %v721_v14 }
 0x1cc   : > { %10449 = vmatprep.subr.bf16.mxu0 %v11173_v5  ;;  %v812_v24 = vpack.c.bf16 %v609_v49, %v608_v23  ;;  %v11212_v47 = vpop.eup %11211  ;;  %11223 = vrsqrt.f32 %v582_v25 }
 0x1cd   : > { %1093 = vmatmul.mubr.bf16.gmra.mxu0 %v811_v45  ;;  %1206 = vmatmul.mubr.bf16.gmra.mxu1 %v811_v45  ;;  %v11214_v63 = vpop.eup %11213  ;;  %v611_v44 = vmul.f32 %v11212_v47, %v12217_v2  ;;  %11225 = vrsqrt.f32 %v760_v53  ;;  %v763_v10 = vadd.f32 1e-05, %v747_v15 }
 0x1ce   : > { %1102 = vmatprep.mubr.bf16.mxu0 %v11771_v30  ;;  %1215 = vmatprep.mubr.bf16.mxu1 %v11771_v30  ;;  %v723_v22 = vpop.xlane.xlu1 %722  ;;  %v725_v1 = vpop.xlane.xlu0 %724  ;;  %v610_v27 = vmul.f32 %v11214_v63, %v12212_v59 }
 0x1cf   : > { %10450 = vmatpush3.bf16.msra.mxu0 %v11173_v5  ;;  %v749_v16 = vmul.f32 0.0078125, %v723_v22  ;;  %v764_v5 = vadd.f32 1e-05, %v748_v29  ;;  %11227 = vrsqrt.f32 %v763_v10  ;;  %v750_v38 = vmul.f32 0.0078125, %v725_v1 }
 0x1d0   : > { %10451 = vmatprep.subr.bf16.mxu0 %v11174_v43  ;;  %v813_v31 = vpack.c.bf16 %v611_v44, %v610_v27  ;;  %v11216_v33 = vpop.eup %11215 }
 0x1d1   : > { %v765_v34 = vadd.f32 1e-05, %v749_v16  ;;  %v11218_v35 = vpop.eup %11217  ;;  %v613_v59 = vmul.f32 %v11216_v33, %v12229_v6  ;;  %v766_v49 = vadd.f32 1e-05, %v750_v38 }
 0x1d2   : > { %v727_v62 = vpop.xlane.xlu1 %726  ;;  %v729_v36 = vpop.xlane.xlu0 %728  ;;  %v612_v12 = vmul.f32 %v11218_v35, %v12222_v4 }
 0x1d3   : > { %10452 = vmatpush3.bf16.msra.mxu0 %v11174_v43  ;;  %v751_v2 = vmul.f32 0.0078125, %v727_v62  ;;  %11229 = vrsqrt.f32 %v765_v34  ;;  %v752_v45 = vmul.f32 0.0078125, %v729_v36  ;;  %v850_v62 = vlaneseq }
 0x1d4   : > { %11231 = vrsqrt.f32 %v762_v61  ;;  %v814_v43 = vpack.c.bf16 %v613_v59, %v612_v12 }
 0x1d5   : > { %1103 = vmatmul.mubr.bf16.gmra.mxu0 %v812_v24  ;;  %1216 = vmatmul.mubr.bf16.gmra.mxu1 %v812_v24  ;;  %11233 = vrsqrt.f32 %v764_v5  ;;  %v767_v41 = vadd.f32 1e-05, %v751_v2  ;;  %v768_v13 = vadd.f32 1e-05, %v752_v45  ;;  %v12389_v0 = vshrl.u32 %v850_v62, 7 }
 0x1d6   : > { %1112 = vmatprep.mubr.bf16.mxu0 %v11771_v30  ;;  %1225 = vmatprep.mubr.bf16.mxu1 %v11771_v30  ;;  %v731_v3 = vpop.xlane.xlu1 %730  ;;  %v733_v6 = vpop.xlane.xlu0 %732 }
 0x1d7   : > { %v753_v39 = vmul.f32 0.0078125, %v731_v3  ;;  %v11220_v20 = vpop.eup %11219  ;;  %11235 = vrsqrt.f32 %v767_v41  ;;  %v754_v55 = vmul.f32 0.0078125, %v733_v6  ;;  %v864_v10 = vsub.s32 3, %v12389_v0 }
 0x1d8   : > { %v11222_v32 = vpop.eup %11221  ;;  %v615_v23 = vmul.f32 %v11220_v20, %v12235_v51 }
 0x1d9   : > { %v769_v46 = vadd.f32 1e-05, %v753_v39  ;;  %v11224_v52 = vpop.eup %11223  ;;  %v793_v26 = vmul.f32 %v11222_v32, %v12247_v9  ;;  %v770_v53 = vadd.f32 1e-05, %v754_v55  ;;  %v856_v55 = vsub.s32 1, %v12389_v0 }
 0x1da   : > { %v735_v48 = vpop.xlane.xlu1 %734  ;;  %v11226_v22 = vpop.eup %11225  ;;  %v614_v14 = vmul.f32 %v11224_v52, %v12232_v42 }
 0x1db   : > { %v755_v4 = vmul.f32 0.0078125, %v735_v48  ;;  %11237 = vrsqrt.f32 %v769_v46  ;;  %v792_v24 = vmul.f32 %v11226_v22, %v12242_v7 }
 0x1dc   : > { %11239 = vrsqrt.f32 %v766_v49  ;;  %v815_v54 = vpack.c.bf16 %v615_v23, %v614_v14  ;;  %v11228_v25 = vpop.eup %11227 }
 0x1dd   : > { %1113 = vmatmul.mubr.bf16.gmra.mxu0 %v813_v31  ;;  %1226 = vmatmul.mubr.bf16.gmra.mxu1 %v813_v31  ;;  %11241 = vrsqrt.f32 %v768_v13  ;;  %v771_v47 = vadd.f32 1e-05, %v755_v4  ;;  %v1448_v63 = vpack.c.bf16 %v793_v26, %v792_v24  ;;  %v795_v9 = vmul.f32 %v11228_v25, %v12261_v18  ;;  %v12395_v18 = vld [vmem:[%s14751_s4] sm:$0xf] }
 0x1de   : > { %1122 = vmatprep.mubr.bf16.mxu0 %v11771_v30  ;;  %1235 = vmatprep.mubr.bf16.mxu1 %v11771_v30  ;;  %v852_v26 = vsub.s32 0, %v12389_v0 }
 0x1df   : > { %11243 = vrsqrt.f32 %v771_v47 }
 0x1e0   : > { %11245 = vrsqrt.f32 %v770_v53  ;;  %v12413_v14 = vrot.slane %v12395_v18, %v852_v26 }
 0x1e5   : > { %1123 = vmatmul.mubr.bf16.gmra.mxu0 %v814_v43  ;;  %1236 = vmatmul.mubr.bf16.gmra.mxu1 %v814_v43 }
 0x1e6   : > { %1132 = vmatprep.mubr.bf16.mxu0 %v11771_v30  ;;  %1245 = vmatprep.mubr.bf16.mxu1 %v11771_v30  ;;  %v11230_v30 = vpop.eup %11229 }
 0x1e7   : > { %v11232_v15 = vpop.eup %11231  ;;  %v797_v42 = vmul.f32 %v11230_v30, %v12267_v37 }
 0x1e8   : > { %v11234_v51 = vpop.eup %11233  ;;  %v794_v7 = vmul.f32 %v11232_v15, %v12252_v28 }
 0x1e9   : > { %v796_v44 = vmul.f32 %v11234_v51, %v12264_v11  ;;  %v11236_v1 = vpop.eup %11235  ;;  %v12399_v11 = vrot.slane %v12395_v18, %v864_v10 }
 0x1ea   : > { %v1449_v16 = vpack.c.bf16 %v795_v9, %v794_v7  ;;  %v11238_v29 = vpop.eup %11237  ;;  %v799_v28 = vmul.f32 %v11236_v1, %v12279_v21 }
 0x1eb   : > { %v1450_v27 = vpack.c.bf16 %v797_v42, %v796_v44  ;;  %v11240_v31 = vpop.eup %11239  ;;  %14957 = vst [vmem:[#allocation20_spill] sm:$0xff] %v12399_v11  ;;  %v801_v33 = vmul.f32 %v11238_v29, %v12291_v57 }
 0x1ec   : > { %v11242_v37 = vpop.eup %11241  ;;  %v798_v34 = vmul.f32 %v11240_v31, %v12274_v19 }
 0x1ed   : > { %1133 = vmatmul.mubr.bf16.gmra.mxu0 %v815_v54  ;;  %1246 = vmatmul.mubr.bf16.gmra.mxu1 %v815_v54  ;;  %v800_v61 = vmul.f32 %v11242_v37, %v12284_v56  ;;  %v11244_v35 = vpop.eup %11243  ;;  %v860_v54 = vsub.s32 2, %v12389_v0 }
 0x1ee   : > { %10453 = vmatprep.mubr.bf16.mxu0 %v1448_v63  ;;  %v1451_v3 = vpack.c.bf16 %v799_v28, %v798_v34  ;;  %v11246_v2 = vpop.eup %11245  ;;  %v803_v36 = vmul.f32 %v11244_v35, %v12301_v60 }
 0x1ef   : > { %v1452_v5 = vpack.c.bf16 %v801_v33, %v800_v61  ;;  %v802_v59 = vmul.f32 %v11246_v2, %v12294_v8  ;;  %v12443_v9 = vrot.slane %v12395_v18, %v860_v54 }
 0x1f1   : > { %v1453_v21 = vpack.c.bf16 %v803_v36, %v802_v59 }
 0x1f5   : > { %10454 = vmatmul.mubr.bf16.vlgmr.msra.gmra.mxu0 %v1449_v16 }
 0x1f6   : > { %10457 = vmatprep.mubr.bf16.mxu0 %v1450_v27 }
 0x1fd   : > { %10458 = vmatmul.mubr.bf16.gmra.mxu0 %v1451_v3 }
 0x1fe   : > { %10461 = vmatprep.mubr.bf16.mxu0 %v1452_v5 }
 0x205   : > { %10462 = vmatmul.mubr.bf16.gmra.mxu0 %v1453_v21 }
 0x22e   : > { %v737_v39 = vpop.xlane.xlu0 %736 }
 0x22f   : > { %v756_v38 = vmul.f32 0.0078125, %v737_v39 }
 0x231   : > { %v772_v12 = vadd.f32 1e-05, %v756_v38 }
 0x232   : > { %v739_v57 = vpop.xlane.xlu1 %738 }
 0x233   : > { %v757_v45 = vmul.f32 0.0078125, %v739_v57  ;;  %11247 = vrsqrt.f32 %v772_v12 }
 0x235   : > { %v773_v19 = vadd.f32 1e-05, %v757_v45 }
 0x236   : > { %v741_v56 = vpop.xlane.xlu0 %740 }
 0x237   : > { %11249 = vrsqrt.f32 %v773_v19  ;;  %v758_v41 = vmul.f32 0.0078125, %v741_v56 }
 0x239   : > { %v774_v43 = vadd.f32 1e-05, %v758_v41 }
 0x23a   : > { %v743_v20 = vpop.xlane.xlu1 %742 }
 0x23b   : > { %v759_v46 = vmul.f32 0.0078125, %v743_v20  ;;  %11251 = vrsqrt.f32 %v774_v43 }
 0x23d   : > { %v775_v48 = vadd.f32 1e-05, %v759_v46 }
 0x23f   : > { %11253 = vrsqrt.f32 %v775_v48 }
 0x240   : > { %v11248_v60 = vpop.eup %11247 }
 0x241   : > { %v804_v32 = vmul.f32 %v11248_v60, %v12312_v17  ;;  %v12416_v17 = vrot.slane %v12395_v18, %v856_v55 }
 0x244   : > { %v11250_v8 = vpop.eup %11249 }
 0x245   : > { %v805_v49 = vmul.f32 %v11250_v8, %v12317_v40 }
 0x247   : > { %v1454_v52 = vpack.c.bf16 %v805_v49, %v804_v32 }
 0x248   : > { %v11252_v13 = vpop.eup %11251 }
 0x249   : > { %10465 = vmatprep.mubr.bf16.mxu0 %v1454_v52  ;;  %v806_v22 = vmul.f32 %v11252_v13, %v12322_v50 }
 0x24c   : > { %v11254_v6 = vpop.eup %11253 }
 0x24d   : > { %v807_v4 = vmul.f32 %v11254_v6, %v12327_v58 }
 0x24f   : > { %v1455_v23 = vpack.c.bf16 %v807_v4, %v806_v22 }
 0x251   : > { %10466 = vmatmul.mubr.bf16.gmra.mxu0 %v1455_v23 }
 0x275   : > { %v1064_v40 = vpop.f32.mrf.mxu0  ;;  %v12418_v24 = vpop.f32.mrf.mxu1 }
 0x276   : > { %v12421_v50 = vadd.f32 %v1064_v40, %v12413_v14 }
 0x277   : > { %v1066_v58 = vpop.f32.mrf.mxu0  ;;  %v12423_v47 = vpop.f32.mrf.mxu1 }
 0x278   : > { %14958 = vst [vmem:[#allocation21_spill] sm:$0xff] %v12421_v50  ;;  %14959 = vst [vmem:[#allocation22_spill] sm:$0xff] %v12423_v47  ;;  %v12427_v25 = vadd.f32 %v1066_v58, %v12416_v17  ;;  %3473 = vrot.lane.b32.xlu0 %v12421_v50, %s11772_s7  ;;  %10505 = vmatprep.mubr.msk.f32.mxu0 %vm1857_vm0, %v12421_v50 }
 0x279   : > { %v1068_v63 = vpop.f32.mrf.mxu0  ;;  %v12433_v30 = vpop.f32.mrf.mxu1 }
 0x27a   : > { %14960 = vst [vmem:[#allocation23_spill] sm:$0xff] %v12427_v25  ;;  %v12436_v53 = vadd.f32 %v1068_v63, %v12413_v14  ;;  %3479 = vrot.lane.b32.xlu1 %v12427_v25, %s11772_s7 }
 0x27b   : > { %v1070_v15 = vpop.f32.mrf.mxu0  ;;  %v12440_v51 = vpop.f32.mrf.mxu1 }
 0x27c   : > { %14961 = vst [vmem:[#allocation24_spill] sm:$0xff] %v12436_v53  ;;  %14962 = vst [vmem:[#allocation25_spill] sm:$0xff] %v12440_v51  ;;  %v12446_v62 = vadd.f32 %v1070_v15, %v12416_v17  ;;  %3475 = vrot.lane.b32.xlu0 %v12436_v53, %s11772_s7 }
 0x27d   : > { %v1074_v42 = vpop.f32.mrf.mxu0  ;;  %v1187_v7 = vpop.f32.mrf.mxu1 }
 0x27e   : > { %14963 = vst [vmem:[#allocation26_spill] sm:$0xff] %v12446_v62  ;;  %v12451_v44 = vadd.f32 %v1074_v42, %v12413_v14  ;;  %v12454_v16 = vadd.f32 %v1187_v7, %v12443_v9  ;;  %10501 = vmatprep.subr.msk.mxu0 %vm1857_vm0, %v12446_v62 }
 0x27f   : > { %v1076_v0 = vpop.f32.mrf.mxu0  ;;  %v12458_v1 = vpop.f32.mrf.mxu1  ;;  %10502 = vmatpush3.xpose.msk.msra.mxu0 %vm1857_vm0, %v12446_v62 }
 0x280   : > { %14964 = vst [vmem:[#allocation27_spill] sm:$0xff] %v12451_v44  ;;  %14965 = vst [vmem:[#allocation28_spill] sm:$0xff] %v12454_v16  ;;  %3576 = vrot.lane.b32.xlu1 %v12451_v44, %s11772_s7  ;;  %3481 = vrot.lane.b32.xlu0 %v12446_v62, %s11772_s7  ;;  %v12469_v10 = vadd.f32 %v1076_v0, %v12416_v17  ;;  %v12645_v62 = vadd.f32 %v12433_v30, %v12443_v9 }
 0x281   : > { %14966 = vst [vmem:[#allocation29_spill] sm:$0xff] %v12458_v1  ;;  %10503 = vmatprep.subr.msk.mxu0 %vm1857_vm0, %v12427_v25  ;;  %v1078_v27 = vpop.f32.mrf.mxu0  ;;  %v1191_v29 = vpop.f32.mrf.mxu1 }
 0x282   : > { %14967 = vst [vmem:[#allocation30_spill] sm:$0xff] %v12469_v10  ;;  %v12472_v31 = vadd.f32 %v1191_v29, %v12443_v9  ;;  %v12481_v34 = vadd.f32 %v1078_v27, %v12413_v14  ;;  %15011 = vst [vmem:[#allocation74_spill] sm:$0xff] %v12645_v62 }
 0x283   : > { %v1080_v18 = vpop.f32.mrf.mxu0  ;;  %v12474_v37 = vpop.f32.mrf.mxu1  ;;  %10504 = vmatpush3.xpose.msk.msra.mxu0 %vm1857_vm0, %v12427_v25 }
 0x284   : > { %14968 = vst [vmem:[#allocation31_spill] sm:$0xff] %v12472_v31  ;;  %14969 = vst [vmem:[#allocation32_spill] sm:$0xff] %v12474_v37  ;;  %3582 = vrot.lane.b32.xlu1 %v12469_v10, %s11772_s7  ;;  %v12500_v59 = vadd.f32 %v1080_v18, %v12416_v17 }
 0x285   : > { %v1084_v28 = vpop.f32.mrf.mxu0  ;;  %v1197_v33 = vpop.f32.mrf.mxu1  ;;  %14970 = vst [vmem:[#allocation33_spill] sm:$0xff] %v12481_v34 }
 0x286   : > { %v12484_v61 = vadd.f32 %v1084_v28, %v12413_v14  ;;  %v12487_v3 = vadd.f32 %v1197_v33, %v12443_v9  ;;  %10506 = vmatmul.mubr.msk.f32.vlgmr.msra.gmra.mxu0 %vm1857_vm0, %v12436_v53  ;;  %14974 = vst [vmem:[#allocation37_spill] sm:$0xff] %v12500_v59 }
 0x287   : > { %v1086_v35 = vpop.f32.mrf.mxu0  ;;  %v12491_v5 = vpop.f32.mrf.mxu1 }
 0x288   : > { %14971 = vst [vmem:[#allocation34_spill] sm:$0xff] %v12484_v61  ;;  %14972 = vst [vmem:[#allocation35_spill] sm:$0xff] %v12487_v3  ;;  %3578 = vrot.lane.b32.xlu1 %v12481_v34, %s11772_s7  ;;  %10519 = vmatprep.mubr.msk.f32.mxu0 %vm1857_vm0, %v12484_v61  ;;  %v12510_v45 = vadd.f32 %v1086_v35, %v12416_v17 }
 0x289   : > { %14973 = vst [vmem:[#allocation36_spill] sm:$0xff] %v12491_v5  ;;  %v1088_v2 = vpop.f32.mrf.mxu0  ;;  %v12497_v36 = vpop.f32.mrf.mxu1 }
 0x28a   : > { %14977 = vst [vmem:[#allocation40_spill] sm:$0xff] %v12510_v45  ;;  %v12540_v32 = vadd.f32 %v1088_v2, %v12413_v14  ;;  %v12668_v30 = vadd.f32 %v12497_v36, %v12443_v9 }
 0x28b   : > { %v1090_v21 = vpop.f32.mrf.mxu0  ;;  %v12502_v39 = vpop.f32.mrf.mxu1 }
 0x28c   : > { %14975 = vst [vmem:[#allocation38_spill] sm:$0xff] %v12502_v39  ;;  %v12505_v38 = vadd.f32 %v1090_v21, %v12416_v17  ;;  %3584 = vrot.lane.b32.xlu1 %v12500_v59, %s11772_s7  ;;  %14983 = vst [vmem:[#allocation46_spill] sm:$0xff] %v12540_v32 }
 0x28d   : > { %v1094_v12 = vpop.f32.mrf.mxu0  ;;  %v1207_v57 = vpop.f32.mrf.mxu1  ;;  %15016 = vst [vmem:[#allocation79_spill] sm:$0xff] %v12668_v30 }
 0x28e   : > { %14976 = vst [vmem:[#allocation39_spill] sm:$0xff] %v12505_v38  ;;  %v12513_v19 = vadd.f32 %v1094_v12, %v12413_v14  ;;  %v12516_v56 = vadd.f32 %v1207_v57, %v12443_v9  ;;  %10515 = vmatprep.subr.msk.mxu0 %vm1857_vm0, %v12505_v38 }
 0x28f   : > { %v12520_v41 = vpop.f32.mrf.mxu0  ;;  %v12522_v43 = vpop.f32.mrf.mxu1  ;;  %10516 = vmatpush3.xpose.msk.msra.mxu0 %vm1857_vm0, %v12505_v38 }
 0x290   : > { %14978 = vst [vmem:[#allocation41_spill] sm:$0xff] %v12513_v19  ;;  %14979 = vst [vmem:[#allocation42_spill] sm:$0xff] %v12516_v56  ;;  %3687 = vrot.lane.b32.xlu1 %v12505_v38, %s11772_s7  ;;  %10517 = vmatprep.subr.msk.mxu0 %vm1857_vm0, %v12510_v45 }
 0x291   : > { %14980 = vst [vmem:[#allocation43_spill] sm:$0xff] %v12522_v43  ;;  %v1098_v20 = vpop.f32.mrf.mxu0  ;;  %v12530_v46 = vpop.f32.mrf.mxu1 }
 0x292   : > { %v12533_v48 = vadd.f32 %v1098_v20, %v12413_v14 }
 0x293   : > { %v1100_v60 = vpop.f32.mrf.mxu0  ;;  %v12535_v8 = vpop.f32.mrf.mxu1  ;;  %10518 = vmatpush3.xpose.msk.msra.mxu0 %vm1857_vm0, %v12510_v45 }
 0x294   : > { %14981 = vst [vmem:[#allocation44_spill] sm:$0xff] %v12533_v48  ;;  %14982 = vst [vmem:[#allocation45_spill] sm:$0xff] %v12535_v8  ;;  %v12543_v49 = vadd.f32 %v1100_v60, %v12416_v17 }
 0x295   : > { %v1104_v52 = vpop.f32.mrf.mxu0  ;;  %v1217_v13 = vpop.f32.mrf.mxu1 }
 0x296   : > { %14984 = vst [vmem:[#allocation47_spill] sm:$0xff] %v12543_v49  ;;  %v12546_v6 = vadd.f32 %v1104_v52, %v12413_v14  ;;  %v12549_v22 = vadd.f32 %v1217_v13, %v12443_v9  ;;  %3790 = vrot.lane.b32.xlu0 %v12543_v49, %s11772_s7  ;;  %10520 = vmatmul.mubr.msk.f32.vlgmr.msra.gmra.mxu0 %vm1857_vm0, %v12540_v32 }
 0x297   : > { %v1106_v4 = vpop.f32.mrf.mxu0  ;;  %v12555_v23 = vpop.f32.mrf.mxu1 }
 0x298   : > { %14985 = vst [vmem:[#allocation48_spill] sm:$0xff] %v12546_v6  ;;  %14986 = vst [vmem:[#allocation49_spill] sm:$0xff] %v12549_v22  ;;  %10533 = vmatprep.mubr.msk.f32.mxu0 %vm1857_vm0, %v12546_v6  ;;  %v12568_v7 = vadd.f32 %v1106_v4, %v12416_v17 }
 0x299   : > { %14987 = vst [vmem:[#allocation50_spill] sm:$0xff] %v12555_v23  ;;  %v1108_v26 = vpop.f32.mrf.mxu0  ;;  %v1221_v55 = vpop.f32.mrf.mxu1 }
 0x29a   : > { %v12560_v40 = vadd.f32 %v1221_v55, %v12443_v9  ;;  %14991 = vst [vmem:[#allocation54_spill] sm:$0xff] %v12568_v7  ;;  %v12600_v20 = vadd.f32 %v1108_v26, %v12413_v14 }
 0x29b   : > { %v1110_v58 = vpop.f32.mrf.mxu0  ;;  %v12562_v54 = vpop.f32.mrf.mxu1 }
 0x29c   : > { %14988 = vst [vmem:[#allocation51_spill] sm:$0xff] %v12560_v40  ;;  %14989 = vst [vmem:[#allocation52_spill] sm:$0xff] %v12562_v54  ;;  %v12565_v63 = vadd.f32 %v1110_v58, %v12416_v17 }
 0x29d   : > { %v1114_v15 = vpop.f32.mrf.mxu0  ;;  %v1227_v42 = vpop.f32.mrf.mxu1  ;;  %14999 = vst [vmem:[#allocation62_spill] sm:$0xff] %v12600_v20 }
 0x29e   : > { %14990 = vst [vmem:[#allocation53_spill] sm:$0xff] %v12565_v63  ;;  %v12571_v0 = vadd.f32 %v1114_v15, %v12413_v14  ;;  %v12574_v27 = vadd.f32 %v1227_v42, %v12443_v9  ;;  %10529 = vmatprep.subr.msk.mxu0 %vm1857_vm0, %v12565_v63 }
 0x29f   : > { %v1116_v29 = vpop.f32.mrf.mxu0  ;;  %v12578_v18 = vpop.f32.mrf.mxu1  ;;  %10530 = vmatpush3.xpose.msk.msra.mxu0 %vm1857_vm0, %v12565_v63 }
 0x2a0   : > { %14992 = vst [vmem:[#allocation55_spill] sm:$0xff] %v12571_v0  ;;  %14993 = vst [vmem:[#allocation56_spill] sm:$0xff] %v12574_v27  ;;  %v12583_v28 = vadd.f32 %v1116_v29, %v12416_v17  ;;  %10531 = vmatprep.subr.msk.mxu0 %vm1857_vm0, %v12568_v7 }
 0x2a1   : > { %14994 = vst [vmem:[#allocation57_spill] sm:$0xff] %v12578_v18  ;;  %v1118_v33 = vpop.f32.mrf.mxu0  ;;  %v1231_v35 = vpop.f32.mrf.mxu1 }
 0x2a2   : > { %14995 = vst [vmem:[#allocation58_spill] sm:$0xff] %v12583_v28  ;;  %v12588_v2 = vadd.f32 %v1118_v33, %v12413_v14  ;;  %v12591_v21 = vadd.f32 %v1231_v35, %v12443_v9 }
 0x2a3   : > { %v12593_v12 = vpop.f32.mrf.mxu0  ;;  %v12595_v57 = vpop.f32.mrf.mxu1  ;;  %10532 = vmatpush3.xpose.msk.msra.mxu0 %vm1857_vm0, %v12568_v7 }
 0x2a4   : > { %14996 = vst [vmem:[#allocation59_spill] sm:$0xff] %v12588_v2  ;;  %14997 = vst [vmem:[#allocation60_spill] sm:$0xff] %v12591_v21 }
 0x2a5   : > { %14998 = vst [vmem:[#allocation61_spill] sm:$0xff] %v12595_v57  ;;  %v1124_v60 = vpop.f32.mrf.mxu0  ;;  %v1237_v52 = vpop.f32.mrf.mxu1 }
 0x2a6   : > { %v12603_v13 = vadd.f32 %v1124_v60, %v12413_v14  ;;  %v12606_v4 = vadd.f32 %v1237_v52, %v12443_v9  ;;  %10534 = vmatmul.mubr.msk.f32.vlgmr.msra.gmra.mxu0 %vm1857_vm0, %v12600_v20 }
 0x2a7   : > { %v1126_v55 = vpop.f32.mrf.mxu0  ;;  %v12610_v58 = vpop.f32.mrf.mxu1 }
 0x2a8   : > { %15000 = vst [vmem:[#allocation63_spill] sm:$0xff] %v12603_v13  ;;  %15001 = vst [vmem:[#allocation64_spill] sm:$0xff] %v12606_v4  ;;  %10547 = vmatprep.mubr.msk.f32.mxu0 %vm1857_vm0, %v12603_v13  ;;  %v12623_v38 = vadd.f32 %v1126_v55, %v12416_v17 }
 0x2a9   : > { %15002 = vst [vmem:[#allocation65_spill] sm:$0xff] %v12610_v58  ;;  %v1128_v15 = vpop.f32.mrf.mxu0  ;;  %v1241_v26 = vpop.f32.mrf.mxu1 }
 0x2aa   : > { %v12615_v42 = vadd.f32 %v1241_v26, %v12443_v9  ;;  %15006 = vst [vmem:[#allocation69_spill] sm:$0xff] %v12623_v38 }
 0x2ab   : > { %v1130_v29 = vpop.f32.mrf.mxu0  ;;  %v12617_v33 = vpop.f32.mrf.mxu1 }
 0x2ac   : > { %15003 = vst [vmem:[#allocation66_spill] sm:$0xff] %v12615_v42  ;;  %15004 = vst [vmem:[#allocation67_spill] sm:$0xff] %v12617_v33  ;;  %v12620_v35 = vadd.f32 %v1130_v29, %v12416_v17 }
 0x2ad   : > { %v1134_v60 = vpop.f32.mrf.mxu0  ;;  %v1247_v52 = vpop.f32.mrf.mxu1 }
 0x2ae   : > { %15005 = vst [vmem:[#allocation68_spill] sm:$0xff] %v12620_v35  ;;  %v12626_v53 = vadd.f32 %v1134_v60, %v12413_v14  ;;  %v12629_v50 = vadd.f32 %v1247_v52, %v12443_v9  ;;  %10543 = vmatprep.subr.msk.mxu0 %vm1857_vm0, %v12620_v35 }
 0x2af   : > { %v1136_v26 = vpop.f32.mrf.mxu0  ;;  %v1249_v25 = vpop.f32.mrf.mxu1  ;;  %10544 = vmatpush3.xpose.msk.msra.mxu0 %vm1857_vm0, %v12620_v35 }
 0x2b0   : > { %15007 = vst [vmem:[#allocation70_spill] sm:$0xff] %v12626_v53  ;;  %15008 = vst [vmem:[#allocation71_spill] sm:$0xff] %v12629_v50  ;;  %v12636_v29 = vadd.f32 %v1136_v26, %v12416_v17  ;;  %v12639_v55 = vadd.f32 %v1249_v25, %v12399_v11  ;;  %10545 = vmatprep.subr.msk.mxu0 %vm1857_vm0, %v12623_v38  ;;  %v12656_v25 = vadd.f32 %v1128_v15, %v12413_v14 }
 0x2b1   : > { %v1138_v60 = vpop.f32.mrf.mxu0  ;;  %v1251_v52 = vpop.f32.mrf.mxu1  ;;  %v12661_v26 = vadd.f32 %v12418_v24, %v12443_v9 }
 0x2b2   : > { %15009 = vst [vmem:[#allocation72_spill] sm:$0xff] %v12636_v29  ;;  %15010 = vst [vmem:[#allocation73_spill] sm:$0xff] %v12639_v55  ;;  %v12648_v57 = vadd.f32 %v1138_v60, %v12413_v14  ;;  %v12651_v18 = vadd.f32 %v1251_v52, %v12443_v9  ;;  %v11175_v14 = vld [vmem:[%s14749_s2] sm:$0xff]  }
 0x2b3   : > { %10546 = vmatpush3.xpose.msk.msra.mxu0 %vm1857_vm0, %v12623_v38  ;;  %15014 = vst [vmem:[#allocation77_spill] sm:$0xff] %v12656_v25  ;;  %15015 = vst [vmem:[#allocation78_spill] sm:$0xff] %v12661_v26  ;;  %10485 = vmatprep.mubr.bf16.mxu1 %v11175_v14  ;;  %v12676_v24 = vpop.f32.mrf.mxu0  ;;  %v9849_v14 = vld [vmem:[%s14753_s6] ss:$0 sm:$0xff] }
 0x2b4   : > { %15012 = vst [vmem:[#allocation75_spill] sm:$0xff] %v12648_v57  ;;  %15013 = vst [vmem:[#allocation76_spill] sm:$0xff] %v12651_v18  ;;  %10557 = vmatprep.subr.mxu0 %v12645_v62 }
 0x2b5   : > { %v10455_v15 = vpop.f32.mrf.mxu0 }
 0x2b6   : > { %10548 = vmatmul.mubr.msk.f32.vlgmr.msra.gmra.mxu0 %vm1857_vm0, %v12656_v25 }
 0x2b7   : > { %10558 = vmatpush3.msra.mxu0 %v12645_v62  ;;  %v1561_v60 = vpop.f32.mrf.mxu0 }
 0x2b8   : > { %10559 = vmatprep.subr.mxu0 %v12661_v26 }
 0x2b9   : > { %10560 = vmatpush3.msra.mxu0 %v12661_v26  ;;  %v10456_v52 = vpop.f32.mrf.mxu0 }
 0x2ba   : > { %10571 = vmatprep.subr.mxu0 %v12668_v30 }
 0x2bb   : > { %v1564_v55 = vpop.f32.mrf.mxu0 }
 0x2bd   : > { %v10459_v8 = vpop.f32.mrf.mxu0 }
 0x2bf   : > { %v1577_v36 = vpop.f32.mrf.mxu0 }
 0x2c1   : > { %v10460_v43 = vpop.f32.mrf.mxu0 }
 0x2c2   : > { %v1589_v3 = vadd.f32 %v10460_v43, %v9849_v14 }
 0x2c3   : > { %v1580_v37 = vpop.f32.mrf.mxu0 }
 0x2c5   : > { %v10463_v1 = vpop.f32.mrf.mxu0 }
 0x2c6   : > { %v1602_v42 = vadd.f32 %v10463_v1, %v9849_v14 }
 0x2c7   : > { %v1593_v33 = vpop.f32.mrf.mxu0 }
 0x2c8   : > { %v1594_v56 = vadd.f32 %v9849_v14, %v1593_v33 }
 0x2c9   : > { %v10464_v58 = vpop.f32.mrf.mxu0 }
 0x2ca   : > { %v1605_v21 = vadd.f32 %v10464_v58, %v9849_v14 }
 0x2cb   : > { %v1596_v54 = vpop.f32.mrf.mxu0 }
 0x2cc   : > { %v1645_v22 = vpack.c.bf16 %v1605_v21, %v1602_v42  ;;  %v1597_v40 = vadd.f32 %v9849_v14, %v1596_v54  ;;  %v1565_v54 = vadd.f32 %v9849_v14, %v1564_v55  ;;  %v12716_v21 = vadd.f32 %v12520_v41, %v12416_v17 }
 0x2cd   : > { %v12744_v41 = vadd.f32 %v12676_v24, %v12416_v17 }
 0x2ce   : > { %v1644_v30 = vpack.c.bf16 %v1597_v40, %v1594_v56  ;;  %v11178_v56 = vld [vmem:[%s14749_s2 + $0x18] sm:$0xff]   ;;  %v11181_v40 = vld [vmem:[%s14749_s2 + $0x30] sm:$0xff]   ;;  %15017 = vst [vmem:[#allocation80_spill] sm:$0xff] %v12716_v21 }
 0x2cf   : > { %15019 = vst [vmem:[#allocation82_spill] sm:$0xff] %v12744_v41 }
 0x311   : > { %v10467_v23 = vpop.f32.mrf.mxu0 }
 0x312   : > { %v1618_v51 = vadd.f32 %v10467_v23, %v9849_v14  ;;  %v1586_v23 = vadd.f32 %v10459_v8, %v9849_v14  ;;  %v11179_v8 = vld [vmem:[%s14749_s2 + $0x20] sm:$0xff]  }
 0x313   : > { %v1609_v39 = vpop.f32.mrf.mxu0 }
 0x314   : > { %v1610_v50 = vadd.f32 %v9849_v14, %v1609_v39  ;;  %v1581_v39 = vadd.f32 %v9849_v14, %v1580_v37  ;;  %v11176_v37 = vld [vmem:[%s14749_s2 + $0x8] sm:$0xff]  }
 0x315   : > { %v10468_v5 = vpop.f32.mrf.mxu0 }
 0x316   : > { %v1621_v47 = vadd.f32 %v10468_v5, %v9849_v14  ;;  %v1643_v5 = vpack.c.bf16 %v1589_v3, %v1586_v23  ;;  %v11177_v3 = vld [vmem:[%s14749_s2 + $0x10] sm:$0xff]  }
 0x317   : > { %v1612_v11 = vpop.f32.mrf.mxu0 }
 0x318   : > { %v1647_v18 = vpack.c.bf16 %v1621_v47, %v1618_v51  ;;  %v1613_v27 = vadd.f32 %v9849_v14, %v1612_v11  ;;  %v1578_v11 = vadd.f32 %v9849_v14, %v1577_v36  ;;  %v1570_v51 = vadd.f32 %v10455_v15, %v9849_v14 }
 0x31a   : > { %v1646_v4 = vpack.c.bf16 %v1613_v27, %v1610_v50  ;;  %10469 = vmatprep.subr.bf16.mxu1 %v1647_v18  ;;  %v1573_v50 = vadd.f32 %v10456_v52, %v9849_v14  ;;  %v1642_v47 = vpack.c.bf16 %v1581_v39, %v1578_v11  ;;  %v1562_v27 = vadd.f32 %v9849_v14, %v1561_v60 }
 0x31b   : > { %10470 = vmatpush3.bf16.msra.mxu1 %v1647_v18  ;;  %v11182_v18 = vld [vmem:[%s14749_s2 + $0x38] sm:$0xff]  }
 0x31c   : > { %10471 = vmatprep.subr.bf16.mxu1 %v1646_v4  ;;  %v1641_v1 = vpack.c.bf16 %v1573_v50, %v1570_v51  ;;  %v1640_v43 = vpack.c.bf16 %v1565_v54, %v1562_v27 }
 0x31f   : > { %10472 = vmatpush3.bf16.msra.mxu1 %v1646_v4  ;;  %v12728_v4 = vadd.f32 %v12593_v12, %v12416_v17  ;;  %v12766_v17 = vadd.f32 %v12530_v46, %v12443_v9  ;;  %v12771_v12 = vpop.f32.mrf.mxu1 }
 0x320   : > { %10473 = vmatprep.subr.bf16.mxu1 %v1645_v22  ;;  %15021 = vst [vmem:[#allocation84_spill] sm:$0xff] %v12771_v12 }
 0x321   : > { %15018 = vst [vmem:[#allocation81_spill] sm:$0xff] %v12728_v4  ;;  %15020 = vst [vmem:[#allocation83_spill] sm:$0xff] %v12766_v17 }
 0x323   : > { %10474 = vmatpush3.bf16.msra.mxu1 %v1645_v22  ;;  %v11180_v22 = vld [vmem:[%s14749_s2 + $0x28] sm:$0xff]  }
 0x324   : > { %10475 = vmatprep.subr.bf16.mxu1 %v1644_v30 }
 0x327   : > { %10476 = vmatpush3.bf16.msra.mxu1 %v1644_v30 }
 0x328   : > { %10477 = vmatprep.subr.bf16.mxu1 %v1643_v5 }
 0x32b   : > { %10478 = vmatpush3.bf16.msra.mxu1 %v1643_v5 }
 0x32c   : > { %10479 = vmatprep.subr.bf16.mxu1 %v1642_v47 }
 0x32f   : > { %10480 = vmatpush3.bf16.msra.mxu1 %v1642_v47 }
 0x330   : > { %10481 = vmatprep.subr.bf16.mxu1 %v1641_v1 }
 0x333   : > { %10482 = vmatpush3.bf16.msra.mxu1 %v1641_v1 }
 0x334   : > { %10483 = vmatprep.subr.bf16.mxu1 %v1640_v43 }
 0x337   : > { %10484 = vmatpush3.bf16.msra.mxu1 %v1640_v43 }
 0x338   : > { %10508 = vmatprep.subr.msk.mxu1 %vm1857_vm0, %v12500_v59 }
 0x33a   : > { %10486 = vmatmul.mubr.bf16.vlgmr.msra.gmra.mxu1 %v11176_v37 }
 0x33b   : > { %10509 = vmatpush3.xpose.msk.msra.mxu1 %vm1857_vm0, %v12500_v59  ;;  %10489 = vmatprep.mubr.bf16.mxu1 %v11177_v3 }
 0x33c   : > { %10510 = vmatprep.subr.msk.mxu1 %vm1857_vm0, %v12469_v10 }
 0x33f   : > { %10511 = vmatpush3.xpose.msk.msra.mxu1 %vm1857_vm0, %v12469_v10 }
 0x340   : > { %10522 = vmatprep.subr.msk.mxu1 %vm1857_vm0, %v12543_v49 }
 0x342   : > { %10490 = vmatmul.mubr.bf16.gmra.mxu1 %v11178_v56 }
 0x343   : > { %10493 = vmatprep.mubr.bf16.mxu1 %v11179_v8 }
 0x346   : > { %v10507_v58 = vpop.f32.mrf.mxu0 }
 0x348   : > { %v1936_v33 = vpop.f32.mrf.mxu0 }
 0x34a   : > { %10494 = vmatmul.mubr.bf16.gmra.mxu1 %v11180_v22 }
 0x34b   : > { %10497 = vmatprep.mubr.bf16.mxu1 %v11181_v40 }
 0x352   : > { %10498 = vmatmul.mubr.bf16.gmra.mxu1 %v11182_v18 }
 0x353   : > { %10512 = vmatprep.mubr.msk.f32.mxu1 %vm1857_vm0, %v12451_v44 }
 0x356   : > { %v10521_v24 = vpop.f32.mrf.mxu0 }
 0x358   : > { %v2110_v14 = vpop.f32.mrf.mxu0 }
 0x35a   : > { %10513 = vmatmul.mubr.msk.f32.vlgmr.msra.gmra.mxu1 %vm1857_vm0, %v12481_v34 }
 0x35b   : > { %10523 = vmatpush3.xpose.msk.msra.mxu1 %vm1857_vm0, %v12543_v49  ;;  %10526 = vmatprep.mubr.msk.f32.mxu1 %vm1857_vm0, %v12513_v19 }
 0x35c   : > { %10524 = vmatprep.subr.msk.mxu1 %vm1857_vm0, %v12716_v21 }
 0x35f   : > { %10525 = vmatpush3.xpose.msk.msra.mxu1 %vm1857_vm0, %v12716_v21 }
 0x360   : > { %10536 = vmatprep.subr.msk.mxu1 %vm1857_vm0, %v12728_v4 }
 0x362   : > { %10527 = vmatmul.mubr.msk.f32.vlgmr.msra.gmra.mxu1 %vm1857_vm0, %v12533_v48 }
 0x363   : > { %10537 = vmatpush3.xpose.msk.msra.mxu1 %vm1857_vm0, %v12728_v4  ;;  %10540 = vmatprep.mubr.msk.f32.mxu1 %vm1857_vm0, %v12571_v0 }
 0x364   : > { %10538 = vmatprep.subr.msk.mxu1 %vm1857_vm0, %v12583_v28 }
 0x366   : > { %v10535_v50 = vpop.f32.mrf.mxu0 }
 0x367   : > { %10539 = vmatpush3.xpose.msk.msra.mxu1 %vm1857_vm0, %v12583_v28 }
 0x368   : > { %10550 = vmatprep.subr.msk.mxu1 %vm1857_vm0, %v12744_v41  ;;  %v2284_v27 = vpop.f32.mrf.mxu0 }
 0x36a   : > { %10541 = vmatmul.mubr.msk.f32.vlgmr.msra.gmra.mxu1 %vm1857_vm0, %v12588_v2 }
 0x36b   : > { %10551 = vmatpush3.xpose.msk.msra.mxu1 %vm1857_vm0, %v12744_v41  ;;  %10554 = vmatprep.mubr.msk.f32.mxu1 %vm1857_vm0, %v12626_v53 }
 0x36c   : > { %10552 = vmatprep.subr.msk.mxu1 %vm1857_vm0, %v12636_v29 }
 0x36f   : > { %10553 = vmatpush3.xpose.msk.msra.mxu1 %vm1857_vm0, %v12636_v29 }
 0x370   : > { %10564 = vmatprep.subr.mxu1 %v12472_v31 }
 0x372   : > { %10555 = vmatmul.mubr.msk.f32.vlgmr.msra.gmra.mxu1 %vm1857_vm0, %v12648_v57 }
 0x373   : > { %10565 = vmatpush3.msra.mxu1 %v12472_v31 }
 0x374   : > { %10566 = vmatprep.subr.mxu1 %v12454_v16 }
 0x375   : > { %10567 = vmatpush3.msra.mxu1 %v12454_v16 }
 0x376   : > { %10578 = vmatprep.subr.mxu1 %v12766_v17  ;;  %v10549_v8 = vpop.f32.mrf.mxu0 }
 0x3fa   : > { %v12773_v42 = vpop.f32.mrf.mxu1 }
 0x3fb   : > { %15022 = vst [vmem:[#allocation85_spill] sm:$0xff] %v12773_v42 }
 0x3fc   : > { %v12775_v55 = vpop.f32.mrf.mxu1 }
 0x3fd   : > { %15023 = vst [vmem:[#allocation86_spill] sm:$0xff] %v12775_v55  ;;  %v12778_v30 = vadd.f32 %v1936_v33, %v12775_v55  ;;  %v2458_v33 = vpop.f32.mrf.mxu0 }
 0x3fe   : > { %v12780_v9 = vpop.f32.mrf.mxu1 }
 0x3ff   : > { %15024 = vst [vmem:[#allocation87_spill] sm:$0xff] %v12780_v9  ;;  %v2555_v46 = vsel %vm2554_vm1, %v12778_v30, -inf }
 0x400   : > { %2556 = vmax.xlane.f32.xlu0 %v2555_v46  ;;  %v12784_v15 = vpop.f32.mrf.mxu1 }
 0x401   : > { %15025 = vst [vmem:[#allocation88_spill] sm:$0xff] %v12784_v15  ;;  %v12787_v60 = vadd.f32 %v10507_v58, %v12784_v15 }
 0x402   : > { %v12789_v52 = vpop.f32.mrf.mxu1 }
 0x403   : > { %15026 = vst [vmem:[#allocation89_spill] sm:$0xff] %v12789_v52  ;;  %v2558_v36 = vsel %vm2554_vm1, %v12787_v60, -inf }
 0x404   : > { %2559 = vmax.xlane.f32.xlu1 %v2558_v36  ;;  %v12793_v23 = vpop.f32.mrf.mxu1 }
 0x405   : > { %15027 = vst [vmem:[#allocation90_spill] sm:$0xff] %v12793_v23  ;;  %v12796_v5 = vadd.f32 %v2110_v14, %v12793_v23 }
 0x406   : > { %v12798_v39 = vpop.f32.mrf.mxu1 }
 0x407   : > { %15028 = vst [vmem:[#allocation91_spill] sm:$0xff] %v12798_v39  ;;  %v2567_v11 = vsel %vm2554_vm1, %v12796_v5, -inf }
 0x408   : > { %2568 = vmax.xlane.f32.xlu0 %v2567_v11  ;;  %v12802_v47 = vpop.f32.mrf.mxu1 }
 0x409   : > { %15029 = vst [vmem:[#allocation92_spill] sm:$0xff] %v12802_v47  ;;  %v12805_v51 = vadd.f32 %v10521_v24, %v12802_v47 }
 0x40a   : > { %v12807_v1 = vpop.f32.mrf.mxu1 }
 0x40b   : > { %15030 = vst [vmem:[#allocation93_spill] sm:$0xff] %v12807_v1  ;;  %v2570_v54 = vsel %vm2554_vm1, %v12805_v51, -inf }
 0x40c   : > { %2571 = vmax.xlane.f32.xlu1 %v2570_v54  ;;  %v12811_v43 = vpop.f32.mrf.mxu1 }
 0x40d   : > { %15031 = vst [vmem:[#allocation94_spill] sm:$0xff] %v12811_v43  ;;  %v12814_v37 = vadd.f32 %v2284_v27, %v12811_v43 }
 0x40e   : > { %v12816_v3 = vpop.f32.mrf.mxu1 }
 0x40f   : > { %15032 = vst [vmem:[#allocation95_spill] sm:$0xff] %v12816_v3  ;;  %v2579_v56 = vsel %vm2554_vm1, %v12814_v37, -inf }
 0x410   : > { %2580 = vmax.xlane.f32.xlu0 %v2579_v56  ;;  %v12820_v22 = vpop.f32.mrf.mxu1 }
 0x411   : > { %15033 = vst [vmem:[#allocation96_spill] sm:$0xff] %v12820_v22  ;;  %v12823_v40 = vadd.f32 %v10535_v50, %v12820_v22 }
 0x412   : > { %v12825_v18 = vpop.f32.mrf.mxu1 }
 0x413   : > { %15034 = vst [vmem:[#allocation97_spill] sm:$0xff] %v12825_v18  ;;  %v2582_v58 = vsel %vm2554_vm1, %v12823_v40, -inf }
 0x414   : > { %2583 = vmax.xlane.f32.xlu1 %v2582_v58  ;;  %v12829_v46 = vpop.f32.mrf.mxu1 }
 0x415   : > { %15035 = vst [vmem:[#allocation98_spill] sm:$0xff] %v12829_v46  ;;  %v12832_v24 = vadd.f32 %v2458_v33, %v12829_v46 }
 0x416   : > { %v12834_v36 = vpop.f32.mrf.mxu1 }
 0x417   : > { %15036 = vst [vmem:[#allocation99_spill] sm:$0xff] %v12834_v36  ;;  %v2591_v14 = vsel %vm2554_vm1, %v12832_v24, -inf }
 0x418   : > { %2592 = vmax.xlane.f32.xlu0 %v2591_v14  ;;  %v12838_v11 = vpop.f32.mrf.mxu1 }
 0x419   : > { %15037 = vst [vmem:[#allocation100_spill] sm:$0xff] %v12838_v11  ;;  %v12841_v50 = vadd.f32 %v10549_v8, %v12838_v11 }
 0x41a   : > { %v10514_v54 = vpop.f32.mrf.mxu1 }
 0x41b   : > { %v12844_v27 = vadd.f32 %v10514_v54, %v12780_v9  ;;  %v2594_v56 = vsel %vm2554_vm1, %v12841_v50, -inf }
 0x41c   : > { %2595 = vmax.xlane.f32.xlu1 %v2594_v56  ;;  %v2023_v58 = vpop.f32.mrf.mxu1 }
 0x41d   : > { %v12849_v33 = vadd.f32 %v12773_v42, %v2023_v58  ;;  %v2564_v14 = vsel %vm2554_vm1, %v12844_v27, -inf }
 0x41f   : > { %v2561_v49 = vsel %vm2554_vm1, %v12849_v33, -inf }
 0x420   : > { %2565 = vmax.xlane.f32.xlu1 %v2564_v14  ;;  %2562 = vmax.xlane.f32.xlu0 %v2561_v49 }
 0x422   : > { %v10528_v8 = vpop.f32.mrf.mxu1 }
 0x423   : > { %v12856_v54 = vadd.f32 %v10528_v8, %v12798_v39 }
 0x424   : > { %v2197_v34 = vpop.f32.mrf.mxu1 }
 0x425   : > { %v12859_v44 = vadd.f32 %v12789_v52, %v2197_v34  ;;  %v2576_v56 = vsel %vm2554_vm1, %v12856_v54, -inf }
 0x426   : > { %2577 = vmax.xlane.f32.xlu1 %v2576_v56 }
 0x427   : > { %v2573_v58 = vsel %vm2554_vm1, %v12859_v44, -inf }
 0x428   : > { %2574 = vmax.xlane.f32.xlu0 %v2573_v58 }
 0x42a   : > { %v10542_v10 = vpop.f32.mrf.mxu1 }
 0x42b   : > { %v12866_v14 = vadd.f32 %v10542_v10, %v12816_v3 }
 0x42c   : > { %v2371_v49 = vpop.f32.mrf.mxu1 }
 0x42d   : > { %v12869_v8 = vadd.f32 %v12807_v1, %v2371_v49  ;;  %v2588_v34 = vsel %vm2554_vm1, %v12866_v14, -inf }
 0x42e   : > { %2589 = vmax.xlane.f32.xlu1 %v2588_v34  ;;  %v12901_v34 = vpop.permute.xlu0 %3473 }
 0x42f   : > { %v2585_v59 = vsel %vm2554_vm1, %v12869_v8, -inf  ;;  %15040 = vst [vmem:[#allocation103_spill] sm:$0xff] %v12901_v34 }
 0x430   : > { %2586 = vmax.xlane.f32.xlu0 %v2585_v59  ;;  %v12897_v59 = vpop.permute.xlu1 %3479 }
 0x431   : > { %15038 = vst [vmem:[#allocation101_spill] sm:$0xff] %v12897_v59 }
 0x432   : > { %v10556_v56 = vpop.f32.mrf.mxu1 }
 0x433   : > { %v12876_v12 = vadd.f32 %v10556_v56, %v12834_v36 }
 0x434   : > { %v2545_v58 = vpop.f32.mrf.mxu1 }
 0x435   : > { %v12879_v10 = vadd.f32 %v12825_v18, %v2545_v58  ;;  %v2600_v49 = vsel %vm2554_vm1, %v12876_v12, -inf  ;;  %v12905_v58 = vpop.permute.xlu0 %3475 }
 0x436   : > { %2601 = vmax.xlane.f32.xlu1 %v2600_v49  ;;  %15042 = vst [vmem:[#allocation105_spill] sm:$0xff] %v12905_v58 }
 0x437   : > { %v2597_v17 = vsel %vm2554_vm1, %v12879_v10, -inf }
 0x438   : > { %2598 = vmax.xlane.f32.xlu0 %v2597_v17  ;;  %v12899_v17 = vpop.permute.xlu1 %3576 }
 0x439   : > { %15039 = vst [vmem:[#allocation102_spill] sm:$0xff] %v12899_v17 }
 0x43c   : > { %v12903_v56 = vpop.permute.xlu1 %3582 }
 0x43d   : > { %15041 = vst [vmem:[#allocation104_spill] sm:$0xff] %v12903_v56 }
 0x440   : > { %v12907_v49 = vpop.permute.xlu1 %3578 }
 0x441   : > { %15043 = vst [vmem:[#allocation106_spill] sm:$0xff] %v12907_v49 }
 0x447   : > { %3788 = vrot.lane.b32.xlu1 %v12716_v21, %s11772_s7 }
 0x44b   : > { %3893 = vrot.lane.b32.xlu1 %v12565_v63, %s11772_s7  ;;  %v12909_v63 = vpop.permute.xlu0 %3481 }
 0x44c   : > { %15044 = vst [vmem:[#allocation107_spill] sm:$0xff] %v12909_v63 }
 0x44e   : > { %3685 = vrot.lane.b32.xlu0 %v12510_v45, %s11772_s7 }
 0x44f   : > { %3782 = vrot.lane.b32.xlu1 %v12513_v19, %s11772_s7  ;;  %v12911_v19 = vpop.permute.xlu1 %3584  ;;  %v12913_v21 = vpop.permute.xlu0 %3790 }
 0x450   : > { %15045 = vst [vmem:[#allocation108_spill] sm:$0xff] %v12911_v19  ;;  %15046 = vst [vmem:[#allocation109_spill] sm:$0xff] %v12913_v21 }
 0x452   : > { %3679 = vrot.lane.b32.xlu0 %v12484_v61, %s11772_s7 }
 0x453   : > { %v12915_v61 = vpop.permute.xlu1 %3687 }
 0x454   : > { %15047 = vst [vmem:[#allocation110_spill] sm:$0xff] %v12915_v61 }
 0x456   : > { %3681 = vrot.lane.b32.xlu0 %v12540_v32, %s11772_s7 }
 0x489   : > { %v2557_v32 = vpop.xlane.xlu0 %2556 }
 0x48a   : > { %v2603_v45 = vsub.f32 %v12778_v30, %v2557_v32 }
 0x48c   : > { %v2619_v17 = vmul.f32 1.442695, %v2603_v45 }
 0x48d   : > { %v2560_v59 = vpop.xlane.xlu1 %2559 }
 0x48e   : > { %11255 = vpow2.f32 %v2619_v17  ;;  %v2604_v56 = vsub.f32 %v12787_v60, %v2560_v59 }
 0x490   : > { %v2621_v34 = vmul.f32 1.442695, %v2604_v56 }
 0x491   : > { %v2569_v58 = vpop.xlane.xlu0 %2568 }
 0x492   : > { %11257 = vpow2.f32 %v2621_v34  ;;  %v2607_v49 = vsub.f32 %v12796_v5, %v2569_v58 }
 0x494   : > { %v2627_v63 = vmul.f32 1.442695, %v2607_v49 }
 0x495   : > { %v2572_v16 = vpop.xlane.xlu1 %2571 }
 0x496   : > { %11259 = vpow2.f32 %v2627_v63  ;;  %v2608_v21 = vsub.f32 %v12805_v51, %v2572_v16 }
 0x498   : > { %v2629_v19 = vmul.f32 1.442695, %v2608_v21 }
 0x499   : > { %v2581_v61 = vpop.xlane.xlu0 %2580 }
 0x49a   : > { %11261 = vpow2.f32 %v2629_v19  ;;  %v2611_v32 = vsub.f32 %v12814_v37, %v2581_v61 }
 0x49b   : > { %v12922_v45 = vpop.eup %11255 }
 0x49c   : > { %v2635_v30 = vmul.f32 1.442695, %v2611_v32  ;;  %v2651_v60 = vsel %vm2554_vm1, %v12922_v45, 0.0 }
 0x49d   : > { %v2584_v59 = vpop.xlane.xlu1 %2583  ;;  %2652 = vadd.xlane.f32.xlu0 %v2651_v60 }
 0x49e   : > { %11263 = vpow2.f32 %v2635_v30  ;;  %v2612_v5 = vsub.f32 %v12823_v40, %v2584_v59 }
 0x49f   : > { %v12927_v17 = vpop.eup %11257 }
 0x4a0   : > { %v2637_v63 = vmul.f32 1.442695, %v2612_v5  ;;  %v2654_v16 = vsel %vm2554_vm1, %v12927_v17, 0.0 }
 0x4a1   : > { %2655 = vadd.xlane.f32.xlu1 %v2654_v16  ;;  %v2593_v19 = vpop.xlane.xlu0 %2592 }
 0x4a2   : > { %11265 = vpow2.f32 %v2637_v63  ;;  %v2615_v61 = vsub.f32 %v12832_v24, %v2593_v19 }
 0x4a3   : > { %v12932_v21 = vpop.eup %11259 }
 0x4a4   : > { %v2643_v51 = vmul.f32 1.442695, %v2615_v61  ;;  %v2663_v37 = vsel %vm2554_vm1, %v12932_v21, 0.0 }
 0x4a5   : > { %v2596_v34 = vpop.xlane.xlu1 %2595  ;;  %2664 = vadd.xlane.f32.xlu0 %v2663_v37 }
 0x4a6   : > { %11267 = vpow2.f32 %v2643_v51  ;;  %v2616_v40 = vsub.f32 %v12841_v50, %v2596_v34 }
 0x4a7   : > { %v12937_v56 = vpop.eup %11261 }
 0x4a8   : > { %v2645_v58 = vmul.f32 1.442695, %v2616_v40  ;;  %v2666_v49 = vsel %vm2554_vm1, %v12937_v56, 0.0 }
 0x4a9   : > { %v2566_v32 = vpop.xlane.xlu1 %2565  ;;  %2667 = vadd.xlane.f32.xlu1 %v2666_v49  ;;  %v2563_v24 = vpop.xlane.xlu0 %2562 }
 0x4aa   : > { %11269 = vpow2.f32 %v2645_v58  ;;  %v2606_v30 = vsub.f32 %v12844_v27, %v2566_v32  ;;  %v2605_v60 = vsub.f32 %v12849_v33, %v2563_v24 }
 0x4ab   : > { %v12943_v59 = vpop.eup %11263 }
 0x4ac   : > { %v2625_v5 = vmul.f32 1.442695, %v2606_v30  ;;  %v2623_v63 = vmul.f32 1.442695, %v2605_v60  ;;  %v2675_v50 = vsel %vm2554_vm1, %v12943_v59, 0.0 }
 0x4ad   : > { %2676 = vadd.xlane.f32.xlu0 %v2675_v50 }
 0x4ae   : > { %11271 = vpow2.f32 %v2625_v5 }
 0x4af   : > { %v12947_v16 = vpop.eup %11265  ;;  %11273 = vpow2.f32 %v2623_v63  ;;  %v2578_v19 = vpop.xlane.xlu1 %2577 }
 0x4b0   : > { %v2610_v61 = vsub.f32 %v12856_v54, %v2578_v19  ;;  %v2678_v27 = vsel %vm2554_vm1, %v12947_v16, 0.0 }
 0x4b1   : > { %v2575_v51 = vpop.xlane.xlu0 %2574  ;;  %2679 = vadd.xlane.f32.xlu1 %v2678_v27 }
 0x4b2   : > { %v2633_v33 = vmul.f32 1.442695, %v2610_v61  ;;  %v2609_v37 = vsub.f32 %v12859_v44, %v2575_v51 }
 0x4b3   : > { %v12953_v34 = vpop.eup %11267 }
 0x4b4   : > { %11275 = vpow2.f32 %v2633_v33  ;;  %v2631_v40 = vmul.f32 1.442695, %v2609_v37  ;;  %v2687_v58 = vsel %vm2554_vm1, %v12953_v34, 0.0 }
 0x4b5   : > { %2688 = vadd.xlane.f32.xlu0 %v2687_v58 }
 0x4b6   : > { %11277 = vpow2.f32 %v2631_v40 }
 0x4b7   : > { %v12957_v49 = vpop.eup %11269  ;;  %v2590_v54 = vpop.xlane.xlu1 %2589 }
 0x4b8   : > { %v2614_v32 = vsub.f32 %v12866_v14, %v2590_v54  ;;  %v2690_v24 = vsel %vm2554_vm1, %v12957_v49, 0.0 }
 0x4b9   : > { %v2587_v30 = vpop.xlane.xlu0 %2586  ;;  %2691 = vadd.xlane.f32.xlu1 %v2690_v24 }
 0x4ba   : > { %v2641_v44 = vmul.f32 1.442695, %v2614_v32  ;;  %v2613_v60 = vsub.f32 %v12869_v8, %v2587_v30 }
 0x4bb   : > { %v12963_v5 = vpop.eup %11271 }
 0x4bc   : > { %v12965_v63 = vpop.eup %11273  ;;  %11279 = vpow2.f32 %v2641_v44  ;;  %v2639_v50 = vmul.f32 1.442695, %v2613_v60  ;;  %v2660_v19 = vsel %vm2554_vm1, %v12963_v5, 0.0 }
 0x4bd   : > { %2661 = vadd.xlane.f32.xlu1 %v2660_v19  ;;  %v2657_v14 = vsel %vm2554_vm1, %v12965_v63, 0.0 }
 0x4be   : > { %11281 = vpow2.f32 %v2639_v50  ;;  %2658 = vadd.xlane.f32.xlu0 %v2657_v14 }
 0x4bf   : > { %v2602_v61 = vpop.xlane.xlu1 %2601 }
 0x4c0   : > { %v2618_v27 = vsub.f32 %v12876_v12, %v2602_v61 }
 0x4c1   : > { %v12972_v51 = vpop.eup %11275  ;;  %v2599_v8 = vpop.xlane.xlu0 %2598 }
 0x4c2   : > { %v2649_v33 = vmul.f32 1.442695, %v2618_v27  ;;  %v2617_v37 = vsub.f32 %v12879_v10, %v2599_v8  ;;  %v2672_v40 = vsel %vm2554_vm1, %v12972_v51, 0.0 }
 0x4c3   : > { %v12977_v58 = vpop.eup %11277  ;;  %2673 = vadd.xlane.f32.xlu1 %v2672_v40  ;;  %v13041_v61 = vpop.permute.xlu1 %3788 }
 0x4c4   : > { %11283 = vpow2.f32 %v2649_v33  ;;  %v2647_v54 = vmul.f32 1.442695, %v2617_v37  ;;  %v2669_v32 = vsel %vm2554_vm1, %v12977_v58, 0.0 }
 0x4c5   : > { %2670 = vadd.xlane.f32.xlu0 %v2669_v32  ;;  %v13037_v14 = vpop.permute.xlu0 %3685  ;;  %v15048_v32 = vld [vmem:[#allocation28_spill] sm:$0xff] }
 0x4c6   : > { %11285 = vpow2.f32 %v2647_v54 }
 0x4c7   : > { %v13048_v8 = vpop.permute.xlu1 %3893 }
 0x4c9   : > { %v12981_v12 = vpop.eup %11279  ;;  %v13044_v27 = vpop.permute.xlu0 %3679 }
 0x4ca   : > { %v2684_v24 = vsel %vm2554_vm1, %v12981_v12, 0.0 }
 0x4cb   : > { %v12985_v30 = vpop.eup %11281  ;;  %2685 = vadd.xlane.f32.xlu1 %v2684_v24  ;;  %v13056_v37 = vpop.permute.xlu1 %3782 }
 0x4cc   : > { %v2681_v10 = vsel %vm2554_vm1, %v12985_v30, 0.0 }
 0x4cd   : > { %2682 = vadd.xlane.f32.xlu0 %v2681_v10  ;;  %v13051_v33 = vpop.permute.xlu0 %3681  ;;  %v15049_v10 = vld [vmem:[#allocation79_spill] sm:$0xff] }
 0x4d1   : > { %v12989_v44 = vpop.eup %11283 }
 0x4d2   : > { %v2696_v60 = vsel %vm2554_vm1, %v12989_v44, 0.0 }
 0x4d3   : > { %v12993_v50 = vpop.eup %11285  ;;  %2697 = vadd.xlane.f32.xlu1 %v2696_v60  ;;  %v15050_v60 = vld [vmem:[#allocation83_spill] sm:$0xff] }
 0x4d4   : > { %v2693_v19 = vsel %vm2554_vm1, %v12993_v50, 0.0 }
 0x4d5   : > { %2694 = vadd.xlane.f32.xlu0 %v2693_v19 }
 0x4e4   : > { %3784 = vrot.lane.b32.xlu1 %v12533_v48, %s11772_s7 }
 0x4e8   : > { %3994 = vrot.lane.b32.xlu1 %v12583_v28, %s11772_s7 }
 0x4eb   : > { %3996 = vrot.lane.b32.xlu0 %v12728_v4, %s11772_s7 }
 0x4ec   : > { %3887 = vrot.lane.b32.xlu1 %v12600_v20, %s11772_s7 }
 0x4ef   : > { %3891 = vrot.lane.b32.xlu0 %v12568_v7, %s11772_s7 }
 0x4f0   : > { %4099 = vrot.lane.b32.xlu1 %v12620_v35, %s11772_s7 }
 0x4f3   : > { %3885 = vrot.lane.b32.xlu0 %v12546_v6, %s11772_s7 }
 0x4f4   : > { %4202 = vrot.lane.b32.xlu1 %v12744_v41, %s11772_s7 }
 0x4f7   : > { %3988 = vrot.lane.b32.xlu0 %v12571_v0, %s11772_s7 }
 0x4f8   : > { %4200 = vrot.lane.b32.xlu1 %v12636_v29, %s11772_s7 }
 0x4fb   : > { %3990 = vrot.lane.b32.xlu0 %v12588_v2, %s11772_s7 }
 0x4fc   : > { %4093 = vrot.lane.b32.xlu1 %v12656_v25, %s11772_s7 }
 0x4ff   : > { %4097 = vrot.lane.b32.xlu0 %v12623_v38, %s11772_s7 }
 0x500   : > { %4196 = vrot.lane.b32.xlu1 %v12648_v57, %s11772_s7 }
 0x503   : > { %4091 = vrot.lane.b32.xlu0 %v12603_v13, %s11772_s7 }
 0x504   : > { %3487 = vrot.lane.b32.xlu1 %v12784_v15, %s11773_s19 }
 0x507   : > { %4194 = vrot.lane.b32.xlu0 %v12626_v53, %s11772_s7 }
 0x508   : > { %3590 = vrot.lane.b32.xlu1 %v12780_v9, %s11773_s19 }
 0x50b   : > { %3485 = vrot.lane.b32.xlu0 %v12775_v55, %s11773_s19 }
 0x50c   : > { %3693 = vrot.lane.b32.xlu1 %v12802_v47, %s11773_s19 }
 0x50f   : > { %3588 = vrot.lane.b32.xlu0 %v12773_v42, %s11773_s19 }
 0x510   : > { %3796 = vrot.lane.b32.xlu1 %v12798_v39, %s11773_s19  ;;  %v15076_v39 = vld [vmem:[#allocation50_spill] sm:$0xff] }
 0x513   : > { %3691 = vrot.lane.b32.xlu0 %v12793_v23, %s11773_s19 }
 0x514   : > { %3899 = vrot.lane.b32.xlu1 %v12820_v22, %s11773_s19 }
 0x517   : > { %3794 = vrot.lane.b32.xlu0 %v12789_v52, %s11773_s19 }
 0x518   : > { %4002 = vrot.lane.b32.xlu1 %v12816_v3, %s11773_s19 }
 0x51b   : > { %3897 = vrot.lane.b32.xlu0 %v12811_v43, %s11773_s19 }
 0x51c   : > { %4105 = vrot.lane.b32.xlu1 %v12838_v11, %s11773_s19 }
 0x51f   : > { %4000 = vrot.lane.b32.xlu0 %v12807_v1, %s11773_s19 }
 0x520   : > { %4208 = vrot.lane.b32.xlu1 %v12834_v36, %s11773_s19 }
 0x523   : > { %4103 = vrot.lane.b32.xlu0 %v12829_v46, %s11773_s19  ;;  %v15075_v46 = vld [vmem:[#allocation38_spill] sm:$0xff] }
 0x524   : > { %4564 = vrot.lane.b32.xlu1 %v12472_v31, %s11772_s7 }
 0x526   : > { %v2653_v40 = vpop.xlane.xlu0 %2652 }
 0x527   : > { %4206 = vrot.lane.b32.xlu0 %v12825_v18, %s11773_s19  ;;  %11287 = vrcp.f32 %v2653_v40  ;;  %v15051_v40 = vld [vmem:[#allocation35_spill] sm:$0xff] }
 0x528   : > { %4473 = vrot.lane.b32.xlu1 %v12661_v26, %s11772_s7  ;;  %v15052_v26 = vld [vmem:[#allocation42_spill] sm:$0xff] }
 0x52a   : > { %v2656_v54 = vpop.xlane.xlu1 %2655 }
 0x52b   : > { %11289 = vrcp.f32 %v2656_v54  ;;  %4475 = vrot.lane.b32.xlu0 %v12645_v62, %s11772_s7 }
 0x52c   : > { %4562 = vrot.lane.b32.xlu1 %v15048_v32, %s11772_s7 }
 0x52e   : > { %v2665_v24 = vpop.xlane.xlu0 %2664 }
 0x52f   : > { %4653 = vrot.lane.b32.xlu0 %v15049_v10, %s11772_s7  ;;  %11291 = vrcp.f32 %v2665_v24 }
 0x530   : > { %4742 = vrot.lane.b32.xlu1 %v15050_v60, %s11772_s7 }
 0x532   : > { %v2668_v19 = vpop.xlane.xlu1 %2667 }
 0x533   : > { %11293 = vrcp.f32 %v2668_v19  ;;  %4651 = vrot.lane.b32.xlu0 %v15051_v40, %s11772_s7 }
 0x534   : > { %v11288_v54 = vpop.eup %11287  ;;  %4740 = vrot.lane.b32.xlu1 %v15052_v26, %s11772_s7 }
 0x535   : > { %v2715_v62 = vmul.f32 %v11288_v54, %v12922_v45  ;;  %v15054_v54 = vld [vmem:[#allocation49_spill] sm:$0xff] }
 0x536   : > { %v2677_v32 = vpop.xlane.xlu0 %2676 }
 0x537   : > { %11295 = vrcp.f32 %v2677_v32  ;;  %10561 = vmatprep.mubr.msk.f32.mxu0 %vm2554_vm1, %v2715_v62  ;;  %v15053_v32 = vld [vmem:[#allocation51_spill] sm:$0xff] }
 0x538   : > { %v11290_v36 = vpop.eup %11289 }
 0x539   : > { %v2716_v24 = vmul.f32 %v11290_v36, %v12927_v17 }
 0x53a   : > { %v2680_v31 = vpop.xlane.xlu1 %2679 }
 0x53b   : > { %11297 = vrcp.f32 %v2680_v31  ;;  %10562 = vmatmul.mubr.msk.f32.vlgmr.msra.gmra.mxu0 %vm2554_vm1, %v2716_v24 }
 0x53c   : > { %v11292_v19 = vpop.eup %11291  ;;  %10572 = vmatpush3.msra.mxu0 %v15049_v10  ;;  %v15073_v10 = vld [vmem:[#allocation25_spill] sm:$0xff] }
 0x53d   : > { %10573 = vmatprep.subr.mxu0 %v15051_v40  ;;  %v2719_v11 = vmul.f32 %v11292_v19, %v12932_v21  ;;  %v15055_v19 = vld [vmem:[#allocation66_spill] sm:$0xff] }
 0x53e   : > { %10574 = vmatpush3.msra.mxu0 %v15051_v40  ;;  %v2689_v45 = vpop.xlane.xlu0 %2688 }
 0x53f   : > { %10585 = vmatprep.subr.mxu0 %v15053_v32  ;;  %11299 = vrcp.f32 %v2689_v45  ;;  %10575 = vmatprep.mubr.msk.f32.mxu0 %vm2554_vm1, %v2719_v11 }
 0x540   : > { %v11294_v62 = vpop.eup %11293 }
 0x541   : > { %v2720_v31 = vmul.f32 %v11294_v62, %v12937_v56 }
 0x542   : > { %v2692_v36 = vpop.xlane.xlu1 %2691 }
 0x543   : > { %11301 = vrcp.f32 %v2692_v36  ;;  %10576 = vmatmul.mubr.msk.f32.vlgmr.msra.gmra.mxu0 %vm2554_vm1, %v2720_v31 }
 0x544   : > { %v11296_v17 = vpop.eup %11295  ;;  %10586 = vmatpush3.msra.mxu0 %v15053_v32 }
 0x545   : > { %10587 = vmatprep.subr.mxu0 %v15054_v54  ;;  %v2723_v21 = vmul.f32 %v11296_v17, %v12943_v59  ;;  %v15056_v59 = vld [vmem:[#allocation64_spill] sm:$0xff] }
 0x546   : > { %10588 = vmatpush3.msra.mxu0 %v15054_v54  ;;  %v2662_v24 = vpop.xlane.xlu1 %2661 }
 0x547   : > { %11303 = vrcp.f32 %v2662_v24  ;;  %10599 = vmatprep.subr.mxu0 %v15055_v19  ;;  %v2659_v11 = vpop.xlane.xlu0 %2658  ;;  %10589 = vmatprep.mubr.msk.f32.mxu0 %vm2554_vm1, %v2723_v21  ;;  %v15057_v21 = vld [vmem:[#allocation107_spill] sm:$0xff] }
 0x548   : > { %v11298_v56 = vpop.eup %11297  ;;  %11305 = vrcp.f32 %v2659_v11 }
 0x549   : > { %v2724_v45 = vmul.f32 %v11298_v56, %v12947_v16 }
 0x54b   : > { %10590 = vmatmul.mubr.msk.f32.vlgmr.msra.gmra.mxu0 %vm2554_vm1, %v2724_v45 }
 0x54c   : > { %v11300_v62 = vpop.eup %11299  ;;  %v2674_v31 = vpop.xlane.xlu1 %2673  ;;  %10600 = vmatpush3.msra.mxu0 %v15055_v19 }
 0x54d   : > { %10601 = vmatprep.subr.mxu0 %v15056_v59  ;;  %v2727_v36 = vmul.f32 %v11300_v62, %v12953_v34  ;;  %11307 = vrcp.f32 %v2674_v31  ;;  %v15058_v34 = vld [vmem:[#allocation103_spill] sm:$0xff]  ;;  %v15059_v62 = vld [vmem:[#allocation101_spill] sm:$0xff] }
 0x54e   : > { %10602 = vmatpush3.msra.mxu0 %v15056_v59  ;;  %v2671_v17 = vpop.xlane.xlu0 %2670 }
 0x54f   : > { %11309 = vrcp.f32 %v2671_v17  ;;  %10613 = vmatprep.subr.msk.mxu0 %vm1857_vm0, %v15057_v21  ;;  %10603 = vmatprep.mubr.msk.f32.mxu0 %vm2554_vm1, %v2727_v36  ;;  %v15060_v17 = vld [vmem:[#allocation110_spill] sm:$0xff] }
 0x550   : > { %v11302_v16 = vpop.eup %11301 }
 0x551   : > { %v2728_v24 = vmul.f32 %v11302_v16, %v12957_v49 }
 0x553   : > { %10604 = vmatmul.mubr.msk.f32.vlgmr.msra.gmra.mxu0 %vm2554_vm1, %v2728_v24  ;;  %v15062_v24 = vld [vmem:[#allocation60_spill] sm:$0xff] }
 0x554   : > { %v11304_v11 = vpop.eup %11303  ;;  %v2686_v56 = vpop.xlane.xlu1 %2685  ;;  %10614 = vmatpush3.xpose.msk.msra.mxu0 %vm1857_vm0, %v15057_v21  ;;  %10617 = vmatprep.mubr.msk.f32.mxu0 %vm1857_vm0, %v15058_v34 }
 0x555   : > { %v11306_v45 = vpop.eup %11305  ;;  %10615 = vmatprep.subr.msk.mxu0 %vm1857_vm0, %v15059_v62  ;;  %v2718_v31 = vmul.f32 %v11304_v11, %v12963_v5  ;;  %11311 = vrcp.f32 %v2686_v56  ;;  %v15061_v5 = vld [vmem:[#allocation105_spill] sm:$0xff] }
 0x556   : > { %v2683_v36 = vpop.xlane.xlu0 %2682  ;;  %v2717_v49 = vmul.f32 %v11306_v45, %v12965_v63 }
 0x557   : > { %11313 = vrcp.f32 %v2683_v36 }
 0x558   : > { %10568 = vmatprep.mubr.msk.f32.mxu1 %vm2554_vm1, %v2717_v49  ;;  %10616 = vmatpush3.xpose.msk.msra.mxu0 %vm1857_vm0, %v15059_v62 }
 0x559   : > { %10569 = vmatmul.mubr.msk.f32.vlgmr.msra.gmra.mxu1 %vm2554_vm1, %v2718_v31  ;;  %10627 = vmatprep.subr.msk.mxu0 %vm1857_vm0, %v15060_v17  ;;  %v15064_v31 = vld [vmem:[#allocation76_spill] sm:$0xff] }
 0x55a   : > { %10579 = vmatpush3.msra.mxu1 %v15050_v60  ;;  %v11308_v21 = vpop.eup %11307  ;;  %v15072_v60 = vld [vmem:[#allocation22_spill] sm:$0xff] }
 0x55b   : > { %10580 = vmatprep.subr.mxu1 %v15052_v26  ;;  %10618 = vmatmul.mubr.msk.f32.vlgmr.msra.gmra.mxu0 %vm1857_vm0, %v15061_v5  ;;  %v2722_v34 = vmul.f32 %v11308_v21, %v12972_v51 }
 0x55c   : > { %v11310_v63 = vpop.eup %11309  ;;  %10581 = vmatpush3.msra.mxu1 %v15052_v26  ;;  %v2698_v16 = vpop.xlane.xlu1 %2697  ;;  %10628 = vmatpush3.xpose.msk.msra.mxu0 %vm1857_vm0, %v15060_v17  ;;  %v15071_v26 = vld [vmem:[#allocation20_spill] sm:$0xff] }
 0x55d   : > { %10592 = vmatprep.subr.mxu1 %v15062_v24  ;;  %10631 = vmatprep.mubr.msk.f32.mxu0 %vm1857_vm0, %v13044_v27  ;;  %v2721_v11 = vmul.f32 %v11310_v63, %v12977_v58  ;;  %11315 = vrcp.f32 %v2698_v16  ;;  %v15063_v58 = vld [vmem:[#allocation56_spill] sm:$0xff]  ;;  %v1184_v40 = vadd.f32 %v15073_v10, %v15071_v26  ;;  %v1220_v43 = vadd.f32 %v15076_v39, %v15071_v26 }
 0x55e   : > { %10629 = vmatprep.subr.msk.mxu0 %vm1857_vm0, %v13037_v14  ;;  %v2695_v56 = vpop.xlane.xlu0 %2694 }
 0x55f   : > { %11317 = vrcp.f32 %v2695_v56  ;;  %10582 = vmatprep.mubr.msk.f32.mxu1 %vm2554_vm1, %v2721_v11  ;;  %v9834_v18 = vmul.f32 -1.442695, %v1184_v40 }
 0x560   : > { %v3785_v45 = vpop.permute.xlu1 %3784  ;;  %10583 = vmatmul.mubr.msk.f32.vlgmr.msra.gmra.mxu1 %vm2554_vm1, %v2722_v34  ;;  %10630 = vmatpush3.xpose.msk.msra.mxu0 %vm1857_vm0, %v13037_v14 }
 0x561   : > { %10593 = vmatpush3.msra.mxu1 %v15062_v24  ;;  %10641 = vmatprep.subr.msk.mxu0 %vm1857_vm0, %v13048_v8 }
 0x562   : > { %10594 = vmatprep.subr.mxu1 %v15063_v58  ;;  %v3997_v27 = vpop.permute.xlu0 %3996  ;;  %v11312_v62 = vpop.eup %11311 }
 0x563   : > { %10595 = vmatpush3.msra.mxu1 %v15063_v58  ;;  %10632 = vmatmul.mubr.msk.f32.vlgmr.msra.gmra.mxu0 %vm1857_vm0, %v13051_v33  ;;  %v2726_v17 = vmul.f32 %v11312_v62, %v12981_v12  ;;  %v15065_v33 = vld [vmem:[#allocation71_spill] sm:$0xff]  ;;  %v15067_v62 = vld [vmem:[#allocation102_spill] sm:$0xff] }
 0x564   : > { %v11314_v51 = vpop.eup %11313  ;;  %10606 = vmatprep.subr.mxu1 %v15064_v31  ;;  %v3995_v36 = vpop.permute.xlu1 %3994  ;;  %10642 = vmatpush3.xpose.msk.msra.mxu0 %vm1857_vm0, %v13048_v8 }
 0x565   : > { %v2725_v14 = vmul.f32 %v11314_v51, %v12985_v30  ;;  %v15066_v30 = vld [vmem:[#allocation108_spill] sm:$0xff] }
 0x566   : > { %v3892_v49 = vpop.permute.xlu0 %3891  ;;  %v15068_v51 = vld [vmem:[#allocation104_spill] sm:$0xff] }
 0x567   : > { %10596 = vmatprep.mubr.msk.f32.mxu1 %vm2554_vm1, %v2725_v14  ;;  %10643 = vmatprep.subr.msk.mxu0 %vm1857_vm0, %v3892_v49 }
 0x568   : > { %v3888_v21 = vpop.permute.xlu1 %3887  ;;  %10597 = vmatmul.mubr.msk.f32.vlgmr.msra.gmra.mxu1 %vm2554_vm1, %v2726_v17  ;;  %10644 = vmatpush3.xpose.msk.msra.mxu0 %vm1857_vm0, %v3892_v49  ;;  %v15070_v17 = vld [vmem:[#allocation106_spill] sm:$0xff] }
 0x569   : > { %10607 = vmatpush3.msra.mxu1 %v15064_v31 }
 0x56a   : > { %10608 = vmatprep.subr.mxu1 %v15065_v33  ;;  %v3886_v5 = vpop.permute.xlu0 %3885  ;;  %v11316_v8 = vpop.eup %11315 }
 0x56b   : > { %10609 = vmatpush3.msra.mxu1 %v15065_v33  ;;  %10645 = vmatprep.mubr.msk.f32.mxu0 %vm1857_vm0, %v3886_v5  ;;  %v2730_v56 = vmul.f32 %v11316_v8, %v12989_v44  ;;  %v15069_v44 = vld [vmem:[#allocation109_spill] sm:$0xff] }
 0x56c   : > { %v11318_v12 = vpop.eup %11317  ;;  %10620 = vmatprep.subr.msk.mxu1 %vm1857_vm0, %v15066_v30  ;;  %v4100_v63 = vpop.permute.xlu1 %4099  ;;  %10646 = vmatmul.mubr.msk.f32.vlgmr.msra.gmra.mxu0 %vm1857_vm0, %v3888_v21 }
 0x56d   : > { %10655 = vmatprep.subr.msk.mxu0 %vm1857_vm0, %v4100_v63  ;;  %v2729_v16 = vmul.f32 %v11318_v12, %v12993_v50 }
 0x56e   : > { %10656 = vmatpush3.xpose.msk.msra.mxu0 %vm1857_vm0, %v4100_v63  ;;  %v3989_v11 = vpop.permute.xlu0 %3988 }
 0x56f   : > { %10610 = vmatprep.mubr.msk.f32.mxu1 %vm2554_vm1, %v2729_v16 }
 0x570   : > { %v4203_v34 = vpop.permute.xlu1 %4202  ;;  %10611 = vmatmul.mubr.msk.f32.vlgmr.msra.gmra.mxu1 %vm2554_vm1, %v2730_v56 }
 0x571   : > { %10621 = vmatpush3.xpose.msk.msra.mxu1 %vm1857_vm0, %v15066_v30  ;;  %10624 = vmatprep.mubr.msk.f32.mxu1 %vm1857_vm0, %v15067_v62 }
 0x572   : > { %10622 = vmatprep.subr.msk.mxu1 %vm1857_vm0, %v15068_v51  ;;  %v3991_v50 = vpop.permute.xlu0 %3990 }
 0x574   : > { %v4201_v14 = vpop.permute.xlu1 %4200 }
 0x575   : > { %10623 = vmatpush3.xpose.msk.msra.mxu1 %vm1857_vm0, %v15068_v51 }
 0x576   : > { %10634 = vmatprep.subr.msk.mxu1 %vm1857_vm0, %v15069_v44  ;;  %v4098_v49 = vpop.permute.xlu0 %4097 }
 0x577   : > { %10657 = vmatprep.subr.msk.mxu0 %vm1857_vm0, %v4098_v49 }
 0x578   : > { %10625 = vmatmul.mubr.msk.f32.vlgmr.msra.gmra.mxu1 %vm1857_vm0, %v15070_v17  ;;  %v4094_v21 = vpop.permute.xlu1 %4093  ;;  %10658 = vmatpush3.xpose.msk.msra.mxu0 %vm1857_vm0, %v4098_v49 }
 0x579   : > { %10635 = vmatpush3.xpose.msk.msra.mxu1 %vm1857_vm0, %v15069_v44  ;;  %10638 = vmatprep.mubr.msk.f32.mxu1 %vm1857_vm0, %v13056_v37 }
 0x57a   : > { %10636 = vmatprep.subr.msk.mxu1 %vm1857_vm0, %v13041_v61  ;;  %v4092_v5 = vpop.permute.xlu0 %4091 }
 0x57b   : > { %10659 = vmatprep.mubr.msk.f32.mxu0 %vm1857_vm0, %v4092_v5 }
 0x57c   : > { %v4197_v8 = vpop.permute.xlu1 %4196  ;;  %10660 = vmatmul.mubr.msk.f32.vlgmr.msra.gmra.mxu0 %vm1857_vm0, %v4094_v21 }
 0x57d   : > { %10637 = vmatpush3.xpose.msk.msra.mxu1 %vm1857_vm0, %v13041_v61 }
 0x57e   : > { %10648 = vmatprep.subr.msk.mxu1 %vm1857_vm0, %v3997_v27  ;;  %v4195_v12 = vpop.permute.xlu0 %4194 }
 0x580   : > { %10639 = vmatmul.mubr.msk.f32.vlgmr.msra.gmra.mxu1 %vm1857_vm0, %v3785_v45  ;;  %v13189_v30 = vpop.permute.xlu1 %3487 }
 0x581   : > { %10649 = vmatpush3.xpose.msk.msra.mxu1 %vm1857_vm0, %v3997_v27  ;;  %10652 = vmatprep.mubr.msk.f32.mxu1 %vm1857_vm0, %v3989_v11 }
 0x582   : > { %10650 = vmatprep.subr.msk.mxu1 %vm1857_vm0, %v3995_v36  ;;  %v13194_v37 = vpop.permute.xlu0 %3485 }
 0x584   : > { %v13196_v63 = vpop.permute.xlu1 %3590 }
 0x585   : > { %10651 = vmatpush3.xpose.msk.msra.mxu1 %vm1857_vm0, %v3995_v36 }
 0x586   : > { %10662 = vmatprep.subr.msk.mxu1 %vm1857_vm0, %v4203_v34  ;;  %v13200_v61 = vpop.permute.xlu0 %3588 }
 0x588   : > { %10653 = vmatmul.mubr.msk.f32.vlgmr.msra.gmra.mxu1 %vm1857_vm0, %v3991_v50  ;;  %v13203_v45 = vpop.permute.xlu1 %3693 }
 0x589   : > { %10663 = vmatpush3.xpose.msk.msra.mxu1 %vm1857_vm0, %v4203_v34  ;;  %10666 = vmatprep.mubr.msk.f32.mxu1 %vm1857_vm0, %v4195_v12 }
 0x58a   : > { %10664 = vmatprep.subr.msk.mxu1 %vm1857_vm0, %v4201_v14  ;;  %v13208_v27 = vpop.permute.xlu0 %3691 }
 0x58c   : > { %v13210_v16 = vpop.permute.xlu1 %3796 }
 0x58d   : > { %10665 = vmatpush3.xpose.msk.msra.mxu1 %vm1857_vm0, %v4201_v14 }
 0x58e   : > { %v13213_v36 = vpop.permute.xlu0 %3794 }
 0x590   : > { %10667 = vmatmul.mubr.msk.f32.vlgmr.msra.gmra.mxu1 %vm1857_vm0, %v4197_v8  ;;  %v13216_v11 = vpop.permute.xlu1 %3899 }
 0x592   : > { %v13218_v56 = vpop.permute.xlu0 %3897 }
 0x594   : > { %v13220_v62 = vpop.permute.xlu1 %4002 }
 0x596   : > { %v13222_v34 = vpop.permute.xlu0 %4000 }
 0x598   : > { %v13224_v51 = vpop.permute.xlu1 %4105 }
 0x59a   : > { %v13226_v50 = vpop.permute.xlu0 %4103 }
 0x59c   : > { %v13228_v44 = vpop.permute.xlu1 %4208 }
 0x59e   : > { %v13230_v49 = vpop.permute.xlu0 %4206 }
 0x5a0   : > { %v4565_v14 = vpop.permute.xlu1 %4564 }
 0x5a1   : > { %10676 = vmatprep.subr.mxu1 %v4565_v14 }
 0x5a2   : > { %10677 = vmatpush3.msra.mxu1 %v4565_v14  ;;  %v4476_v17 = vpop.permute.xlu0 %4475  ;;  %v1180_v14 = vadd.f32 %v15072_v60, %v15071_v26  ;;  %v15077_v60 = vld [vmem:[#allocation52_spill] sm:$0xff] }
 0x5a3   : > { %10669 = vmatprep.subr.mxu0 %v4476_v17  ;;  %v1224_v10 = vadd.f32 %v15077_v60, %v15071_v26 }
 0x5a4   : > { %v4474_v21 = vpop.permute.xlu1 %4473  ;;  %10670 = vmatpush3.msra.mxu0 %v4476_v17  ;;  %v9833_v17 = vmul.f32 -1.442695, %v1180_v14  ;;  %v9841_v14 = vmul.f32 -1.442695, %v1220_v43  ;;  %v15080_v43 = vld [vmem:[#allocation29_spill] sm:$0xff] }
 0x5a5   : > { %10671 = vmatprep.subr.mxu0 %v4474_v21 }
 0x5a6   : > { %10672 = vmatpush3.msra.mxu0 %v4474_v21  ;;  %v13232_v5 = vpop.permute.xlu0 %4653  ;;  %11319 = vpow2.f32 %v9833_v17  ;;  %v15074_v21 = vld [vmem:[#allocation36_spill] sm:$0xff]  ;;  %v9842_v17 = vmul.f32 -1.442695, %v1224_v10  ;;  %v1190_v10 = vadd.f32 %v15080_v43, %v15071_v26 }
 0x5a7   : > { %10683 = vmatprep.subr.mxu0 %v13232_v5  ;;  %v1200_v3 = vadd.f32 %v15074_v21, %v15071_v26  ;;  %11321 = vpow2.f32 %v9834_v18  ;;  %v15078_v18 = vld [vmem:[#allocation65_spill] sm:$0xff] }
 0x5a8   : > { %v4563_v8 = vpop.permute.xlu1 %4562  ;;  %v1240_v21 = vadd.f32 %v15078_v18, %v15071_v26 }
 0x5a9   : > { %10678 = vmatprep.subr.mxu1 %v4563_v8  ;;  %v9837_v22 = vmul.f32 -1.442695, %v1200_v3  ;;  %v15079_v3 = vld [vmem:[#allocation67_spill] sm:$0xff] }
 0x5aa   : > { %10679 = vmatpush3.msra.mxu1 %v4563_v8  ;;  %v1204_v8 = vadd.f32 %v15075_v46, %v15071_v26  ;;  %v9845_v39 = vmul.f32 -1.442695, %v1240_v21 }
 0x5ab   : > { %11323 = vpow2.f32 %v9837_v22  ;;  %v1244_v22 = vadd.f32 %v15079_v3, %v15071_v26  ;;  %v15082_v3 = vld [vmem:[#allocation43_spill] sm:$0xff] }
 0x5ac   : > { %v13235_v12 = vpop.permute.xlu1 %4742  ;;  %v9838_v1 = vmul.f32 -1.442695, %v1204_v8 }
 0x5ad   : > { %10690 = vmatprep.subr.mxu1 %v13235_v12  ;;  %v9846_v8 = vmul.f32 -1.442695, %v1244_v22  ;;  %v15083_v22 = vld [vmem:[#allocation45_spill] sm:$0xff] }
 0x5ae   : > { %11325 = vpow2.f32 %v9838_v1  ;;  %v1214_v43 = vadd.f32 %v15083_v22, %v15071_v26 }
 0x5af   : > { %11327 = vpow2.f32 %v9841_v14 }
 0x5b0   : > { %11329 = vpow2.f32 %v9842_v17 }
 0x5b3   : > { %v11320_v40 = vpop.eup %11319 }
 0x5b4   : > { %v11322_v47 = vpop.eup %11321  ;;  %v1384_v52 = vadd.f32 1.0, %v11320_v40  ;;  %v15081_v40 = vld [vmem:[#allocation32_spill] sm:$0xff] }
 0x5b5   : > { %v1385_v46 = vadd.f32 1.0, %v11322_v47  ;;  %v1194_v14 = vadd.f32 %v15081_v40, %v15071_v26  ;;  %v9835_v47 = vmul.f32 -1.442695, %v1190_v10  ;;  %v9840_v10 = vmul.f32 -1.442695, %v1214_v43 }
 0x5b6   : > { %11331 = vrcp.f32 %v1384_v52  ;;  %v1210_v52 = vadd.f32 %v15082_v3, %v15071_v26 }
 0x5b7   : > { %11333 = vrcp.f32 %v1385_v46  ;;  %v9836_v17 = vmul.f32 -1.442695, %v1194_v14 }
 0x5b8   : > { %v11324_v1 = vpop.eup %11323  ;;  %11335 = vpow2.f32 %v9845_v39  ;;  %v9839_v23 = vmul.f32 -1.442695, %v1210_v52 }
 0x5b9   : > { %v1388_v9 = vadd.f32 1.0, %v11324_v1  ;;  %11337 = vpow2.f32 %v9846_v8 }
 0x5bb   : > { %v11326_v60 = vpop.eup %11325  ;;  %11339 = vrcp.f32 %v1388_v9  ;;  %v15084_v9 = vld [vmem:[#allocation57_spill] sm:$0xff] }
 0x5bc   : > { %v1389_v18 = vadd.f32 1.0, %v11326_v60  ;;  %v11328_v21 = vpop.eup %11327 }
 0x5bd   : > { %v11330_v46 = vpop.eup %11329  ;;  %v1392_v40 = vadd.f32 1.0, %v11328_v21 }
 0x5be   : > { %11341 = vrcp.f32 %v1389_v18  ;;  %v1393_v8 = vadd.f32 1.0, %v11330_v46  ;;  %v1230_v18 = vadd.f32 %v15084_v9, %v15071_v26  ;;  %v15087_v46 = vld [vmem:[#allocation61_spill] sm:$0xff] }
 0x5bf   : > { %11343 = vpow2.f32 %v9835_v47 }
 0x5c0   : > { %11345 = vpow2.f32 %v9836_v17  ;;  %v9843_v22 = vmul.f32 -1.442695, %v1230_v18 }
 0x5c1   : > { %11347 = vpow2.f32 %v9839_v23  ;;  %v1234_v23 = vadd.f32 %v15087_v46, %v15071_v26 }
 0x5c2   : > { %11349 = vrcp.f32 %v1392_v40 }
 0x5c3   : > { %v13262_v39 = vpop.eup %11331  ;;  %11351 = vrcp.f32 %v1393_v8 }
 0x5c4   : > { %v13264_v60 = vpop.eup %11333  ;;  %11353 = vpow2.f32 %v9840_v10 }
 0x5c5   : > { %v11336_v17 = vpop.eup %11335  ;;  %11355 = vpow2.f32 %v9843_v22 }
 0x5c6   : > { %v11338_v21 = vpop.eup %11337  ;;  %v1396_v43 = vadd.f32 1.0, %v11336_v17 }
 0x5c8   : > { %v13278_v15 = vpop.eup %11339  ;;  %11357 = vrcp.f32 %v1396_v43 }
 0x5c9   : > { %15088 = vst [vmem:[#allocation101_spill] sm:$0xff] %v13278_v15 }
 0x5cb   : > { %v13280_v42 = vpop.eup %11341 }
 0x5cc   : > { %15089 = vst [vmem:[#allocation110_spill] sm:$0xff] %v13280_v42  ;;  %v11344_v57 = vpop.eup %11343 }
 0x5cd   : > { %v11346_v52 = vpop.eup %11345  ;;  %v1386_v17 = vadd.f32 1.0, %v11344_v57 }
 0x5fb   : > { %v10563_v1 = vpop.f32.mrf.mxu0 }
 0x5fc   : > { %v13269_v47 = vmul.f32 %v13264_v60, %v10563_v1  ;;  %v1397_v1 = vadd.f32 1.0, %v11338_v21  ;;  %v15092_v21 = vld [vmem:[#allocation84_spill] sm:$0xff] }
 0x5fd   : > { %v2803_v14 = vpop.f32.mrf.mxu0  ;;  %v1254_v46 = vadd.f32 %v15092_v21, %v15071_v26 }
 0x5fe   : > { %15085 = vst [vmem:[#allocation107_spill] sm:$0xff] %v13269_v47  ;;  %v13272_v3 = vmul.f32 %v13262_v39, %v2803_v14  ;;  %v9844_v14 = vmul.f32 -1.442695, %v1234_v23  ;;  %11359 = vrcp.f32 %v1397_v1  ;;  %v1387_v23 = vadd.f32 1.0, %v11346_v52 }
 0x5ff   : > { %v9848_v43 = vmul.f32 -1.442695, %v1254_v46 }
 0x600   : > { %15086 = vst [vmem:[#allocation103_spill] sm:$0xff] %v13272_v3  ;;  %11361 = vpow2.f32 %v9844_v14  ;;  %v11348_v3 = vpop.eup %11347 }
 0x601   : > { %v13292_v47 = vpop.eup %11349  ;;  %11363 = vrcp.f32 %v1386_v17  ;;  %v1390_v26 = vadd.f32 1.0, %v11348_v3 }
 0x602   : > { %15093 = vst [vmem:[#allocation102_spill] sm:$0xff] %v13292_v47  ;;  %11365 = vrcp.f32 %v1387_v23 }
 0x603   : > { %v10577_v9 = vpop.f32.mrf.mxu0 }
 0x604   : > { %v13283_v8 = vmul.f32 %v13280_v42, %v10577_v9  ;;  %v15094_v9 = vld [vmem:[#allocation73_spill] sm:$0xff] }
 0x605   : > { %v2965_v40 = vpop.f32.mrf.mxu0  ;;  %v9847_v55 = vmul.f32 -1.442695, %v15094_v9 }
 0x606   : > { %15090 = vst [vmem:[#allocation105_spill] sm:$0xff] %v13283_v8  ;;  %v13286_v10 = vmul.f32 %v13278_v15, %v2965_v40  ;;  %v13295_v40 = vpop.eup %11351 }
 0x607   : > { %15095 = vst [vmem:[#allocation104_spill] sm:$0xff] %v13295_v40  ;;  %v11354_v25 = vpop.eup %11353  ;;  %11367 = vpow2.f32 %v9847_v55 }
 0x608   : > { %15091 = vst [vmem:[#allocation108_spill] sm:$0xff] %v13286_v10  ;;  %v1391_v21 = vadd.f32 1.0, %v11354_v25  ;;  %11369 = vpow2.f32 %v9848_v43  ;;  %v11356_v9 = vpop.eup %11355 }
 0x609   : > { %v13305_v17 = vpop.eup %11357  ;;  %11371 = vrcp.f32 %v1390_v26  ;;  %v1394_v3 = vadd.f32 1.0, %v11356_v9 }
 0x60a   : > { %15098 = vst [vmem:[#allocation20_spill] sm:$0xff] %v13305_v17  ;;  %11373 = vrcp.f32 %v1391_v21 }
 0x60b   : > { %v10591_v22 = vpop.f32.mrf.mxu0  ;;  %v13307_v46 = vpop.eup %11359  ;;  %11375 = vrcp.f32 %v1394_v3 }
 0x60c   : > { %v13298_v57 = vmul.f32 %v13295_v40, %v10591_v22  ;;  %15099 = vst [vmem:[#allocation22_spill] sm:$0xff] %v13307_v46 }
 0x60d   : > { %v3127_v1 = vpop.f32.mrf.mxu0  ;;  %v11362_v22 = vpop.eup %11361 }
 0x60e   : > { %15096 = vst [vmem:[#allocation109_spill] sm:$0xff] %v13298_v57  ;;  %v13301_v14 = vmul.f32 %v13292_v47, %v3127_v1  ;;  %v1395_v43 = vadd.f32 1.0, %v11362_v22 }
 0x610   : > { %15097 = vst [vmem:[#allocation106_spill] sm:$0xff] %v13301_v14  ;;  %v13317_v14 = vpop.eup %11363  ;;  %11377 = vrcp.f32 %v1395_v43 }
 0x611   : > { %15102 = vst [vmem:[#allocation38_spill] sm:$0xff] %v13317_v14  ;;  %v13319_v26 = vpop.eup %11365 }
 0x612   : > { %15103 = vst [vmem:[#allocation50_spill] sm:$0xff] %v13319_v26 }
 0x613   : > { %v10605_v18 = vpop.f32.mrf.mxu0 }
 0x614   : > { %v13310_v1 = vmul.f32 %v13307_v46, %v10605_v18 }
 0x615   : > { %v3289_v23 = vpop.f32.mrf.mxu0 }
 0x616   : > { %15100 = vst [vmem:[#allocation25_spill] sm:$0xff] %v13310_v1  ;;  %v13313_v55 = vmul.f32 %v13305_v17, %v3289_v23  ;;  %v11368_v23 = vpop.eup %11367 }
 0x617   : > { %v11370_v25 = vpop.eup %11369  ;;  %v1398_v3 = vadd.f32 1.0, %v11368_v23 }
 0x618   : > { %15101 = vst [vmem:[#allocation36_spill] sm:$0xff] %v13313_v55  ;;  %v1399_v43 = vadd.f32 1.0, %v11370_v25 }
 0x619   : > { %v10570_v52 = vpop.f32.mrf.mxu1  ;;  %11379 = vrcp.f32 %v1398_v3 }
 0x61a   : > { %v13322_v10 = vmul.f32 %v13319_v26, %v10570_v52  ;;  %11381 = vrcp.f32 %v1399_v43 }
 0x61b   : > { %v2884_v57 = vpop.f32.mrf.mxu1  ;;  %v10619_v21 = vpop.f32.mrf.mxu0 }
 0x61c   : > { %15104 = vst [vmem:[#allocation52_spill] sm:$0xff] %v13322_v10  ;;  %v13325_v18 = vmul.f32 %v13317_v14, %v2884_v57  ;;  %v13328_v9 = vadd.f32 %v10619_v21, %v13189_v30  ;;  %v13339_v21 = vpop.eup %11371 }
 0x61d   : > { %v3565_v22 = vpop.f32.mrf.mxu0  ;;  %15106 = vst [vmem:[#allocation67_spill] sm:$0xff] %v13339_v21  ;;  %v13341_v8 = vpop.eup %11373 }
 0x61e   : > { %15105 = vst [vmem:[#allocation65_spill] sm:$0xff] %v13325_v18  ;;  %v13333_v1 = vadd.f32 %v3565_v22, %v13194_v37  ;;  %v4298_v52 = vsel %vm2554_vm1, %v13328_v9, -inf  ;;  %15107 = vst [vmem:[#allocation29_spill] sm:$0xff] %v13341_v8  ;;  %v13361_v3 = vpop.eup %11375 }
 0x61f   : > { %4299 = vmax.xlane.f32.xlu1 %v4298_v52  ;;  %15110 = vst [vmem:[#allocation45_spill] sm:$0xff] %v13361_v3 }
 0x620   : > { %v10584_v57 = vpop.f32.mrf.mxu1  ;;  %v4295_v30 = vsel %vm2554_vm1, %v13333_v1, -inf }
 0x621   : > { %4296 = vmax.xlane.f32.xlu0 %v4295_v30  ;;  %v13344_v55 = vmul.f32 %v13341_v8, %v10584_v57 }
 0x622   : > { %v3046_v53 = vpop.f32.mrf.mxu1 }
 0x623   : > { %15108 = vst [vmem:[#allocation32_spill] sm:$0xff] %v13344_v55  ;;  %v13347_v37 = vmul.f32 %v13339_v21, %v3046_v53  ;;  %v10633_v22 = vpop.f32.mrf.mxu0 }
 0x624   : > { %v13350_v23 = vadd.f32 %v10633_v22, %v13203_v45  ;;  %v13363_v45 = vpop.eup %11377 }
 0x625   : > { %15109 = vst [vmem:[#allocation43_spill] sm:$0xff] %v13347_v37  ;;  %v3771_v25 = vpop.f32.mrf.mxu0  ;;  %15111 = vst [vmem:[#allocation57_spill] sm:$0xff] %v13363_v45 }
 0x626   : > { %v13355_v30 = vadd.f32 %v3771_v25, %v13208_v27  ;;  %v4310_v57 = vsel %vm2554_vm1, %v13350_v23, -inf }
 0x627   : > { %4311 = vmax.xlane.f32.xlu1 %v4310_v57 }
 0x628   : > { %v10598_v18 = vpop.f32.mrf.mxu1  ;;  %v4307_v53 = vsel %vm2554_vm1, %v13355_v30, -inf }
 0x629   : > { %4308 = vmax.xlane.f32.xlu0 %v4307_v53  ;;  %v13366_v22 = vmul.f32 %v13363_v45, %v10598_v18  ;;  %v13381_v18 = vpop.eup %11379 }
 0x62a   : > { %v3208_v43 = vpop.f32.mrf.mxu1  ;;  %15114 = vst [vmem:[#allocation73_spill] sm:$0xff] %v13381_v18  ;;  %v13385_v29 = vpop.eup %11381 }
 0x62b   : > { %15112 = vst [vmem:[#allocation61_spill] sm:$0xff] %v13366_v22  ;;  %v13369_v27 = vmul.f32 %v13361_v3, %v3208_v43  ;;  %15115 = vst [vmem:[#allocation111_spill] sm:$0xff] %v13385_v29 }
 0x62c   : > { %v10647_v25 = vpop.f32.mrf.mxu0 }
 0x62d   : > { %15113 = vst [vmem:[#allocation84_spill] sm:$0xff] %v13369_v27  ;;  %v13374_v52 = vadd.f32 %v10647_v25, %v13216_v11 }
 0x62e   : > { %v3977_v37 = vpop.f32.mrf.mxu0 }
 0x62f   : > { %v13377_v55 = vadd.f32 %v3977_v37, %v13218_v56  ;;  %v4322_v53 = vsel %vm2554_vm1, %v13374_v52, -inf }
 0x630   : > { %v10612_v10 = vpop.f32.mrf.mxu1  ;;  %4323 = vmax.xlane.f32.xlu1 %v4322_v53 }
 0x631   : > { %v4319_v43 = vsel %vm2554_vm1, %v13377_v55, -inf  ;;  %v13388_v11 = vmul.f32 %v13385_v29, %v10612_v10 }
 0x632   : > { %v3370_v57 = vpop.f32.mrf.mxu1  ;;  %4320 = vmax.xlane.f32.xlu0 %v4319_v43 }
 0x633   : > { %15116 = vst [vmem:[#allocation112_spill] sm:$0xff] %v13388_v11  ;;  %v13391_v56 = vmul.f32 %v13381_v18, %v3370_v57 }
 0x635   : > { %15117 = vst [vmem:[#allocation113_spill] sm:$0xff] %v13391_v56 }
 0x638   : > { %v10626_v25 = vpop.f32.mrf.mxu1 }
 0x639   : > { %v13404_v57 = vadd.f32 %v10626_v25, %v13196_v63 }
 0x63a   : > { %v3668_v22 = vpop.f32.mrf.mxu1 }
 0x63c   : > { %v10661_v53 = vpop.f32.mrf.mxu0 }
 0x63d   : > { %v13396_v27 = vadd.f32 %v10661_v53, %v13224_v51 }
 0x63e   : > { %v4183_v13 = vpop.f32.mrf.mxu0 }
 0x63f   : > { %v13399_v41 = vadd.f32 %v4183_v13, %v13226_v50  ;;  %v4334_v10 = vsel %vm2554_vm1, %v13396_v27, -inf  ;;  %v13414_v13 = vadd.f32 %v3668_v22, %v13200_v61  ;;  %v4304_v50 = vsel %vm2554_vm1, %v13404_v57, -inf }
 0x640   : > { %v10640_v43 = vpop.f32.mrf.mxu1  ;;  %4335 = vmax.xlane.f32.xlu1 %v4334_v10 }
 0x641   : > { %v13407_v37 = vadd.f32 %v10640_v43, %v13210_v16  ;;  %v4331_v51 = vsel %vm2554_vm1, %v13399_v41, -inf  ;;  %v4301_v43 = vsel %vm2554_vm1, %v13414_v13, -inf }
 0x642   : > { %4332 = vmax.xlane.f32.xlu0 %v4331_v51  ;;  %v3874_v10 = vpop.f32.mrf.mxu1 }
 0x643   : > { %v4316_v53 = vsel %vm2554_vm1, %v13407_v37, -inf  ;;  %v13419_v16 = vadd.f32 %v3874_v10, %v13213_v36 }
 0x644   : > { %4317 = vmax.xlane.f32.xlu1 %v4316_v53 }
 0x645   : > { %v4313_v53 = vsel %vm2554_vm1, %v13419_v16, -inf }
 0x646   : > { %4305 = vmax.xlane.f32.xlu0 %v4304_v50 }
 0x648   : > { %v10654_v63 = vpop.f32.mrf.mxu1 }
 0x649   : > { %v13422_v25 = vadd.f32 %v10654_v63, %v13220_v62 }
 0x64a   : > { %v4080_v51 = vpop.f32.mrf.mxu1  ;;  %4302 = vmax.xlane.f32.xlu0 %v4301_v43 }
 0x64b   : > { %v4328_v61 = vsel %vm2554_vm1, %v13422_v25, -inf  ;;  %v13429_v22 = vadd.f32 %v4080_v51, %v13222_v34 }
 0x64c   : > { %4329 = vmax.xlane.f32.xlu1 %v4328_v61 }
 0x64d   : > { %v4325_v36 = vsel %vm2554_vm1, %v13429_v22, -inf }
 0x64e   : > { %4314 = vmax.xlane.f32.xlu0 %v4313_v53 }
 0x650   : > { %v10668_v62 = vpop.f32.mrf.mxu1 }
 0x651   : > { %v13440_v50 = vadd.f32 %v10668_v62, %v13228_v44  ;;  %v13457_v44 = vpop.permute.xlu1 %4740 }
 0x652   : > { %4326 = vmax.xlane.f32.xlu0 %v4325_v36  ;;  %v4286_v34 = vpop.f32.mrf.mxu1 }
 0x653   : > { %v4340_v10 = vsel %vm2554_vm1, %v13440_v50, -inf  ;;  %v13445_v63 = vadd.f32 %v4286_v34, %v13230_v49  ;;  %v13459_v49 = vpop.permute.xlu0 %4651 }
 0x655   : > { %v4337_v43 = vsel %vm2554_vm1, %v13445_v63, -inf }
 0x65d   : > { %4920 = vrot.lane.b32.xlu1 %v15062_v24, %s11772_s7 }
 0x668   : > { %4831 = vrot.lane.b32.xlu0 %v15053_v32, %s11772_s7 }
 0x681   : > { %4341 = vmax.xlane.f32.xlu1 %v4340_v10 }
 0x687   : > { %4338 = vmax.xlane.f32.xlu0 %v4337_v43 }
 0x692   : > { %4918 = vrot.lane.b32.xlu1 %v15063_v58, %s11772_s7 }
 0x696   : > { %5098 = vrot.lane.b32.xlu1 %v15064_v31, %s11772_s7 }
 0x69d   : > { %4829 = vrot.lane.b32.xlu0 %v15054_v54, %s11772_s7 }
 0x6a1   : > { %5009 = vrot.lane.b32.xlu0 %v15055_v19, %s11772_s7 }
 0x6a8   : > { %v4300_v51 = vpop.xlane.xlu1 %4299 }
 0x6a9   : > { %v4344_v61 = vsub.f32 %v13328_v9, %v4300_v51 }
 0x6aa   : > { %v4297_v53 = vpop.xlane.xlu0 %4296 }
 0x6ab   : > { %v4361_v36 = vmul.f32 1.442695, %v4344_v61  ;;  %v4343_v62 = vsub.f32 %v13333_v1, %v4297_v53 }
 0x6ad   : > { %11383 = vpow2.f32 %v4361_v36  ;;  %v4359_v34 = vmul.f32 1.442695, %v4343_v62 }
 0x6af   : > { %11385 = vpow2.f32 %v4359_v34 }
 0x6b0   : > { %v4312_v10 = vpop.xlane.xlu1 %4311 }
 0x6b1   : > { %v4348_v43 = vsub.f32 %v13350_v23, %v4312_v10 }
 0x6b2   : > { %v4309_v31 = vpop.xlane.xlu0 %4308 }
 0x6b3   : > { %v4369_v54 = vmul.f32 1.442695, %v4348_v43  ;;  %v4347_v19 = vsub.f32 %v13355_v30, %v4309_v31 }
 0x6b5   : > { %11387 = vpow2.f32 %v4369_v54  ;;  %v4367_v58 = vmul.f32 1.442695, %v4347_v19 }
 0x6b7   : > { %11389 = vpow2.f32 %v4367_v58 }
 0x6b9   : > { %v4324_v56 = vpop.xlane.xlu1 %4323 }
 0x6ba   : > { %v13465_v11 = vpop.eup %11383  ;;  %v4352_v9 = vsub.f32 %v13374_v52, %v4324_v56 }
 0x6bb   : > { %v4321_v51 = vpop.xlane.xlu0 %4320  ;;  %v4394_v1 = vsel %vm2554_vm1, %v13465_v11, 0.0 }
 0x6bc   : > { %v13470_v61 = vpop.eup %11385  ;;  %v4377_v53 = vmul.f32 1.442695, %v4352_v9  ;;  %v4351_v23 = vsub.f32 %v13377_v55, %v4321_v51  ;;  %4395 = vadd.xlane.f32.xlu1 %v4394_v1 }
 0x6bd   : > { %v4391_v54 = vsel %vm2554_vm1, %v13470_v61, 0.0 }
 0x6be   : > { %11391 = vpow2.f32 %v4377_v53  ;;  %v4375_v31 = vmul.f32 1.442695, %v4351_v23 }
 0x6c0   : > { %11393 = vpow2.f32 %v4375_v31  ;;  %4392 = vadd.xlane.f32.xlu0 %v4391_v54 }
 0x6c2   : > { %v13475_v19 = vpop.eup %11387 }
 0x6c3   : > { %v4406_v58 = vsel %vm2554_vm1, %v13475_v19, 0.0 }
 0x6c4   : > { %v13479_v52 = vpop.eup %11389  ;;  %4407 = vadd.xlane.f32.xlu1 %v4406_v58 }
 0x6c5   : > { %v4403_v30 = vsel %vm2554_vm1, %v13479_v52, 0.0 }
 0x6c6   : > { %4404 = vadd.xlane.f32.xlu0 %v4403_v30 }
 0x6c9   : > { %v4336_v55 = vpop.xlane.xlu1 %4335 }
 0x6ca   : > { %v4356_v56 = vsub.f32 %v13396_v27, %v4336_v55 }
 0x6cb   : > { %v13484_v36 = vpop.eup %11391  ;;  %v4333_v62 = vpop.xlane.xlu0 %4332 }
 0x6cc   : > { %v4385_v34 = vmul.f32 1.442695, %v4356_v56  ;;  %v4355_v10 = vsub.f32 %v13399_v41, %v4333_v62  ;;  %v4418_v43 = vsel %vm2554_vm1, %v13484_v36, 0.0 }
 0x6cd   : > { %v13489_v9 = vpop.eup %11393  ;;  %v4318_v51 = vpop.xlane.xlu1 %4317  ;;  %4419 = vadd.xlane.f32.xlu1 %v4418_v43 }
 0x6ce   : > { %11395 = vpow2.f32 %v4385_v34  ;;  %v4383_v1 = vmul.f32 1.442695, %v4355_v10  ;;  %v4350_v53 = vsub.f32 %v13407_v37, %v4318_v51  ;;  %v4415_v27 = vsel %vm2554_vm1, %v13489_v9, 0.0 }
 0x6cf   : > { %4416 = vadd.xlane.f32.xlu0 %v4415_v27  ;;  %v4306_v23 = vpop.xlane.xlu0 %4305 }
 0x6d0   : > { %11397 = vpow2.f32 %v4383_v1  ;;  %v4346_v31 = vsub.f32 %v13404_v57, %v4306_v23  ;;  %v4373_v41 = vmul.f32 1.442695, %v4350_v53 }
 0x6d2   : > { %v4365_v54 = vmul.f32 1.442695, %v4346_v31 }
 0x6d3   : > { %v4303_v58 = vpop.xlane.xlu0 %4302 }
 0x6d4   : > { %11399 = vpow2.f32 %v4365_v54  ;;  %v4345_v30 = vsub.f32 %v13414_v13, %v4303_v58 }
 0x6d5   : > { %v4330_v55 = vpop.xlane.xlu1 %4329  ;;  %11401 = vpow2.f32 %v4373_v41 }
 0x6d6   : > { %v4363_v56 = vmul.f32 1.442695, %v4345_v30  ;;  %v4354_v62 = vsub.f32 %v13422_v25, %v4330_v55 }
 0x6d7   : > { %v4315_v37 = vpop.xlane.xlu0 %4314 }
 0x6d8   : > { %11403 = vpow2.f32 %v4363_v56  ;;  %v4381_v34 = vmul.f32 1.442695, %v4354_v62  ;;  %v4349_v10 = vsub.f32 %v13419_v16, %v4315_v37 }
 0x6da   : > { %11405 = vpow2.f32 %v4381_v34  ;;  %v4371_v43 = vmul.f32 1.442695, %v4349_v10  ;;  %v13531_v34 = vpop.permute.xlu1 %4920 }
 0x6db   : > { %v13498_v51 = vpop.eup %11395  ;;  %v4327_v57 = vpop.xlane.xlu0 %4326 }
 0x6dc   : > { %11407 = vpow2.f32 %v4371_v43  ;;  %v4353_v1 = vsub.f32 %v13429_v22, %v4327_v57  ;;  %v4430_v13 = vsel %vm2554_vm1, %v13498_v51, 0.0 }
 0x6dd   : > { %v13503_v53 = vpop.eup %11397  ;;  %4431 = vadd.xlane.f32.xlu1 %v4430_v13 }
 0x6de   : > { %v4379_v25 = vmul.f32 1.442695, %v4353_v1  ;;  %v4427_v27 = vsel %vm2554_vm1, %v13503_v53, 0.0 }
 0x6df   : > { %4428 = vadd.xlane.f32.xlu0 %v4427_v27  ;;  %v4832_v57 = vpop.permute.xlu0 %4831 }
 0x6e0   : > { %11409 = vpow2.f32 %v4379_v25 }
 0x6e1   : > { %v13507_v16 = vpop.eup %11399 }
 0x6e2   : > { %v4400_v23 = vsel %vm2554_vm1, %v13507_v16, 0.0  ;;  %v13511_v31 = vpop.eup %11401 }
 0x6e3   : > { %4401 = vadd.xlane.f32.xlu1 %v4400_v23  ;;  %v4412_v41 = vsel %vm2554_vm1, %v13511_v31, 0.0 }
 0x6e5   : > { %v13513_v22 = vpop.eup %11403 }
 0x6e6   : > { %v4397_v54 = vsel %vm2554_vm1, %v13513_v22, 0.0 }
 0x6e7   : > { %v13519_v58 = vpop.eup %11405  ;;  %4413 = vadd.xlane.f32.xlu1 %v4412_v41  ;;  %4398 = vadd.xlane.f32.xlu0 %v4397_v54 }
 0x6e8   : > { %v4424_v55 = vsel %vm2554_vm1, %v13519_v58, 0.0 }
 0x6e9   : > { %v13521_v30 = vpop.eup %11407 }
 0x6ea   : > { %v4409_v56 = vsel %vm2554_vm1, %v13521_v30, 0.0 }
 0x6eb   : > { %4425 = vadd.xlane.f32.xlu1 %v4424_v55  ;;  %4410 = vadd.xlane.f32.xlu0 %v4409_v56 }
 0x6ed   : > { %v13527_v62 = vpop.eup %11409 }
 0x6ee   : > { %v4421_v37 = vsel %vm2554_vm1, %v13527_v62, 0.0 }
 0x6ef   : > { %4422 = vadd.xlane.f32.xlu0 %v4421_v37 }
 0x70a   : > { %v4342_v10 = vpop.xlane.xlu1 %4341 }
 0x70b   : > { %v4358_v43 = vsub.f32 %v13440_v50, %v4342_v10 }
 0x70d   : > { %v4389_v1 = vmul.f32 1.442695, %v4358_v43 }
 0x70e   : > { %v13547_v50 = vpop.permute.xlu1 %4918 }
 0x70f   : > { %11411 = vpow2.f32 %v4389_v1 }
 0x710   : > { %v4339_v13 = vpop.xlane.xlu0 %4338 }
 0x711   : > { %v4357_v25 = vsub.f32 %v13445_v63, %v4339_v13 }
 0x712   : > { %v13549_v56 = vpop.permute.xlu1 %5098 }
 0x713   : > { %v4387_v27 = vmul.f32 1.442695, %v4357_v25 }
 0x714   : > { %v4830_v63 = vpop.permute.xlu0 %4829 }
 0x715   : > { %11413 = vpow2.f32 %v4387_v27 }
 0x718   : > { %v5010_v37 = vpop.permute.xlu0 %5009 }
 0x71c   : > { %v13535_v23 = vpop.eup %11411 }
 0x71d   : > { %v4436_v41 = vsel %vm2554_vm1, %v13535_v23, 0.0 }
 0x71e   : > { %4437 = vadd.xlane.f32.xlu1 %v4436_v41 }
 0x722   : > { %v13539_v54 = vpop.eup %11413 }
 0x723   : > { %v4433_v55 = vsel %vm2554_vm1, %v13539_v54, 0.0 }
 0x724   : > { %4434 = vadd.xlane.f32.xlu0 %v4433_v55 }
 0x72f   : > { %5096 = vrot.lane.b32.xlu1 %v15065_v33, %s11772_s7 }
 0x73a   : > { %5007 = vrot.lane.b32.xlu0 %v15056_v59, %s11772_s7 }
 0x745   : > { %v4396_v10 = vpop.xlane.xlu1 %4395 }
 0x746   : > { %11415 = vrcp.f32 %v4396_v10 }
 0x749   : > { %v4393_v43 = vpop.xlane.xlu0 %4392 }
 0x74a   : > { %11417 = vrcp.f32 %v4393_v43 }
 0x74d   : > { %v4408_v1 = vpop.xlane.xlu1 %4407 }
 0x74e   : > { %11419 = vrcp.f32 %v4408_v1 }
 0x74f   : > { %v4405_v13 = vpop.xlane.xlu0 %4404 }
 0x750   : > { %11421 = vrcp.f32 %v4405_v13 }
 0x753   : > { %v11416_v25 = vpop.eup %11415 }
 0x754   : > { %v4456_v33 = vmul.f32 %v11416_v25, %v13465_v11 }
 0x756   : > { %v4420_v27 = vpop.xlane.xlu1 %4419 }
 0x757   : > { %v11418_v41 = vpop.eup %11417  ;;  %11423 = vrcp.f32 %v4420_v27 }
 0x758   : > { %v4417_v55 = vpop.xlane.xlu0 %4416  ;;  %v4455_v59 = vmul.f32 %v11418_v41, %v13470_v61 }
 0x759   : > { %11425 = vrcp.f32 %v4417_v55 }
 0x75a   : > { %10673 = vmatprep.mubr.msk.f32.mxu0 %vm2554_vm1, %v4455_v59 }
 0x75b   : > { %10674 = vmatmul.mubr.msk.f32.vlgmr.msra.gmra.mxu0 %vm2554_vm1, %v4456_v33  ;;  %v11420_v10 = vpop.eup %11419 }
 0x75c   : > { %10684 = vmatpush3.msra.mxu0 %v13232_v5  ;;  %v4460_v61 = vmul.f32 %v11420_v10, %v13475_v19 }
 0x75d   : > { %v11422_v43 = vpop.eup %11421  ;;  %10685 = vmatprep.subr.mxu0 %v13459_v49 }
 0x75e   : > { %10686 = vmatpush3.msra.mxu0 %v13459_v49  ;;  %v4459_v1 = vmul.f32 %v11422_v43, %v13479_v52 }
 0x75f   : > { %10697 = vmatprep.subr.mxu0 %v4832_v57 }
 0x760   : > { %10687 = vmatprep.mubr.msk.f32.mxu0 %vm2554_vm1, %v4459_v1 }
 0x761   : > { %10688 = vmatmul.mubr.msk.f32.vlgmr.msra.gmra.mxu0 %vm2554_vm1, %v4460_v61 }
 0x762   : > { %10698 = vmatpush3.msra.mxu0 %v4832_v57 }
 0x763   : > { %10699 = vmatprep.subr.mxu0 %v4830_v63 }
 0x764   : > { %10700 = vmatpush3.msra.mxu0 %v4830_v63  ;;  %v11424_v59 = vpop.eup %11423 }
 0x765   : > { %10711 = vmatprep.subr.mxu0 %v5010_v37  ;;  %v4464_v49 = vmul.f32 %v11424_v59, %v13484_v36 }
 0x766   : > { %v11426_v33 = vpop.eup %11425  ;;  %v4432_v11 = vpop.xlane.xlu1 %4431 }
 0x767   : > { %v4463_v5 = vmul.f32 %v11426_v33, %v13489_v9 }
 0x768   : > { %v4429_v13 = vpop.xlane.xlu0 %4428 }
 0x769   : > { %11427 = vrcp.f32 %v4429_v13  ;;  %10701 = vmatprep.mubr.msk.f32.mxu0 %vm2554_vm1, %v4463_v5 }
 0x76a   : > { %10702 = vmatmul.mubr.msk.f32.vlgmr.msra.gmra.mxu0 %vm2554_vm1, %v4464_v49 }
 0x76b   : > { %10712 = vmatpush3.msra.mxu0 %v5010_v37 }
 0x76c   : > { %v4402_v19 = vpop.xlane.xlu1 %4401 }
 0x76d   : > { %11429 = vrcp.f32 %v4402_v19 }
 0x770   : > { %v4414_v52 = vpop.xlane.xlu1 %4413  ;;  %v4399_v57 = vpop.xlane.xlu0 %4398 }
 0x771   : > { %11431 = vrcp.f32 %v4399_v57 }
 0x772   : > { %11433 = vrcp.f32 %v4414_v52 }
 0x774   : > { %v4411_v63 = vpop.xlane.xlu0 %4410  ;;  %v4426_v25 = vpop.xlane.xlu1 %4425 }
 0x775   : > { %11435 = vrcp.f32 %v4411_v63 }
 0x776   : > { %v11428_v27 = vpop.eup %11427  ;;  %11437 = vrcp.f32 %v4426_v25 }
 0x777   : > { %v4467_v9 = vmul.f32 %v11428_v27, %v13503_v53 }
 0x778   : > { %v4423_v36 = vpop.xlane.xlu0 %4422 }
 0x779   : > { %11439 = vrcp.f32 %v4423_v36  ;;  %10715 = vmatprep.mubr.msk.f32.mxu0 %vm2554_vm1, %v4467_v9 }
 0x77a   : > { %v11430_v41 = vpop.eup %11429  ;;  %11441 = vrcp.f32 %v4432_v11 }
 0x77b   : > { %v4458_v10 = vmul.f32 %v11430_v41, %v13507_v16 }
 0x77e   : > { %v11432_v55 = vpop.eup %11431 }
 0x77f   : > { %v4457_v37 = vmul.f32 %v11432_v55, %v13513_v22  ;;  %v11434_v43 = vpop.eup %11433 }
 0x780   : > { %v4462_v59 = vmul.f32 %v11434_v43, %v13511_v31  ;;  %v11183_v43 = vld [vmem:[#allocation9 + $0x18] sm:$0xff]  }
 0x781   : > { %10680 = vmatprep.mubr.msk.f32.mxu1 %vm2554_vm1, %v4457_v37 }
 0x782   : > { %v11436_v1 = vpop.eup %11435  ;;  %10681 = vmatmul.mubr.msk.f32.vlgmr.msra.gmra.mxu1 %vm2554_vm1, %v4458_v10 }
 0x783   : > { %10691 = vmatpush3.msra.mxu1 %v13235_v12  ;;  %v4461_v53 = vmul.f32 %v11436_v1, %v13521_v30  ;;  %v11438_v61 = vpop.eup %11437 }
 0x784   : > { %10692 = vmatprep.subr.mxu1 %v13457_v44  ;;  %v4466_v12 = vmul.f32 %v11438_v61, %v13519_v58 }
 0x785   : > { %10693 = vmatpush3.msra.mxu1 %v13457_v44  ;;  %10694 = vmatprep.mubr.msk.f32.mxu1 %vm2554_vm1, %v4461_v53 }
 0x786   : > { %v11440_v33 = vpop.eup %11439  ;;  %10704 = vmatprep.subr.mxu1 %v13531_v34  ;;  %10695 = vmatmul.mubr.msk.f32.vlgmr.msra.gmra.mxu1 %vm2554_vm1, %v4462_v59  ;;  %v11184_v59 = vld [vmem:[#allocation9 + $0x10] sm:$0xff]  }
 0x787   : > { %v4465_v16 = vmul.f32 %v11440_v33, %v13527_v62  ;;  %10705 = vmatpush3.msra.mxu1 %v13531_v34  ;;  %v11442_v30 = vpop.eup %11441 }
 0x788   : > { %10706 = vmatprep.subr.mxu1 %v13547_v50  ;;  %v4468_v58 = vmul.f32 %v11442_v30, %v13498_v51 }
 0x789   : > { %10708 = vmatprep.mubr.msk.f32.mxu1 %vm2554_vm1, %v4465_v16  ;;  %10707 = vmatpush3.msra.mxu1 %v13547_v50 }
 0x78a   : > { %10718 = vmatprep.subr.mxu1 %v13549_v56  ;;  %10709 = vmatmul.mubr.msk.f32.vlgmr.msra.gmra.mxu1 %vm2554_vm1, %v4466_v12 }
 0x78b   : > { %10719 = vmatpush3.msra.mxu1 %v13549_v56 }
 0x7a7   : > { %v4438_v44 = vpop.xlane.xlu1 %4437 }
 0x7a8   : > { %11443 = vrcp.f32 %v4438_v44 }
 0x7ab   : > { %v5097_v31 = vpop.permute.xlu1 %5096 }
 0x7ac   : > { %10720 = vmatprep.subr.mxu1 %v5097_v31 }
 0x7ad   : > { %10721 = vmatpush3.msra.mxu1 %v5097_v31  ;;  %v4435_v22 = vpop.xlane.xlu0 %4434 }
 0x7ae   : > { %11445 = vrcp.f32 %v4435_v22  ;;  %11029 = vmatprep.subr.bf16.mxu1 %v11183_v43 }
 0x7b1   : > { %v5008_v62 = vpop.permute.xlu0 %5007 }
 0x7b2   : > { %10713 = vmatprep.subr.mxu0 %v5008_v62 }
 0x7b3   : > { %10714 = vmatpush3.msra.mxu0 %v5008_v62 }
 0x7b4   : > { %10716 = vmatmul.mubr.msk.f32.vlgmr.msra.gmra.mxu0 %vm2554_vm1, %v4468_v58  ;;  %10725 = vmatprep.subr.bf16.mxu0 %v11183_v43 }
 0x7b5   : > { %v11444_v34 = vpop.eup %11443  ;;  %10726 = vmatpush3.bf16.msra.mxu0 %v11183_v43 }
 0x7b6   : > { %v4470_v5 = vmul.f32 %v11444_v34, %v13535_v23  ;;  %10727 = vmatprep.subr.bf16.mxu0 %v11184_v59 }
 0x7b9   : > { %10728 = vmatpush3.bf16.msra.mxu0 %v11184_v59 }
 0x7bb   : > { %v11446_v50 = vpop.eup %11445 }
 0x7bc   : > { %v4469_v56 = vmul.f32 %v11446_v50, %v13539_v54 }
 0x7be   : > { %10722 = vmatprep.mubr.msk.f32.mxu1 %vm2554_vm1, %v4469_v56 }
 0x7bf   : > { %10723 = vmatmul.mubr.msk.f32.vlgmr.msra.gmra.mxu1 %vm2554_vm1, %v4470_v5 }
 0x7c0   : > { %11031 = vmatpush3.bf16.msra.mxu1 %v11183_v43 }
 0x7c1   : > { %11030 = vmatprep.subr.bf16.mxu1 %v11184_v59 }
 0x7c4   : > { %11032 = vmatpush3.bf16.msra.mxu1 %v11184_v59 }
 0x81b   : > { %v10675_v11 = vpop.f32.mrf.mxu0 }
 0x81d   : > { %v4551_v13 = vpop.f32.mrf.mxu0 }
 0x821   : > { %v10689_v49 = vpop.f32.mrf.mxu0 }
 0x823   : > { %v4729_v19 = vpop.f32.mrf.mxu0 }
 0x82a   : > { %v10703_v52 = vpop.f32.mrf.mxu0 }
 0x82b   : > { %5217 = vrot.lane.b32.xlu1 %v10703_v52, %s11774_s20 }
 0x82c   : > { %v4907_v51 = vpop.f32.mrf.mxu0 }
 0x82d   : > { %5215 = vrot.lane.b32.xlu0 %v4907_v51, %s11774_s20 }
 0x842   : > { %v10682_v57 = vpop.f32.mrf.mxu1 }
 0x844   : > { %v4640_v63 = vpop.f32.mrf.mxu1 }
 0x846   : > { %v10696_v54 = vpop.f32.mrf.mxu1 }
 0x848   : > { %v4818_v25 = vpop.f32.mrf.mxu1 }
 0x84a   : > { %v10710_v23 = vpop.f32.mrf.mxu1 }
 0x84b   : > { %5221 = vrot.lane.b32.xlu1 %v10710_v23, %s11774_s20 }
 0x84c   : > { %v4996_v27 = vpop.f32.mrf.mxu1 }
 0x84d   : > { %5219 = vrot.lane.b32.xlu0 %v4996_v27, %s11774_s20 }
 0x874   : > { %v10717_v9 = vpop.f32.mrf.mxu0 }
 0x875   : > { %5225 = vrot.lane.b32.xlu1 %v10717_v9, %s11774_s20 }
 0x876   : > { %v5085_v36 = vpop.f32.mrf.mxu0 }
 0x877   : > { %5223 = vrot.lane.b32.xlu0 %v5085_v36, %s11774_s20 }
 0x87f   : > { %v10724_v41 = vpop.f32.mrf.mxu1 }
 0x880   : > { %5229 = vrot.lane.b32.xlu1 %v10724_v41, %s11774_s20 }
 0x881   : > { %v5174_v55 = vpop.f32.mrf.mxu1 }
 0x882   : > { %5227 = vrot.lane.b32.xlu0 %v5174_v55, %s11774_s20 }
 0x884   : > { %5201 = vrot.lane.b32.xlu1 %v10675_v11, %s11774_s20 }
 0x886   : > { %5199 = vrot.lane.b32.xlu0 %v4551_v13, %s11774_s20  ;;  %v13618_v13 = vld [vmem:[#allocation9 + $0x8] sm:$0xff]  }
 0x887   : > { %10745 = vmatprep.subr.bf16.mxu1 %v13618_v13 }
 0x888   : > { %5205 = vrot.lane.b32.xlu1 %v10682_v57, %s11774_s20 }
 0x88a   : > { %5203 = vrot.lane.b32.xlu0 %v4640_v63, %s11774_s20 }
 0x88c   : > { %5209 = vrot.lane.b32.xlu1 %v10689_v49, %s11774_s20 }
 0x88e   : > { %5207 = vrot.lane.b32.xlu0 %v4729_v19, %s11774_s20 }
 0x890   : > { %5213 = vrot.lane.b32.xlu1 %v10696_v54, %s11774_s20 }
 0x892   : > { %5211 = vrot.lane.b32.xlu0 %v4818_v25, %s11774_s20 }
 0x89d   : > { %v5218_v37 = vpop.permute.xlu1 %5217 }
 0x89e   : > { %v5256_v56 = vmul.f32 %v13295_v40, %v5218_v37 }
 0x89f   : > { %v5216_v10 = vpop.permute.xlu0 %5215 }
 0x8a0   : > { %v5255_v58 = vmul.f32 %v13292_v47, %v5216_v10 }
 0x8a2   : > { %v5267_v19 = vpack.c.bf16 %v5256_v56, %v5255_v58  ;;  %v15126_v58 = vld [vmem:[#allocation39_spill] sm:$0xff]  ;;  %v15129_v56 = vld [vmem:[#allocation34_spill] sm:$0xff] }
 0x8bd   : > { %v5222_v1 = vpop.permute.xlu1 %5221 }
 0x8be   : > { %v5258_v63 = vmul.f32 %v13363_v45, %v5222_v1 }
 0x8bf   : > { %v5220_v53 = vpop.permute.xlu0 %5219 }
 0x8c0   : > { %v5257_v52 = vmul.f32 %v13361_v3, %v5220_v53 }
 0x8c2   : > { %v5268_v27 = vpack.c.bf16 %v5258_v63, %v5257_v52  ;;  %v15134_v52 = vld [vmem:[#allocation82_spill] sm:$0xff] }
 0x8c3   : > { %v15137_v63 = vld [vmem:[#allocation70_spill] sm:$0xff] }
 0x8e7   : > { %v5226_v61 = vpop.permute.xlu1 %5225 }
 0x8e8   : > { %v5260_v55 = vmul.f32 %v13307_v46, %v5226_v61  ;;  %v15118_v61 = vld [vmem:[#allocation26_spill] sm:$0xff] }
 0x8e9   : > { %v5224_v33 = vpop.permute.xlu0 %5223 }
 0x8ea   : > { %v5259_v9 = vmul.f32 %v13305_v17, %v5224_v33 }
 0x8ec   : > { %v5269_v43 = vpack.c.bf16 %v5260_v55, %v5259_v9  ;;  %v15142_v9 = vld [vmem:[#allocation88_spill] sm:$0xff]  ;;  %v15145_v55 = vld [vmem:[#allocation89_spill] sm:$0xff] }
 0x8f2   : > { %v5230_v16 = vpop.permute.xlu1 %5229 }
 0x8f3   : > { %v5262_v59 = vmul.f32 %v13385_v29, %v5230_v16  ;;  %v15122_v16 = vld [vmem:[#allocation30_spill] sm:$0xff] }
 0x8f4   : > { %v5228_v12 = vpop.permute.xlu0 %5227 }
 0x8f5   : > { %v5261_v1 = vmul.f32 %v13381_v18, %v5228_v12  ;;  %v15121_v12 = vld [vmem:[#allocation21_spill] sm:$0xff] }
 0x8f6   : > { %v5202_v44 = vpop.permute.xlu1 %5201 }
 0x8f7   : > { %v5248_v22 = vmul.f32 %v13264_v60, %v5202_v44  ;;  %v5270_v33 = vpack.c.bf16 %v5262_v59, %v5261_v1  ;;  %v15119_v44 = vld [vmem:[#allocation23_spill] sm:$0xff]  ;;  %v15149_v1 = vld [vmem:[#allocation93_spill] sm:$0xff]  ;;  %v15151_v59 = vld [vmem:[#allocation98_spill] sm:$0xff] }
 0x8f8   : > { %v5200_v31 = vpop.permute.xlu0 %5199 }
 0x8f9   : > { %v5247_v30 = vmul.f32 %v13262_v39, %v5200_v31  ;;  %v15120_v31 = vld [vmem:[#allocation37_spill] sm:$0xff] }
 0x8fa   : > { %v5206_v62 = vpop.permute.xlu1 %5205 }
 0x8fb   : > { %v5263_v34 = vpack.c.bf16 %v5248_v22, %v5247_v30  ;;  %v5250_v5 = vmul.f32 %v13319_v26, %v5206_v62  ;;  %v15123_v22 = vld [vmem:[#allocation27_spill] sm:$0xff]  ;;  %v15124_v30 = vld [vmem:[#allocation24_spill] sm:$0xff]  ;;  %v15125_v62 = vld [vmem:[#allocation33_spill] sm:$0xff] }
 0x8fc   : > { %v5204_v50 = vpop.permute.xlu0 %5203 }
 0x8fd   : > { %v5249_v11 = vmul.f32 %v13317_v14, %v5204_v50  ;;  %5283 = vrot.lane.b32.xlu0 %v5263_v34, %s11772_s7  ;;  %v15127_v34 = vld [vmem:[#allocation40_spill] sm:$0xff]  ;;  %v15128_v50 = vld [vmem:[#allocation47_spill] sm:$0xff] }
 0x8fe   : > { %v5210_v49 = vpop.permute.xlu1 %5209 }
 0x8ff   : > { %v5264_v51 = vpack.c.bf16 %v5250_v5, %v5249_v11  ;;  %v5252_v54 = vmul.f32 %v13280_v42, %v5210_v49  ;;  %v15130_v5 = vld [vmem:[#allocation80_spill] sm:$0xff]  ;;  %v15131_v11 = vld [vmem:[#allocation41_spill] sm:$0xff]  ;;  %v15132_v49 = vld [vmem:[#allocation46_spill] sm:$0xff] }
 0x900   : > { %v5208_v57 = vpop.permute.xlu0 %5207 }
 0x901   : > { %v5251_v25 = vmul.f32 %v13278_v15, %v5208_v57  ;;  %5291 = vrot.lane.b32.xlu0 %v5267_v19, %s11772_s7  ;;  %5285 = vrot.lane.b32.xlu1 %v5264_v51, %s11772_s7  ;;  %v15133_v19 = vld [vmem:[#allocation53_spill] sm:$0xff]  ;;  %v15135_v51 = vld [vmem:[#allocation63_spill] sm:$0xff]  ;;  %v15136_v57 = vld [vmem:[#allocation72_spill] sm:$0xff] }
 0x902   : > { %v5214_v23 = vpop.permute.xlu1 %5213 }
 0x903   : > { %v5265_v36 = vpack.c.bf16 %v5252_v54, %v5251_v25  ;;  %v5254_v37 = vmul.f32 %v13341_v8, %v5214_v23  ;;  %v15138_v54 = vld [vmem:[#allocation77_spill] sm:$0xff]  ;;  %v15139_v25 = vld [vmem:[#allocation86_spill] sm:$0xff]  ;;  %v15140_v23 = vld [vmem:[#allocation75_spill] sm:$0xff] }
 0x904   : > { %v5212_v41 = vpop.permute.xlu0 %5211 }
 0x905   : > { %v5253_v10 = vmul.f32 %v13339_v21, %v5212_v41  ;;  %5293 = vrot.lane.b32.xlu1 %v5268_v27, %s11772_s7  ;;  %5287 = vrot.lane.b32.xlu0 %v5265_v36, %s11772_s7  ;;  %v15141_v27 = vld [vmem:[#allocation85_spill] sm:$0xff]  ;;  %v15143_v36 = vld [vmem:[#allocation90_spill] sm:$0xff]  ;;  %v15144_v41 = vld [vmem:[#allocation87_spill] sm:$0xff] }
 0x907   : > { %v5266_v53 = vpack.c.bf16 %v5254_v37, %v5253_v10  ;;  %v15146_v37 = vld [vmem:[#allocation92_spill] sm:$0xff]  ;;  %v15147_v10 = vld [vmem:[#allocation94_spill] sm:$0xff] }
 0x909   : > { %5295 = vrot.lane.b32.xlu0 %v5269_v43, %s11772_s7  ;;  %5289 = vrot.lane.b32.xlu1 %v5266_v53, %s11772_s7  ;;  %v15148_v43 = vld [vmem:[#allocation91_spill] sm:$0xff]  ;;  %v15150_v53 = vld [vmem:[#allocation96_spill] sm:$0xff] }
 0x90d   : > { %5639 = vrot.lane.b32.xlu0 %v15118_v61, %s11775_s22  ;;  %5297 = vrot.lane.b32.xlu1 %v5270_v33, %s11772_s7  ;;  %v15152_v33 = vld [vmem:[#allocation95_spill] sm:$0xff] }
 0x911   : > { %5637 = vrot.lane.b32.xlu0 %v15119_v44, %s11775_s22  ;;  %5740 = vrot.lane.b32.xlu1 %v15120_v31, %s11775_s22 }
 0x915   : > { %5631 = vrot.lane.b32.xlu0 %v15121_v12, %s11775_s22  ;;  %5738 = vrot.lane.b32.xlu1 %v15122_v16, %s11775_s22 }
 0x919   : > { %5732 = vrot.lane.b32.xlu0 %v15123_v22, %s11775_s22  ;;  %5633 = vrot.lane.b32.xlu1 %v15124_v30, %s11775_s22 }
 0x91d   : > { %5734 = vrot.lane.b32.xlu0 %v15125_v62, %s11775_s22  ;;  %5841 = vrot.lane.b32.xlu1 %v15126_v58, %s11775_s22 }
 0x921   : > { %5839 = vrot.lane.b32.xlu0 %v15127_v34, %s11775_s22  ;;  %5942 = vrot.lane.b32.xlu1 %v15128_v50, %s11775_s22 }
 0x925   : > { %5833 = vrot.lane.b32.xlu0 %v15129_v56, %s11775_s22  ;;  %5940 = vrot.lane.b32.xlu1 %v15130_v5, %s11775_s22 }
 0x929   : > { %5934 = vrot.lane.b32.xlu0 %v15131_v11, %s11775_s22  ;;  %5835 = vrot.lane.b32.xlu1 %v15132_v49, %s11775_s22 }
 0x92d   : > { %5936 = vrot.lane.b32.xlu0 %v12533_v48, %s11775_s22  ;;  %6043 = vrot.lane.b32.xlu1 %v15133_v19, %s11775_s22 }
 0x931   : > { %6041 = vrot.lane.b32.xlu0 %v12568_v7, %s11775_s22  ;;  %6144 = vrot.lane.b32.xlu1 %v12728_v4, %s11775_s22 }
 0x935   : > { %6035 = vrot.lane.b32.xlu0 %v12546_v6, %s11775_s22  ;;  %6142 = vrot.lane.b32.xlu1 %v12583_v28, %s11775_s22 }
 0x939   : > { %6136 = vrot.lane.b32.xlu0 %v12571_v0, %s11775_s22  ;;  %6037 = vrot.lane.b32.xlu1 %v12600_v20, %s11775_s22 }
 0x93d   : > { %6138 = vrot.lane.b32.xlu0 %v12588_v2, %s11775_s22  ;;  %6245 = vrot.lane.b32.xlu1 %v12620_v35, %s11775_s22 }
 0x941   : > { %6243 = vrot.lane.b32.xlu0 %v12623_v38, %s11775_s22  ;;  %6346 = vrot.lane.b32.xlu1 %v15134_v52, %s11775_s22 }
 0x945   : > { %6237 = vrot.lane.b32.xlu0 %v15135_v51, %s11775_s22  ;;  %6344 = vrot.lane.b32.xlu1 %v15136_v57, %s11775_s22 }
 0x949   : > { %6338 = vrot.lane.b32.xlu0 %v15137_v63, %s11775_s22  ;;  %6239 = vrot.lane.b32.xlu1 %v15138_v54, %s11775_s22  ;;  %v15186_v63 = vld [vmem:[#allocation113_spill] sm:$0xff] }
 0x94d   : > { %5641 = vrot.lane.b32.xlu0 %v15139_v25, %s11772_s7  ;;  %6340 = vrot.lane.b32.xlu1 %v15140_v23, %s11775_s22 }
 0x951   : > { %5742 = vrot.lane.b32.xlu0 %v15141_v27, %s11772_s7  ;;  %5643 = vrot.lane.b32.xlu1 %v15142_v9, %s11772_s7  ;;  %v15185_v9 = vld [vmem:[#allocation112_spill] sm:$0xff] }
 0x952   : > { %v15187_v23 = vpack.c.bf16 %v15185_v9, %v15186_v63 }
 0x955   : > { %5843 = vrot.lane.b32.xlu0 %v15143_v36, %s11772_s7  ;;  %5744 = vrot.lane.b32.xlu1 %v15144_v41, %s11772_s7 }
 0x959   : > { %5944 = vrot.lane.b32.xlu0 %v15145_v55, %s11772_s7  ;;  %5845 = vrot.lane.b32.xlu1 %v15146_v37, %s11772_s7  ;;  %v15153_v55 = vld [vmem:[#allocation97_spill] sm:$0xff] }
 0x95a   : > { %v15168_v37 = vld [vmem:[#allocation65_spill] sm:$0xff] }
 0x95d   : > { %6045 = vrot.lane.b32.xlu0 %v15147_v10, %s11772_s7  ;;  %5946 = vrot.lane.b32.xlu1 %v15148_v43, %s11772_s7  ;;  %v15154_v10 = vld [vmem:[#allocation100_spill] sm:$0xff]  ;;  %v15155_v43 = vld [vmem:[#allocation31_spill] sm:$0xff] }
 0x961   : > { %6146 = vrot.lane.b32.xlu0 %v15149_v1, %s11772_s7  ;;  %6047 = vrot.lane.b32.xlu1 %v15150_v53, %s11772_s7  ;;  %v15156_v1 = vld [vmem:[#allocation99_spill] sm:$0xff] }
 0x965   : > { %6247 = vrot.lane.b32.xlu0 %v15151_v59, %s11772_s7  ;;  %6148 = vrot.lane.b32.xlu1 %v15152_v33, %s11772_s7  ;;  %v15157_v59 = vld [vmem:[#allocation35_spill] sm:$0xff]  ;;  %v15158_v33 = vld [vmem:[#allocation74_spill] sm:$0xff] }
 0x969   : > { %6348 = vrot.lane.b32.xlu0 %v15153_v55, %s11772_s7  ;;  %6249 = vrot.lane.b32.xlu1 %v15154_v10, %s11772_s7 }
 0x96d   : > { %6706 = vrot.lane.b32.xlu0 %v15155_v43, %s11775_s22  ;;  %6350 = vrot.lane.b32.xlu1 %v15156_v1, %s11772_s7  ;;  %v15159_v43 = vld [vmem:[#allocation78_spill] sm:$0xff]  ;;  %v11186_v1 = vld [vmem:[#allocation9] sm:$0xff]  }
 0x96f   : > { %v5284_v36 = vpop.permute.xlu0 %5283 }
 0x970   : > { %10729 = vmatprep.mubr.msk.bf16.mxu0 %vm1857_vm0, %v5284_v36 }
 0x971   : > { %6793 = vrot.lane.b32.xlu0 %v15157_v59, %s11775_s22  ;;  %6617 = vrot.lane.b32.xlu1 %v15158_v33, %s11775_s22  ;;  %v15160_v59 = vld [vmem:[#allocation28_spill] sm:$0xff] }
 0x973   : > { %v5286_v53 = vpop.permute.xlu1 %5285  ;;  %v5292_v55 = vpop.permute.xlu0 %5291 }
 0x974   : > { %10730 = vmatmul.mubr.msk.bf16.vlgmr.msra.gmra.mxu0 %vm1857_vm0, %v5286_v53  ;;  %10737 = vmatprep.mubr.msk.bf16.mxu1 %vm1857_vm0, %v5292_v55 }
 0x975   : > { %6973 = vrot.lane.b32.xlu0 %v15053_v32, %s11775_s22  ;;  %6615 = vrot.lane.b32.xlu1 %v15159_v43, %s11775_s22  ;;  %v15161_v32 = vld [vmem:[#allocation79_spill] sm:$0xff] }
 0x977   : > { %v5294_v36 = vpop.permute.xlu1 %5293  ;;  %v5288_v10 = vpop.permute.xlu0 %5287 }
 0x978   : > { %10733 = vmatprep.mubr.msk.bf16.mxu0 %vm1857_vm0, %v5288_v10  ;;  %10738 = vmatmul.mubr.msk.bf16.vlgmr.msra.gmra.mxu1 %vm1857_vm0, %v5294_v36  ;;  %v15162_v36 = vld [vmem:[#allocation83_spill] sm:$0xff] }
 0x979   : > { %6704 = vrot.lane.b32.xlu1 %v15160_v59, %s11775_s22  ;;  %10746 = vmatpush3.bf16.msra.mxu1 %v13618_v13  ;;  %v15163_v13 = vld [vmem:[#allocation107_spill] sm:$0xff] }
 0x97a   : > { %10747 = vmatprep.subr.bf16.mxu1 %v11186_v1  ;;  %v15164_v59 = vld [vmem:[#allocation103_spill] sm:$0xff] }
 0x97b   : > { %v5290_v55 = vpop.permute.xlu1 %5289  ;;  %v5296_v53 = vpop.permute.xlu0 %5295  ;;  %v15165_v33 = vpack.c.bf16 %v15163_v13, %v15164_v59 }
 0x97c   : > { %10734 = vmatmul.mubr.msk.bf16.gmra.mxu0 %vm1857_vm0, %v5290_v55  ;;  %10741 = vmatprep.mubr.msk.bf16.mxu1 %vm1857_vm0, %v5296_v53 }
 0x97d   : > { %6795 = vrot.lane.b32.xlu1 %v15161_v32, %s11775_s22  ;;  %10748 = vmatpush3.bf16.msra.mxu1 %v11186_v1  ;;  %v15167_v32 = vld [vmem:[#allocation52_spill] sm:$0xff] }
 0x97e   : > { %v15169_v59 = vpack.c.bf16 %v15167_v32, %v15168_v37 }
 0x97f   : > { %v5298_v43 = vpop.permute.xlu1 %5297  ;;  %v5640_v10 = vpop.permute.xlu0 %5639 }
 0x980   : > { %10742 = vmatmul.mubr.msk.bf16.gmra.mxu1 %vm1857_vm0, %v5298_v43  ;;  %10765 = vmatprep.subr.msk.mxu0 %vm1857_vm0, %v5640_v10  ;;  %v15166_v43 = vld [vmem:[#allocation42_spill] sm:$0xff] }
 0x981   : > { %6884 = vrot.lane.b32.xlu1 %v15162_v36, %s11775_s22  ;;  %10749 = vmatprep.mubr.msk.bf16.mxu1 %vm1857_vm0, %v15165_v33  ;;  %v15170_v33 = vld [vmem:[#allocation105_spill] sm:$0xff] }
 0x982   : > { %10766 = vmatpush3.xpose.msk.msra.mxu0 %vm1857_vm0, %v5640_v10  ;;  %v15171_v10 = vld [vmem:[#allocation108_spill] sm:$0xff] }
 0x983   : > { %v5741_v55 = vpop.permute.xlu1 %5740  ;;  %v5638_v53 = vpop.permute.xlu0 %5637  ;;  %v15172_v13 = vpack.c.bf16 %v15170_v33, %v15171_v10  ;;  %v15176_v33 = vld [vmem:[#allocation109_spill] sm:$0xff]  ;;  %v15177_v10 = vld [vmem:[#allocation106_spill] sm:$0xff] }
 0x984   : > { %10767 = vmatprep.subr.msk.mxu0 %vm1857_vm0, %v5638_v53  ;;  %10772 = vmatprep.subr.msk.mxu1 %vm1857_vm0, %v5741_v55 }
 0x985   : > { %6882 = vrot.lane.b32.xlu1 %v15166_v43, %s11775_s22 }
 0x986   : > { %10768 = vmatpush3.xpose.msk.msra.mxu0 %vm1857_vm0, %v5638_v53 }
 0x987   : > { %v5739_v1 = vpop.permute.xlu1 %5738  ;;  %v5632_v36 = vpop.permute.xlu0 %5631 }
 0x988   : > { %10750 = vmatmul.mubr.msk.bf16.vlgmr.msra.gmra.mxu1 %vm1857_vm0, %v15169_v59  ;;  %10769 = vmatprep.mubr.msk.f32.mxu0 %vm1857_vm0, %v5632_v36  ;;  %v15173_v36 = vld [vmem:[#allocation32_spill] sm:$0xff] }
 0x989   : > { %10773 = vmatpush3.xpose.msk.msra.mxu1 %vm1857_vm0, %v5741_v55  ;;  %7062 = vrot.lane.b32.xlu1 %v15062_v24, %s11775_s22  ;;  %v15174_v55 = vld [vmem:[#allocation43_spill] sm:$0xff] }
 0x98a   : > { %10753 = vmatprep.mubr.msk.bf16.mxu1 %vm1857_vm0, %v15172_v13  ;;  %10774 = vmatprep.subr.msk.mxu1 %vm1857_vm0, %v5739_v1  ;;  %v15175_v59 = vpack.c.bf16 %v15173_v36, %v15174_v55  ;;  %v15178_v13 = vpack.c.bf16 %v15176_v33, %v15177_v10  ;;  %v15179_v55 = vld [vmem:[#allocation61_spill] sm:$0xff]  ;;  %v15183_v10 = vld [vmem:[#allocation36_spill] sm:$0xff] }
 0x98b   : > { %v5634_v53 = vpop.permute.xlu1 %5633  ;;  %v5733_v43 = vpop.permute.xlu0 %5732  ;;  %v15182_v33 = vld [vmem:[#allocation25_spill] sm:$0xff] }
 0x98c   : > { %10770 = vmatmul.mubr.msk.f32.vlgmr.msra.gmra.mxu0 %vm1857_vm0, %v5634_v53 }
 0x98d   : > { %10775 = vmatpush3.xpose.msk.msra.mxu1 %vm1857_vm0, %v5739_v1 }
 0x98f   : > { %v5842_v32 = vpop.permute.xlu1 %5841  ;;  %v5735_v37 = vpop.permute.xlu0 %5734 }
 0x990   : > { %10754 = vmatmul.mubr.msk.bf16.gmra.mxu1 %vm1857_vm0, %v15175_v59  ;;  %10779 = vmatprep.subr.msk.mxu0 %vm1857_vm0, %v5842_v32  ;;  %v15180_v59 = vld [vmem:[#allocation84_spill] sm:$0xff] }
 0x991   : > { %10757 = vmatprep.mubr.msk.bf16.mxu1 %vm1857_vm0, %v15178_v13  ;;  %10780 = vmatpush3.xpose.msk.msra.mxu0 %vm1857_vm0, %v5842_v32  ;;  %v15181_v27 = vpack.c.bf16 %v15179_v55, %v15180_v59  ;;  %v15184_v32 = vpack.c.bf16 %v15182_v33, %v15183_v10 }
 0x993   : > { %v5943_v24 = vpop.permute.xlu1 %5942  ;;  %v5840_v53 = vpop.permute.xlu0 %5839 }
 0x994   : > { %10781 = vmatprep.subr.msk.mxu0 %vm1857_vm0, %v5840_v53  ;;  %10786 = vmatprep.subr.msk.mxu1 %vm1857_vm0, %v5943_v24 }
 0x995   : > { %10782 = vmatpush3.xpose.msk.msra.mxu0 %vm1857_vm0, %v5840_v53 }
 0x997   : > { %v5941_v1 = vpop.permute.xlu1 %5940  ;;  %v5834_v36 = vpop.permute.xlu0 %5833 }
 0x998   : > { %10758 = vmatmul.mubr.msk.bf16.gmra.mxu1 %vm1857_vm0, %v15181_v27  ;;  %10783 = vmatprep.mubr.msk.f32.mxu0 %vm1857_vm0, %v5834_v36 }
 0x999   : > { %10761 = vmatprep.mubr.msk.bf16.mxu1 %vm1857_vm0, %v15184_v32 }
 0x99b   : > { %v5836_v13 = vpop.permute.xlu1 %5835  ;;  %v5935_v41 = vpop.permute.xlu0 %5934 }
 0x99c   : > { %10784 = vmatmul.mubr.msk.f32.vlgmr.msra.gmra.mxu0 %vm1857_vm0, %v5836_v13 }
 0x99f   : > { %v6044_v25 = vpop.permute.xlu1 %6043  ;;  %v5937_v53 = vpop.permute.xlu0 %5936 }
 0x9a0   : > { %10762 = vmatmul.mubr.msk.bf16.gmra.mxu1 %vm1857_vm0, %v15187_v23  ;;  %10793 = vmatprep.subr.msk.mxu0 %vm1857_vm0, %v6044_v25 }
 0x9a1   : > { %10776 = vmatprep.mubr.msk.f32.mxu1 %vm1857_vm0, %v5733_v43  ;;  %10794 = vmatpush3.xpose.msk.msra.mxu0 %vm1857_vm0, %v6044_v25 }
 0x9a3   : > { %v6145_v27 = vpop.permute.xlu1 %6144  ;;  %v6042_v36 = vpop.permute.xlu0 %6041 }
 0x9a4   : > { %10795 = vmatprep.subr.msk.mxu0 %vm1857_vm0, %v6042_v36 }
 0x9a5   : > { %10796 = vmatpush3.xpose.msk.msra.mxu0 %vm1857_vm0, %v6042_v36 }
 0x9a7   : > { %v6143_v55 = vpop.permute.xlu1 %6142  ;;  %v6036_v59 = vpop.permute.xlu0 %6035 }
 0x9a8   : > { %10777 = vmatmul.mubr.msk.f32.vlgmr.msra.gmra.mxu1 %vm1857_vm0, %v5735_v37  ;;  %10797 = vmatprep.mubr.msk.f32.mxu0 %vm1857_vm0, %v6036_v59 }
 0x9a9   : > { %10787 = vmatpush3.xpose.msk.msra.mxu1 %vm1857_vm0, %v5943_v24  ;;  %10790 = vmatprep.mubr.msk.f32.mxu1 %vm1857_vm0, %v5935_v41 }
 0x9aa   : > { %10788 = vmatprep.subr.msk.mxu1 %vm1857_vm0, %v5941_v1 }
 0x9ab   : > { %v6038_v63 = vpop.permute.xlu1 %6037  ;;  %v6137_v25 = vpop.permute.xlu0 %6136 }
 0x9ac   : > { %10798 = vmatmul.mubr.msk.f32.vlgmr.msra.gmra.mxu0 %vm1857_vm0, %v6038_v63 }
 0x9ad   : > { %10789 = vmatpush3.xpose.msk.msra.mxu1 %vm1857_vm0, %v5941_v1 }
 0x9ae   : > { %10800 = vmatprep.subr.msk.mxu1 %vm1857_vm0, %v6145_v27 }
 0x9af   : > { %v6246_v23 = vpop.permute.xlu1 %6245  ;;  %v6139_v9 = vpop.permute.xlu0 %6138 }
 0x9b0   : > { %10791 = vmatmul.mubr.msk.f32.vlgmr.msra.gmra.mxu1 %vm1857_vm0, %v5937_v53  ;;  %10807 = vmatprep.subr.msk.mxu0 %vm1857_vm0, %v6246_v23 }
 0x9b1   : > { %10801 = vmatpush3.xpose.msk.msra.mxu1 %vm1857_vm0, %v6145_v27  ;;  %10804 = vmatprep.mubr.msk.f32.mxu1 %vm1857_vm0, %v6137_v25 }
 0x9b2   : > { %10802 = vmatprep.subr.msk.mxu1 %vm1857_vm0, %v6143_v55  ;;  %10808 = vmatpush3.xpose.msk.msra.mxu0 %vm1857_vm0, %v6246_v23 }
 0x9b3   : > { %v6347_v24 = vpop.permute.xlu1 %6346  ;;  %v6244_v41 = vpop.permute.xlu0 %6243 }
 0x9b4   : > { %10809 = vmatprep.subr.msk.mxu0 %vm1857_vm0, %v6244_v41 }
 0x9b5   : > { %10803 = vmatpush3.xpose.msk.msra.mxu1 %vm1857_vm0, %v6143_v55 }
 0x9b6   : > { %10810 = vmatpush3.xpose.msk.msra.mxu0 %vm1857_vm0, %v6244_v41  ;;  %10814 = vmatprep.subr.msk.mxu1 %vm1857_vm0, %v6347_v24 }
 0x9b7   : > { %v6345_v43 = vpop.permute.xlu1 %6344  ;;  %v6238_v37 = vpop.permute.xlu0 %6237 }
 0x9b8   : > { %10805 = vmatmul.mubr.msk.f32.vlgmr.msra.gmra.mxu1 %vm1857_vm0, %v6139_v9  ;;  %10811 = vmatprep.mubr.msk.f32.mxu0 %vm1857_vm0, %v6238_v37 }
 0x9b9   : > { %10815 = vmatpush3.xpose.msk.msra.mxu1 %vm1857_vm0, %v6347_v24 }
 0x9ba   : > { %10816 = vmatprep.subr.msk.mxu1 %vm1857_vm0, %v6345_v43 }
 0x9bb   : > { %v6240_v1 = vpop.permute.xlu1 %6239  ;;  %v6339_v33 = vpop.permute.xlu0 %6338 }
 0x9bc   : > { %10812 = vmatmul.mubr.msk.f32.vlgmr.msra.gmra.mxu0 %vm1857_vm0, %v6240_v1  ;;  %10818 = vmatprep.mubr.msk.f32.mxu1 %vm1857_vm0, %v6339_v33 }
 0x9bd   : > { %10817 = vmatpush3.xpose.msk.msra.mxu1 %vm1857_vm0, %v6345_v43 }
 0x9bf   : > { %v6341_v10 = vpop.permute.xlu1 %6340  ;;  %v5642_v32 = vpop.permute.xlu0 %5641 }
 0x9c0   : > { %10819 = vmatmul.mubr.msk.f32.vlgmr.msra.gmra.mxu1 %vm1857_vm0, %v6341_v10 }
 0x9c3   : > { %v5644_v13 = vpop.permute.xlu1 %5643  ;;  %v13843_v53 = vpop.permute.xlu0 %5742 }
 0x9c7   : > { %v13845_v27 = vpop.permute.xlu1 %5744  ;;  %v13847_v36 = vpop.permute.xlu0 %5843 }
 0x9cb   : > { %v13849_v55 = vpop.permute.xlu1 %5845  ;;  %v13851_v59 = vpop.permute.xlu0 %5944 }
 0x9cf   : > { %v13853_v63 = vpop.permute.xlu1 %5946  ;;  %v13855_v25 = vpop.permute.xlu0 %6045 }
 0x9d3   : > { %v13857_v23 = vpop.permute.xlu1 %6047  ;;  %v13859_v9 = vpop.permute.xlu0 %6146 }
 0x9d7   : > { %v13861_v24 = vpop.permute.xlu1 %6148  ;;  %v13863_v41 = vpop.permute.xlu0 %6247 }
 0x9db   : > { %v13865_v43 = vpop.permute.xlu1 %6249  ;;  %v13867_v37 = vpop.permute.xlu0 %6348 }
 0x9df   : > { %v13869_v1 = vpop.permute.xlu1 %6350  ;;  %v6707_v33 = vpop.permute.xlu0 %6706 }
 0x9e0   : > { %10828 = vmatprep.subr.mxu1 %v6707_v33 }
 0x9e1   : > { %10829 = vmatpush3.msra.mxu1 %v6707_v33 }
 0x9e3   : > { %v6618_v10 = vpop.permute.xlu1 %6617 }
 0x9e4   : > { %10821 = vmatprep.subr.mxu0 %v6618_v10 }
 0x9e5   : > { %10822 = vmatpush3.msra.mxu0 %v6618_v10 }
 0x9e7   : > { %v6616_v51 = vpop.permute.xlu1 %6615 }
 0x9e8   : > { %10823 = vmatprep.subr.mxu0 %v6616_v51 }
 0x9e9   : > { %10824 = vmatpush3.msra.mxu0 %v6616_v51 }
 0x9eb   : > { %v6705_v54 = vpop.permute.xlu1 %6704 }
 0x9ec   : > { %10830 = vmatprep.subr.mxu1 %v6705_v54 }
 0x9ed   : > { %10831 = vmatpush3.msra.mxu1 %v6705_v54 }
 0x9ef   : > { %v13871_v38 = vpop.permute.xlu1 %6795 }
 0x9f0   : > { %10835 = vmatprep.subr.mxu0 %v13871_v38 }
 0x9f3   : > { %v13874_v57 = vpop.permute.xlu1 %6884 }
 0x9f4   : > { %10842 = vmatprep.subr.mxu1 %v13874_v57 }
 0xa34   : > { %v10731_v2 = vpop.f32.mrf.mxu0 }
 0xa36   : > { %v5369_v52 = vpop.f32.mrf.mxu0 }
 0xa38   : > { %v10732_v33 = vpop.f32.mrf.mxu0  ;;  %v10739_v0 = vpop.f32.mrf.mxu1 }
 0xa3a   : > { %v5372_v35 = vpop.f32.mrf.mxu0  ;;  %v5401_v10 = vpop.f32.mrf.mxu1 }
 0xa3c   : > { %v10740_v6 = vpop.f32.mrf.mxu1  ;;  %v10735_v7 = vpop.f32.mrf.mxu0 }
 0xa3e   : > { %v5404_v51 = vpop.f32.mrf.mxu1  ;;  %v5385_v18 = vpop.f32.mrf.mxu0 }
 0xa40   : > { %v10743_v20 = vpop.f32.mrf.mxu1  ;;  %v10736_v17 = vpop.f32.mrf.mxu0 }
 0xa42   : > { %v5417_v54 = vpop.f32.mrf.mxu1  ;;  %v5388_v45 = vpop.f32.mrf.mxu0 }
 0xa44   : > { %v10744_v29 = vpop.f32.mrf.mxu1 }
 0xa46   : > { %v5420_v46 = vpop.f32.mrf.mxu1 }
 0xa48   : > { %v10751_v28 = vpop.f32.mrf.mxu1 }
 0xa49   : > { %v13877_v3 = vadd.f32 %v10751_v28, %v10731_v2 }
 0xa4a   : > { %v5502_v47 = vpop.f32.mrf.mxu1 }
 0xa4b   : > { %15188 = vst [vmem:[#allocation26_spill] sm:$0xff] %v13877_v3  ;;  %v13879_v40 = vadd.f32 %v5502_v47, %v5369_v52 }
 0xa4c   : > { %v10752_v21 = vpop.f32.mrf.mxu1  ;;  %v10771_v8 = vpop.f32.mrf.mxu0 }
 0xa4d   : > { %v13881_v4 = vadd.f32 %v10752_v21, %v10732_v33  ;;  %v13883_v15 = vadd.f32 %v10771_v8, %v5644_v13 }
 0xa4e   : > { %v5505_v42 = vpop.f32.mrf.mxu1  ;;  %v5721_v14 = vpop.f32.mrf.mxu0 }
 0xa4f   : > { %v13885_v26 = vadd.f32 %v5505_v42, %v5372_v35  ;;  %v13887_v48 = vadd.f32 %v5721_v14, %v5642_v32  ;;  %v6440_v28 = vsel %vm2554_vm1, %v13883_v15, -inf }
 0xa50   : > { %v10755_v2 = vpop.f32.mrf.mxu1  ;;  %6441 = vmax.xlane.f32.xlu1 %v6440_v28 }
 0xa51   : > { %v13891_v3 = vadd.f32 %v10755_v2, %v10735_v7  ;;  %v6437_v47 = vsel %vm2554_vm1, %v13887_v48, -inf }
 0xa52   : > { %v5518_v21 = vpop.f32.mrf.mxu1  ;;  %6438 = vmax.xlane.f32.xlu0 %v6437_v47 }
 0xa53   : > { %15189 = vst [vmem:[#allocation23_spill] sm:$0xff] %v13891_v3  ;;  %v13895_v8 = vadd.f32 %v5518_v21, %v5385_v18 }
 0xa54   : > { %v10756_v52 = vpop.f32.mrf.mxu1 }
 0xa55   : > { %v13897_v13 = vadd.f32 %v10756_v52, %v10736_v17 }
 0xa56   : > { %v5521_v35 = vpop.f32.mrf.mxu1 }
 0xa57   : > { %v13899_v42 = vadd.f32 %v5521_v35, %v5388_v45 }
 0xa58   : > { %v10759_v14 = vpop.f32.mrf.mxu1 }
 0xa59   : > { %v13901_v32 = vadd.f32 %v10759_v14, %v10739_v0 }
 0xa5a   : > { %v5534_v33 = vpop.f32.mrf.mxu1 }
 0xa5b   : > { %v13903_v28 = vadd.f32 %v5534_v33, %v5401_v10 }
 0xa5c   : > { %v10760_v7 = vpop.f32.mrf.mxu1  ;;  %v10785_v2 = vpop.f32.mrf.mxu0 }
 0xa5d   : > { %v13905_v3 = vadd.f32 %v10760_v7, %v10740_v6  ;;  %v13908_v47 = vadd.f32 %v10785_v2, %v13849_v55 }
 0xa5e   : > { %v5537_v18 = vpop.f32.mrf.mxu1  ;;  %v5923_v21 = vpop.f32.mrf.mxu0 }
 0xa5f   : > { %v13910_v17 = vadd.f32 %v5537_v18, %v5404_v51  ;;  %v13913_v45 = vadd.f32 %v5923_v21, %v13847_v36  ;;  %v6452_v0 = vsel %vm2554_vm1, %v13908_v47, -inf }
 0xa60   : > { %v10763_v52 = vpop.f32.mrf.mxu1  ;;  %6453 = vmax.xlane.f32.xlu1 %v6452_v0 }
 0xa61   : > { %15190 = vst [vmem:[#allocation37_spill] sm:$0xff] %v13910_v17  ;;  %v13917_v10 = vadd.f32 %v10763_v52, %v10743_v20  ;;  %v6449_v6 = vsel %vm2554_vm1, %v13913_v45, -inf }
 0xa62   : > { %v5550_v35 = vpop.f32.mrf.mxu1  ;;  %6450 = vmax.xlane.f32.xlu0 %v6449_v6 }
 0xa63   : > { %15191 = vst [vmem:[#allocation21_spill] sm:$0xff] %v13917_v10  ;;  %v13921_v55 = vadd.f32 %v5550_v35, %v5417_v54 }
 0xa64   : > { %v10764_v14 = vpop.f32.mrf.mxu1 }
 0xa65   : > { %15192 = vst [vmem:[#allocation30_spill] sm:$0xff] %v13921_v55  ;;  %v13923_v51 = vadd.f32 %v10764_v14, %v10744_v29 }
 0xa66   : > { %v5553_v33 = vpop.f32.mrf.mxu1 }
 0xa67   : > { %15193 = vst [vmem:[#allocation27_spill] sm:$0xff] %v13923_v51  ;;  %v13925_v36 = vadd.f32 %v5553_v33, %v5420_v46 }
 0xa68   : > { %v10778_v29 = vpop.f32.mrf.mxu1 }
 0xa69   : > { %15194 = vst [vmem:[#allocation24_spill] sm:$0xff] %v13925_v36 }
 0xa6a   : > { %v5822_v0 = vpop.f32.mrf.mxu1 }
 0xa6c   : > { %v10799_v7 = vpop.f32.mrf.mxu0 }
 0xa6d   : > { %v13928_v2 = vadd.f32 %v10799_v7, %v13857_v23 }
 0xa6e   : > { %v6125_v18 = vpop.f32.mrf.mxu0 }
 0xa6f   : > { %v13931_v20 = vadd.f32 %v6125_v18, %v13855_v25  ;;  %v6464_v21 = vsel %vm2554_vm1, %v13928_v2, -inf  ;;  %v13949_v18 = vadd.f32 %v10778_v29, %v13845_v27 }
 0xa70   : > { %6465 = vmax.xlane.f32.xlu1 %v6464_v21  ;;  %v10792_v46 = vpop.f32.mrf.mxu1 }
 0xa71   : > { %v6461_v54 = vsel %vm2554_vm1, %v13931_v20, -inf  ;;  %v13941_v25 = vadd.f32 %v10792_v46, %v13853_v63  ;;  %v13959_v46 = vadd.f32 %v5822_v0, %v13843_v53  ;;  %v6446_v27 = vsel %vm2554_vm1, %v13949_v18, -inf }
 0xa72   : > { %6462 = vmax.xlane.f32.xlu0 %v6461_v54  ;;  %v6024_v52 = vpop.f32.mrf.mxu1 }
 0xa73   : > { %v6458_v63 = vsel %vm2554_vm1, %v13941_v25, -inf }
 0xa78   : > { %v10806_v35 = vpop.f32.mrf.mxu1 }
 0xa79   : > { %v13954_v54 = vadd.f32 %v10806_v35, %v13861_v24  ;;  %v13969_v24 = vadd.f32 %v6024_v52, %v13851_v59  ;;  %v6443_v35 = vsel %vm2554_vm1, %v13959_v46, -inf  ;;  %v15195_v59 = vld [vmem:[#allocation56_spill] sm:$0xff]  ;;  %v15196_v52 = vld [vmem:[#allocation49_spill] sm:$0xff] }
 0xa7c   : > { %v10813_v6 = vpop.f32.mrf.mxu0 }
 0xa7d   : > { %v13938_v23 = vadd.f32 %v10813_v6, %v13865_v43  ;;  %v6226_v43 = vpop.f32.mrf.mxu1  ;;  %v6470_v6 = vsel %vm2554_vm1, %v13954_v54, -inf }
 0xa7e   : > { %v6327_v14 = vpop.f32.mrf.mxu0  ;;  %v13976_v0 = vadd.f32 %v6226_v43, %v13859_v9  ;;  %v13991_v43 = vpop.permute.xlu1 %6882 }
 0xa7f   : > { %v13944_v33 = vadd.f32 %v6327_v14, %v13863_v41  ;;  %v6476_v7 = vsel %vm2554_vm1, %v13938_v23, -inf }
 0xa80   : > { %6477 = vmax.xlane.f32.xlu1 %v6476_v7  ;;  %v10820_v41 = vpop.f32.mrf.mxu1  ;;  %v6467_v14 = vsel %vm2554_vm1, %v13976_v0, -inf }
 0xa81   : > { %v6473_v21 = vsel %vm2554_vm1, %v13944_v33, -inf  ;;  %v13964_v29 = vadd.f32 %v10820_v41, %v13869_v1  ;;  %v6455_v1 = vsel %vm2554_vm1, %v13969_v24, -inf }
 0xa82   : > { %6474 = vmax.xlane.f32.xlu0 %v6473_v21  ;;  %v6428_v7 = vpop.f32.mrf.mxu1  ;;  %v13995_v41 = vpop.permute.xlu1 %7062 }
 0xa83   : > { %v6482_v53 = vsel %vm2554_vm1, %v13964_v29, -inf  ;;  %v13987_v21 = vadd.f32 %v6428_v7, %v13867_v37 }
 0xa84   : > { %6459 = vmax.xlane.f32.xlu1 %v6458_v63  ;;  %v13993_v63 = vpop.permute.xlu0 %6793 }
 0xa85   : > { %v6479_v9 = vsel %vm2554_vm1, %v13987_v21, -inf }
 0xa86   : > { %6447 = vmax.xlane.f32.xlu0 %v6446_v27 }
 0xa88   : > { %6471 = vmax.xlane.f32.xlu1 %v6470_v6  ;;  %v13997_v27 = vpop.permute.xlu0 %6973 }
 0xa8a   : > { %6444 = vmax.xlane.f32.xlu0 %v6443_v35 }
 0xa8c   : > { %6483 = vmax.xlane.f32.xlu1 %v6482_v53 }
 0xa8e   : > { %6456 = vmax.xlane.f32.xlu0 %v6455_v1 }
 0xa92   : > { %6468 = vmax.xlane.f32.xlu0 %v6467_v14 }
 0xa9d   : > { %7060 = vrot.lane.b32.xlu1 %v15195_v59, %s11775_s22 }
 0xaa8   : > { %6971 = vrot.lane.b32.xlu0 %v15196_v52, %s11775_s22 }
 0xac7   : > { %6480 = vmax.xlane.f32.xlu0 %v6479_v9 }
 0xad9   : > { %v6442_v6 = vpop.xlane.xlu1 %6441 }
 0xada   : > { %v6486_v35 = vsub.f32 %v13883_v15, %v6442_v6 }
 0xadb   : > { %v6439_v53 = vpop.xlane.xlu0 %6438 }
 0xadc   : > { %v6503_v1 = vmul.f32 1.442695, %v6486_v35  ;;  %v6485_v37 = vsub.f32 %v13887_v48, %v6439_v53 }
 0xade   : > { %11447 = vpow2.f32 %v6503_v1  ;;  %v6501_v14 = vmul.f32 1.442695, %v6485_v37 }
 0xae0   : > { %11449 = vpow2.f32 %v6501_v14 }
 0xae9   : > { %v6454_v7 = vpop.xlane.xlu1 %6453 }
 0xaea   : > { %v6490_v9 = vsub.f32 %v13908_v47, %v6454_v7 }
 0xaeb   : > { %v14002_v52 = vpop.eup %11447  ;;  %v6451_v59 = vpop.xlane.xlu0 %6450 }
 0xaec   : > { %v6511_v36 = vmul.f32 1.442695, %v6490_v9  ;;  %v6489_v51 = vsub.f32 %v13913_v45, %v6451_v59  ;;  %v6536_v55 = vsel %vm2554_vm1, %v14002_v52, 0.0 }
 0xaed   : > { %v14007_v15 = vpop.eup %11449  ;;  %6537 = vadd.xlane.f32.xlu1 %v6536_v55 }
 0xaee   : > { %11451 = vpow2.f32 %v6511_v36  ;;  %v6509_v48 = vmul.f32 1.442695, %v6489_v51  ;;  %v6533_v6 = vsel %vm2554_vm1, %v14007_v15, 0.0 }
 0xaef   : > { %6534 = vadd.xlane.f32.xlu0 %v6533_v6 }
 0xaf0   : > { %11453 = vpow2.f32 %v6509_v48 }
 0xaf9   : > { %v6466_v47 = vpop.xlane.xlu1 %6465 }
 0xafa   : > { %v6494_v35 = vsub.f32 %v13928_v2, %v6466_v47 }
 0xafb   : > { %v14012_v53 = vpop.eup %11451  ;;  %v6463_v1 = vpop.xlane.xlu0 %6462 }
 0xafc   : > { %v6519_v45 = vmul.f32 1.442695, %v6494_v35  ;;  %v6493_v59 = vsub.f32 %v13931_v20, %v6463_v1  ;;  %v6548_v37 = vsel %vm2554_vm1, %v14012_v53, 0.0 }
 0xafd   : > { %v14017_v55 = vpop.eup %11453  ;;  %6549 = vadd.xlane.f32.xlu1 %v6548_v37 }
 0xafe   : > { %11455 = vpow2.f32 %v6519_v45  ;;  %v6517_v51 = vmul.f32 1.442695, %v6493_v59  ;;  %v6545_v36 = vsel %vm2554_vm1, %v14017_v55, 0.0 }
 0xaff   : > { %6546 = vadd.xlane.f32.xlu0 %v6545_v36 }
 0xb00   : > { %11457 = vpow2.f32 %v6517_v51 }
 0xb09   : > { %v6478_v2 = vpop.xlane.xlu1 %6477 }
 0xb0a   : > { %v6498_v14 = vsub.f32 %v13938_v23, %v6478_v2 }
 0xb0b   : > { %v14022_v7 = vpop.eup %11455  ;;  %v6475_v9 = vpop.xlane.xlu0 %6474 }
 0xb0c   : > { %v6527_v20 = vmul.f32 1.442695, %v6498_v14  ;;  %v6497_v48 = vsub.f32 %v13944_v33, %v6475_v9  ;;  %v6560_v6 = vsel %vm2554_vm1, %v14022_v7, 0.0 }
 0xb0d   : > { %v14027_v47 = vpop.eup %11457  ;;  %v6460_v35 = vpop.xlane.xlu1 %6459  ;;  %6561 = vadd.xlane.f32.xlu1 %v6560_v6 }
 0xb0e   : > { %11459 = vpow2.f32 %v6527_v20  ;;  %v6525_v1 = vmul.f32 1.442695, %v6497_v48  ;;  %v6492_v45 = vsub.f32 %v13941_v25, %v6460_v35  ;;  %v6557_v23 = vsel %vm2554_vm1, %v14027_v47, 0.0 }
 0xb0f   : > { %6558 = vadd.xlane.f32.xlu0 %v6557_v23  ;;  %v6448_v59 = vpop.xlane.xlu0 %6447  ;;  %v15197_v23 = vld [vmem:[#allocation76_spill] sm:$0xff] }
 0xb10   : > { %11461 = vpow2.f32 %v6525_v1  ;;  %v6488_v37 = vsub.f32 %v13949_v18, %v6448_v59  ;;  %v6515_v33 = vmul.f32 1.442695, %v6492_v45  ;;  %v15198_v59 = vld [vmem:[#allocation66_spill] sm:$0xff] }
 0xb12   : > { %v6507_v51 = vmul.f32 1.442695, %v6488_v37 }
 0xb13   : > { %v6445_v36 = vpop.xlane.xlu0 %6444 }
 0xb14   : > { %11463 = vpow2.f32 %v6507_v51  ;;  %v6487_v2 = vsub.f32 %v13959_v46, %v6445_v36 }
 0xb15   : > { %11465 = vpow2.f32 %v6515_v33  ;;  %v6472_v33 = vpop.xlane.xlu1 %6471 }
 0xb16   : > { %v6505_v14 = vmul.f32 1.442695, %v6487_v2  ;;  %v6496_v51 = vsub.f32 %v13954_v54, %v6472_v33 }
 0xb17   : > { %v6457_v37 = vpop.xlane.xlu0 %6456 }
 0xb18   : > { %11467 = vpow2.f32 %v6505_v14  ;;  %v6491_v36 = vsub.f32 %v13969_v24, %v6457_v37  ;;  %v6523_v14 = vmul.f32 1.442695, %v6496_v51 }
 0xb1a   : > { %11469 = vpow2.f32 %v6523_v14 }
 0xb1b   : > { %v14034_v9 = vpop.eup %11459  ;;  %v6469_v2 = vpop.xlane.xlu0 %6468 }
 0xb1c   : > { %v6572_v25 = vsel %vm2554_vm1, %v14034_v9, 0.0 }
 0xb1d   : > { %v14038_v20 = vpop.eup %11461  ;;  %6573 = vadd.xlane.f32.xlu1 %v6572_v25  ;;  %v6513_v25 = vmul.f32 1.442695, %v6491_v36  ;;  %v15199_v36 = vld [vmem:[#allocation71_spill] sm:$0xff] }
 0xb1e   : > { %v6569_v18 = vsel %vm2554_vm1, %v14038_v20, 0.0 }
 0xb1f   : > { %6570 = vadd.xlane.f32.xlu0 %v6569_v18  ;;  %v6495_v18 = vsub.f32 %v13976_v0, %v6469_v2  ;;  %11471 = vpow2.f32 %v6513_v25 }
 0xb21   : > { %v14042_v48 = vpop.eup %11463 }
 0xb22   : > { %v6542_v46 = vsel %vm2554_vm1, %v14042_v48, 0.0  ;;  %v14046_v6 = vpop.eup %11465 }
 0xb23   : > { %6543 = vadd.xlane.f32.xlu1 %v6542_v46  ;;  %v6554_v1 = vsel %vm2554_vm1, %v14046_v6, 0.0  ;;  %v6484_v46 = vpop.xlane.xlu1 %6483 }
 0xb25   : > { %v14048_v35 = vpop.eup %11467 }
 0xb26   : > { %v6539_v45 = vsel %vm2554_vm1, %v14048_v35, 0.0 }
 0xb27   : > { %6555 = vadd.xlane.f32.xlu1 %v6554_v1  ;;  %6540 = vadd.xlane.f32.xlu0 %v6539_v45  ;;  %v6500_v1 = vsub.f32 %v13964_v29, %v6484_v46  ;;  %v6521_v45 = vmul.f32 1.442695, %v6495_v18  ;;  %v14063_v24 = vpop.eup %11469  ;;  %v14085_v2 = vpop.permute.xlu1 %7060  ;;  %v15200_v18 = vld [vmem:[#allocation64_spill] sm:$0xff] }
 0xb28   : > { %v6566_v0 = vsel %vm2554_vm1, %v14063_v24, 0.0 }
 0xb29   : > { %v6531_v10 = vmul.f32 1.442695, %v6500_v1  ;;  %11473 = vpow2.f32 %v6521_v45 }
 0xb2b   : > { %11475 = vpow2.f32 %v6531_v10 }
 0xb2c   : > { %v14065_v37 = vpop.eup %11471 }
 0xb2d   : > { %v6551_v29 = vsel %vm2554_vm1, %v14065_v37, 0.0 }
 0xb36   : > { %v14071_v33 = vpop.eup %11473 }
 0xb38   : > { %7240 = vrot.lane.b32.xlu1 %v15197_v23, %s11775_s22  ;;  %v6972_v23 = vpop.permute.xlu0 %6971  ;;  %v14075_v10 = vpop.eup %11475 }
 0xb3d   : > { %7151 = vrot.lane.b32.xlu0 %v15198_v59, %s11775_s22 }
 0xb50   : > { %v6481_v59 = vpop.xlane.xlu0 %6480 }
 0xb51   : > { %v6499_v17 = vsub.f32 %v13987_v21, %v6481_v59  ;;  %v6563_v21 = vsel %vm2554_vm1, %v14071_v33, 0.0 }
 0xb53   : > { %v6529_v54 = vmul.f32 1.442695, %v6499_v17  ;;  %v6578_v17 = vsel %vm2554_vm1, %v14075_v10, 0.0 }
 0xb55   : > { %11477 = vpow2.f32 %v6529_v54 }
 0xb5c   : > { %6567 = vadd.xlane.f32.xlu1 %v6566_v0  ;;  %6552 = vadd.xlane.f32.xlu0 %v6551_v29 }
 0xb60   : > { %6564 = vadd.xlane.f32.xlu0 %v6563_v21 }
 0xb62   : > { %v14079_v59 = vpop.eup %11477 }
 0xb63   : > { %v6575_v51 = vsel %vm2554_vm1, %v14079_v59, 0.0 }
 0xb64   : > { %6579 = vadd.xlane.f32.xlu0 %v6578_v17 }
 0xb68   : > { %6576 = vadd.xlane.f32.xlu0 %v6575_v51 }
 0xb6d   : > { %7238 = vrot.lane.b32.xlu1 %v15199_v36, %s11775_s22 }
 0xb76   : > { %v6538_v14 = vpop.xlane.xlu1 %6537 }
 0xb77   : > { %11479 = vrcp.f32 %v6538_v14 }
 0xb78   : > { %v6535_v25 = vpop.xlane.xlu0 %6534 }
 0xb79   : > { %11481 = vrcp.f32 %v6535_v25 }
 0xb7e   : > { %7149 = vrot.lane.b32.xlu0 %v15200_v18, %s11775_s22 }
 0xb84   : > { %v11480_v46 = vpop.eup %11479 }
 0xb85   : > { %v6598_v29 = vmul.f32 %v11480_v46, %v14002_v52 }
 0xb86   : > { %v11482_v1 = vpop.eup %11481  ;;  %v6550_v45 = vpop.xlane.xlu1 %6549 }
 0xb87   : > { %v6597_v54 = vmul.f32 %v11482_v1, %v14007_v15  ;;  %11483 = vrcp.f32 %v6550_v45 }
 0xb88   : > { %v6547_v0 = vpop.xlane.xlu0 %6546 }
 0xb89   : > { %11485 = vrcp.f32 %v6547_v0  ;;  %10825 = vmatprep.mubr.msk.f32.mxu0 %vm2554_vm1, %v6597_v54 }
 0xb8a   : > { %10826 = vmatmul.mubr.msk.f32.vlgmr.msra.gmra.mxu0 %vm2554_vm1, %v6598_v29 }
 0xb8b   : > { %10836 = vmatpush3.msra.mxu0 %v13871_v38 }
 0xb8c   : > { %10837 = vmatprep.subr.mxu0 %v13993_v63 }
 0xb8d   : > { %10838 = vmatpush3.msra.mxu0 %v13993_v63 }
 0xb8e   : > { %10849 = vmatprep.subr.mxu0 %v13997_v27 }
 0xb94   : > { %v11484_v21 = vpop.eup %11483 }
 0xb95   : > { %v6602_v14 = vmul.f32 %v11484_v21, %v14012_v53 }
 0xb96   : > { %v11486_v17 = vpop.eup %11485  ;;  %v6562_v15 = vpop.xlane.xlu1 %6561 }
 0xb97   : > { %v6601_v51 = vmul.f32 %v11486_v17, %v14017_v55  ;;  %11487 = vrcp.f32 %v6562_v15 }
 0xb98   : > { %v6559_v52 = vpop.xlane.xlu0 %6558 }
 0xb99   : > { %11489 = vrcp.f32 %v6559_v52  ;;  %10839 = vmatprep.mubr.msk.f32.mxu0 %vm2554_vm1, %v6601_v51 }
 0xb9a   : > { %10840 = vmatmul.mubr.msk.f32.vlgmr.msra.gmra.mxu0 %vm2554_vm1, %v6602_v14 }
 0xb9b   : > { %10850 = vmatpush3.msra.mxu0 %v13997_v27 }
 0xb9c   : > { %10851 = vmatprep.subr.mxu0 %v6972_v23 }
 0xb9d   : > { %10852 = vmatpush3.msra.mxu0 %v6972_v23 }
 0xba4   : > { %v11488_v38 = vpop.eup %11487 }
 0xba5   : > { %v6606_v55 = vmul.f32 %v11488_v38, %v14022_v7 }
 0xba6   : > { %v11490_v63 = vpop.eup %11489  ;;  %v6574_v53 = vpop.xlane.xlu1 %6573 }
 0xba7   : > { %v6605_v25 = vmul.f32 %v11490_v63, %v14027_v47 }
 0xba8   : > { %v6571_v46 = vpop.xlane.xlu0 %6570 }
 0xba9   : > { %11491 = vrcp.f32 %v6571_v46  ;;  %10853 = vmatprep.mubr.msk.f32.mxu0 %vm2554_vm1, %v6605_v25 }
 0xbaa   : > { %10854 = vmatmul.mubr.msk.f32.vlgmr.msra.gmra.mxu0 %vm2554_vm1, %v6606_v55 }
 0xbac   : > { %v6544_v1 = vpop.xlane.xlu1 %6543 }
 0xbad   : > { %11493 = vrcp.f32 %v6544_v1 }
 0xbb0   : > { %v6541_v45 = vpop.xlane.xlu0 %6540 }
 0xbb1   : > { %11495 = vrcp.f32 %v6541_v45 }
 0xbb2   : > { %11497 = vrcp.f32 %v6574_v53 }
 0xbb4   : > { %v7152_v27 = vpop.permute.xlu0 %7151 }
 0xbb5   : > { %10863 = vmatprep.subr.mxu0 %v7152_v27 }
 0xbb6   : > { %v11492_v23 = vpop.eup %11491  ;;  %10864 = vmatpush3.msra.mxu0 %v7152_v27 }
 0xbb7   : > { %v6609_v54 = vmul.f32 %v11492_v23, %v14038_v20  ;;  %v6556_v20 = vpop.xlane.xlu1 %6555 }
 0xbb8   : > { %11499 = vrcp.f32 %v6556_v20 }
 0xbb9   : > { %10867 = vmatprep.mubr.msk.f32.mxu0 %vm2554_vm1, %v6609_v54 }
 0xbba   : > { %v11494_v47 = vpop.eup %11493 }
 0xbbb   : > { %v6600_v29 = vmul.f32 %v11494_v47, %v14042_v48  ;;  %v7241_v21 = vpop.permute.xlu1 %7240 }
 0xbbe   : > { %v11496_v7 = vpop.eup %11495 }
 0xbbf   : > { %v6599_v0 = vmul.f32 %v11496_v7, %v14048_v35 }
 0xbc1   : > { %10832 = vmatprep.mubr.msk.f32.mxu1 %vm2554_vm1, %v6599_v0 }
 0xbc2   : > { %10833 = vmatmul.mubr.msk.f32.vlgmr.msra.gmra.mxu1 %vm2554_vm1, %v6600_v29 }
 0xbc3   : > { %10843 = vmatpush3.msra.mxu1 %v13874_v57  ;;  %v11498_v57 = vpop.eup %11497 }
 0xbc4   : > { %10844 = vmatprep.subr.mxu1 %v13991_v43  ;;  %v6610_v46 = vmul.f32 %v11498_v57, %v14034_v9 }
 0xbc5   : > { %10845 = vmatpush3.msra.mxu1 %v13991_v43  ;;  %v11500_v52 = vpop.eup %11499 }
 0xbc6   : > { %10856 = vmatprep.subr.mxu1 %v13995_v41  ;;  %v6604_v25 = vmul.f32 %v11500_v52, %v14046_v6  ;;  %v15205_v52 = vld [vmem:[#allocation101_spill] sm:$0xff] }
 0xbe5   : > { %v6553_v17 = vpop.xlane.xlu0 %6552  ;;  %v6568_v35 = vpop.xlane.xlu1 %6567 }
 0xbe6   : > { %11501 = vrcp.f32 %v6553_v17 }
 0xbe7   : > { %11503 = vrcp.f32 %v6568_v35 }
 0xbe9   : > { %v6565_v48 = vpop.xlane.xlu0 %6564  ;;  %v7239_v9 = vpop.permute.xlu1 %7238 }
 0xbea   : > { %11505 = vrcp.f32 %v6565_v48  ;;  %v11187_v48 = vld [vmem:[#allocation9 + $0x28] sm:$0xff]  }
 0xbed   : > { %v6580_v15 = vpop.xlane.xlu0 %6579 }
 0xbee   : > { %11507 = vrcp.f32 %v6580_v15 }
 0xbf1   : > { %v6577_v51 = vpop.xlane.xlu0 %6576 }
 0xbf2   : > { %11509 = vrcp.f32 %v6577_v51  ;;  %v15204_v51 = vld [vmem:[#allocation110_spill] sm:$0xff] }
 0xbf3   : > { %v11502_v14 = vpop.eup %11501 }
 0xbf4   : > { %v6603_v38 = vmul.f32 %v11502_v14, %v14065_v37  ;;  %v11504_v63 = vpop.eup %11503 }
 0xbf5   : > { %v7150_v43 = vpop.permute.xlu0 %7149  ;;  %v6608_v37 = vmul.f32 %v11504_v63, %v14063_v24 }
 0xbf6   : > { %10865 = vmatprep.subr.mxu0 %v7150_v43  ;;  %10846 = vmatprep.mubr.msk.f32.mxu1 %vm2554_vm1, %v6603_v38 }
 0xbf7   : > { %v11506_v55 = vpop.eup %11505  ;;  %10866 = vmatpush3.msra.mxu0 %v7150_v43  ;;  %10847 = vmatmul.mubr.msk.f32.vlgmr.msra.gmra.mxu1 %vm2554_vm1, %v6604_v25  ;;  %v15206_v43 = vld [vmem:[#allocation81_spill] sm:$0xff] }
 0xbf8   : > { %10868 = vmatmul.mubr.msk.f32.vlgmr.msra.gmra.mxu0 %vm2554_vm1, %v6610_v46  ;;  %v6607_v53 = vmul.f32 %v11506_v55, %v14071_v33  ;;  %10857 = vmatpush3.msra.mxu1 %v13995_v41  ;;  %v15207_v25 = vld [vmem:[#allocation29_spill] sm:$0xff]  ;;  %v15208_v55 = vld [vmem:[#allocation67_spill] sm:$0xff] }
 0xbf9   : > { %10858 = vmatprep.subr.mxu1 %v14085_v2  ;;  %10877 = vmatprep.subr.bf16.mxu0 %v11187_v48 }
 0xbfa   : > { %10860 = vmatprep.mubr.msk.f32.mxu1 %vm2554_vm1, %v6607_v53  ;;  %10859 = vmatpush3.msra.mxu1 %v14085_v2 }
 0xbfb   : > { %10870 = vmatprep.subr.mxu1 %v7241_v21  ;;  %10861 = vmatmul.mubr.msk.f32.vlgmr.msra.gmra.mxu1 %vm2554_vm1, %v6608_v37  ;;  %v11508_v6 = vpop.eup %11507 }
 0xbfc   : > { %10871 = vmatpush3.msra.mxu1 %v7241_v21  ;;  %v6612_v41 = vmul.f32 %v11508_v6, %v14075_v10  ;;  %10878 = vmatpush3.bf16.msra.mxu0 %v11187_v48 }
 0xbfd   : > { %10872 = vmatprep.subr.mxu1 %v7239_v9 }
 0xbfe   : > { %10873 = vmatpush3.msra.mxu1 %v7239_v9 }
 0xbff   : > { %v11510_v1 = vpop.eup %11509 }
 0xc00   : > { %v6611_v33 = vmul.f32 %v11510_v1, %v14079_v59  ;;  %v15209_v1 = vld [vmem:[#allocation104_spill] sm:$0xff] }
 0xc02   : > { %10874 = vmatprep.mubr.msk.f32.mxu1 %vm2554_vm1, %v6611_v33 }
 0xc03   : > { %10875 = vmatmul.mubr.msk.f32.vlgmr.msra.gmra.mxu1 %vm2554_vm1, %v6612_v41  ;;  %v15210_v41 = vld [vmem:[#allocation102_spill] sm:$0xff] }
 0xc4a   : > { %v10827_v24 = vpop.f32.mrf.mxu0 }
 0xc4b   : > { %7343 = vrot.lane.b32.xlu1 %v10827_v24, %s11775_s22 }
 0xc4c   : > { %v6693_v2 = vpop.f32.mrf.mxu0 }
 0xc4d   : > { %7341 = vrot.lane.b32.xlu0 %v6693_v2, %s11775_s22 }
 0xc5a   : > { %v10841_v27 = vpop.f32.mrf.mxu0 }
 0xc5c   : > { %v6871_v10 = vpop.f32.mrf.mxu0 }
 0xc6a   : > { %v10855_v54 = vpop.f32.mrf.mxu0 }
 0xc6c   : > { %v7049_v7 = vpop.f32.mrf.mxu0 }
 0xc82   : > { %v10834_v45 = vpop.f32.mrf.mxu1 }
 0xc83   : > { %7347 = vrot.lane.b32.xlu1 %v10834_v45, %s11775_s22 }
 0xc84   : > { %v6782_v23 = vpop.f32.mrf.mxu1 }
 0xc85   : > { %7345 = vrot.lane.b32.xlu0 %v6782_v23, %s11775_s22  ;;  %v15211_v23 = vld [vmem:[#allocation57_spill] sm:$0xff] }
 0xc87   : > { %7351 = vrot.lane.b32.xlu1 %v10841_v27, %s11775_s22 }
 0xc89   : > { %7349 = vrot.lane.b32.xlu0 %v6871_v10, %s11775_s22 }
 0xcb7   : > { %v10848_v59 = vpop.f32.mrf.mxu1 }
 0xcb8   : > { %7355 = vrot.lane.b32.xlu1 %v10848_v59, %s11775_s22  ;;  %v10869_v29 = vpop.f32.mrf.mxu0  ;;  %v15212_v59 = vld [vmem:[#allocation45_spill] sm:$0xff] }
 0xcb9   : > { %v6960_v47 = vpop.f32.mrf.mxu1 }
 0xcba   : > { %7353 = vrot.lane.b32.xlu0 %v6960_v47, %s11775_s22  ;;  %v7227_v21 = vpop.f32.mrf.mxu0  ;;  %v15213_v47 = vld [vmem:[#allocation58_spill] sm:$0xff] }
 0xcbb   : > { %v10862_v0 = vpop.f32.mrf.mxu1 }
 0xcbc   : > { %7359 = vrot.lane.b32.xlu1 %v10855_v54, %s11775_s22 }
 0xcbd   : > { %v7138_v20 = vpop.f32.mrf.mxu1 }
 0xcbe   : > { %7357 = vrot.lane.b32.xlu0 %v7049_v7, %s11775_s22 }
 0xcc0   : > { %7363 = vrot.lane.b32.xlu1 %v10862_v0, %s11775_s22 }
 0xcc2   : > { %7361 = vrot.lane.b32.xlu0 %v7138_v20, %s11775_s22  ;;  %v15214_v20 = vld [vmem:[#allocation22_spill] sm:$0xff] }
 0xcc3   : > { %v10876_v17 = vpop.f32.mrf.mxu1 }
 0xcc4   : > { %7367 = vrot.lane.b32.xlu1 %v10869_v29, %s11775_s22 }
 0xcc5   : > { %v7316_v35 = vpop.f32.mrf.mxu1 }
 0xcc6   : > { %7365 = vrot.lane.b32.xlu0 %v7227_v21, %s11775_s22 }
 0xcc8   : > { %7371 = vrot.lane.b32.xlu1 %v10876_v17, %s11775_s22  ;;  %v15215_v17 = vld [vmem:[#allocation20_spill] sm:$0xff] }
 0xcca   : > { %7369 = vrot.lane.b32.xlu0 %v7316_v35, %s11775_s22 }
 0xccc   : > { %7662 = vrot.lane.b32.xlu1 %v15119_v44, %s11774_s20  ;;  %v11188_v44 = vld [vmem:[#allocation9 + $0x20] sm:$0xff]  }
 0xccd   : > { %10879 = vmatprep.subr.bf16.mxu0 %v11188_v44 }
 0xcce   : > { %7664 = vrot.lane.b32.xlu0 %v15118_v61, %s11774_s20  ;;  %10880 = vmatpush3.bf16.msra.mxu0 %v11188_v44  ;;  %v7342_v61 = vpop.permute.xlu0 %7341 }
 0xcd0   : > { %7765 = vrot.lane.b32.xlu1 %v15120_v31, %s11774_s20  ;;  %v7344_v31 = vpop.permute.xlu1 %7343 }
 0xcd2   : > { %7656 = vrot.lane.b32.xlu0 %v15121_v12, %s11774_s20  ;;  %v7389_v12 = vmul.f32 %v13262_v39, %v7342_v61 }
 0xcd4   : > { %7763 = vrot.lane.b32.xlu1 %v15122_v16, %s11774_s20  ;;  %v7390_v16 = vmul.f32 %v13264_v60, %v7344_v31  ;;  %v15216_v31 = vld [vmem:[#allocation111_spill] sm:$0xff] }
 0xcd6   : > { %7658 = vrot.lane.b32.xlu0 %v15124_v30, %s11774_s20  ;;  %v15201_v30 = vld [vmem:[#allocation44_spill] sm:$0xff] }
 0xcd8   : > { %7866 = vrot.lane.b32.xlu1 %v15126_v58, %s11774_s20 }
 0xcda   : > { %7757 = vrot.lane.b32.xlu0 %v15123_v22, %s11774_s20  ;;  %v7405_v22 = vpack.c.bf16 %v7390_v16, %v7389_v12  ;;  %v15217_v16 = vld [vmem:[#allocation73_spill] sm:$0xff] }
 0xcdc   : > { %7864 = vrot.lane.b32.xlu1 %v15127_v34, %s11774_s20  ;;  %v15202_v34 = vld [vmem:[#allocation50_spill] sm:$0xff] }
 0xcde   : > { %7759 = vrot.lane.b32.xlu0 %v15125_v62, %s11774_s20 }
 0xce0   : > { %7967 = vrot.lane.b32.xlu1 %v15128_v50, %s11774_s20 }
 0xce2   : > { %7858 = vrot.lane.b32.xlu0 %v15129_v56, %s11774_s20  ;;  %v15203_v56 = vld [vmem:[#allocation38_spill] sm:$0xff] }
 0xce4   : > { %7965 = vrot.lane.b32.xlu1 %v15130_v5, %s11774_s20 }
 0xce6   : > { %7860 = vrot.lane.b32.xlu0 %v15132_v49, %s11774_s20 }
 0xce8   : > { %8068 = vrot.lane.b32.xlu1 %v15133_v19, %s11774_s20 }
 0xcea   : > { %7959 = vrot.lane.b32.xlu0 %v15131_v11, %s11774_s20 }
 0xcee   : > { %7425 = vrot.lane.b32.xlu0 %v7405_v22, %s11775_s22 }
 0xcf2   : > { %7961 = vrot.lane.b32.xlu0 %v15201_v30, %s11774_s20  ;;  %v15218_v30 = vld [vmem:[#allocation62_spill] sm:$0xff] }
 0xcf5   : > { %v7348_v62 = vpop.permute.xlu1 %7347 }
 0xcf6   : > { %v7392_v50 = vmul.f32 %v15202_v34, %v7348_v62 }
 0xcf7   : > { %v7346_v58 = vpop.permute.xlu0 %7345 }
 0xcf8   : > { %v7391_v5 = vmul.f32 %v15203_v56, %v7346_v58 }
 0xcf9   : > { %v7352_v49 = vpop.permute.xlu1 %7351 }
 0xcfa   : > { %v7406_v15 = vpack.c.bf16 %v7392_v50, %v7391_v5  ;;  %v7394_v57 = vmul.f32 %v15204_v51, %v7352_v49  ;;  %v15219_v5 = vld [vmem:[#allocation54_spill] sm:$0xff] }
 0xcfb   : > { %v7350_v19 = vpop.permute.xlu0 %7349 }
 0xcfc   : > { %v7393_v14 = vmul.f32 %v15205_v52, %v7350_v19  ;;  %7427 = vrot.lane.b32.xlu1 %v7406_v15, %s11775_s22  ;;  %v15220_v19 = vld [vmem:[#allocation48_spill] sm:$0xff] }
 0xcfe   : > { %v7407_v11 = vpack.c.bf16 %v7394_v57, %v7393_v14  ;;  %v15221_v57 = vld [vmem:[#allocation68_spill] sm:$0xff] }
 0xd00   : > { %8169 = vrot.lane.b32.xlu1 %v15206_v43, %s11774_s20  ;;  %7429 = vrot.lane.b32.xlu0 %v7407_v11, %s11775_s22  ;;  %v15222_v43 = vld [vmem:[#allocation55_spill] sm:$0xff] }
 0xd2a   : > { %v7356_v38 = vpop.permute.xlu1 %7355 }
 0xd2b   : > { %v7396_v46 = vmul.f32 %v15207_v25, %v7356_v38  ;;  %v15223_v38 = vld [vmem:[#allocation82_spill] sm:$0xff] }
 0xd2c   : > { %v7354_v63 = vpop.permute.xlu0 %7353 }
 0xd2d   : > { %v7395_v53 = vmul.f32 %v15208_v55, %v7354_v63 }
 0xd2e   : > { %v7360_v37 = vpop.permute.xlu1 %7359 }
 0xd2f   : > { %v7408_v9 = vpack.c.bf16 %v7396_v46, %v7395_v53  ;;  %v7398_v33 = vmul.f32 %v15209_v1, %v7360_v37  ;;  %v15224_v53 = vld [vmem:[#allocation59_spill] sm:$0xff]  ;;  %v15225_v37 = vld [vmem:[#allocation72_spill] sm:$0xff] }
 0xd30   : > { %v7358_v6 = vpop.permute.xlu0 %7357 }
 0xd31   : > { %v7397_v24 = vmul.f32 %v15210_v41, %v7358_v6  ;;  %7431 = vrot.lane.b32.xlu1 %v7408_v9, %s11775_s22 }
 0xd32   : > { %v7364_v2 = vpop.permute.xlu1 %7363 }
 0xd33   : > { %v7409_v45 = vpack.c.bf16 %v7398_v33, %v7397_v24  ;;  %v7400_v10 = vmul.f32 %v15211_v23, %v7364_v2  ;;  %v15226_v33 = vld [vmem:[#allocation69_spill] sm:$0xff] }
 0xd34   : > { %v7362_v27 = vpop.permute.xlu0 %7361  ;;  %v15227_v24 = vld [vmem:[#allocation77_spill] sm:$0xff] }
 0xd35   : > { %v7399_v54 = vmul.f32 %v15212_v59, %v7362_v27  ;;  %8167 = vrot.lane.b32.xlu1 %v15213_v47, %s11774_s20  ;;  %7433 = vrot.lane.b32.xlu0 %v7409_v45, %s11775_s22  ;;  %v15228_v27 = vld [vmem:[#allocation63_spill] sm:$0xff] }
 0xd36   : > { %v7368_v7 = vpop.permute.xlu1 %7367 }
 0xd37   : > { %v7410_v0 = vpack.c.bf16 %v7400_v10, %v7399_v54  ;;  %v7402_v21 = vmul.f32 %v15214_v20, %v7368_v7  ;;  %v15229_v10 = vld [vmem:[#allocation75_spill] sm:$0xff]  ;;  %v15230_v7 = vld [vmem:[#allocation70_spill] sm:$0xff] }
 0xd38   : > { %v7366_v29 = vpop.permute.xlu0 %7365 }
 0xd39   : > { %v7401_v35 = vmul.f32 %v15215_v17, %v7366_v29  ;;  %7435 = vrot.lane.b32.xlu1 %v7410_v0, %s11775_s22  ;;  %v15231_v0 = vld [vmem:[#allocation88_spill] sm:$0xff] }
 0xd3a   : > { %v7372_v48 = vpop.permute.xlu1 %7371 }
 0xd3b   : > { %v7411_v44 = vpack.c.bf16 %v7402_v21, %v7401_v35  ;;  %v7404_v12 = vmul.f32 %v15216_v31, %v7372_v48  ;;  %v15232_v35 = vld [vmem:[#allocation86_spill] sm:$0xff]  ;;  %v15233_v48 = vld [vmem:[#allocation87_spill] sm:$0xff] }
 0xd3c   : > { %v7370_v61 = vpop.permute.xlu0 %7369 }
 0xd3d   : > { %v7403_v22 = vmul.f32 %v15217_v16, %v7370_v61  ;;  %8062 = vrot.lane.b32.xlu1 %v15218_v30, %s11774_s20  ;;  %7437 = vrot.lane.b32.xlu0 %v7411_v44, %s11775_s22  ;;  %v15234_v61 = vld [vmem:[#allocation85_spill] sm:$0xff]  ;;  %v15236_v30 = vld [vmem:[#allocation90_spill] sm:$0xff] }
 0xd3e   : > { %v7663_v62 = vpop.permute.xlu1 %7662 }
 0xd3f   : > { %v7412_v58 = vpack.c.bf16 %v7404_v12, %v7403_v22  ;;  %v15235_v12 = vld [vmem:[#allocation92_spill] sm:$0xff] }
 0xd40   : > { %v7665_v50 = vpop.permute.xlu0 %7664 }
 0xd41   : > { %8066 = vrot.lane.b32.xlu0 %v15219_v5, %s11774_s20  ;;  %7439 = vrot.lane.b32.xlu1 %v7412_v58, %s11775_s22  ;;  %v15238_v58 = vld [vmem:[#allocation89_spill] sm:$0xff]  ;;  %v15240_v5 = vld [vmem:[#allocation94_spill] sm:$0xff] }
 0xd42   : > { %10897 = vmatprep.subr.msk.mxu1 %vm1857_vm0, %v7665_v50  ;;  %v7766_v49 = vpop.permute.xlu1 %7765 }
 0xd43   : > { %10898 = vmatpush3.xpose.msk.msra.mxu1 %vm1857_vm0, %v7665_v50  ;;  %v15239_v50 = vld [vmem:[#allocation96_spill] sm:$0xff] }
 0xd44   : > { %10899 = vmatprep.subr.msk.mxu1 %vm1857_vm0, %v7663_v62  ;;  %v7657_v15 = vpop.permute.xlu0 %7656 }
 0xd45   : > { %8060 = vrot.lane.b32.xlu0 %v15220_v19, %s11774_s20  ;;  %8270 = vrot.lane.b32.xlu1 %v15221_v57, %s11774_s20  ;;  %v15242_v19 = vld [vmem:[#allocation93_spill] sm:$0xff]  ;;  %v15243_v57 = vld [vmem:[#allocation100_spill] sm:$0xff] }
 0xd46   : > { %10901 = vmatprep.mubr.msk.f32.mxu1 %vm1857_vm0, %v7657_v15  ;;  %v7764_v14 = vpop.permute.xlu1 %7763 }
 0xd47   : > { %10900 = vmatpush3.xpose.msk.msra.mxu1 %vm1857_vm0, %v7663_v62  ;;  %v15237_v62 = vld [vmem:[#allocation91_spill] sm:$0xff] }
 0xd48   : > { %10904 = vmatprep.subr.msk.mxu1 %vm1857_vm0, %v7766_v49  ;;  %v7659_v11 = vpop.permute.xlu0 %7658 }
 0xd49   : > { %8161 = vrot.lane.b32.xlu0 %v15222_v43, %s11774_s20  ;;  %8371 = vrot.lane.b32.xlu1 %v15223_v38, %s11774_s20  ;;  %v15244_v43 = vld [vmem:[#allocation98_spill] sm:$0xff]  ;;  %v15245_v38 = vld [vmem:[#allocation99_spill] sm:$0xff] }
 0xd4a   : > { %10902 = vmatmul.mubr.msk.f32.vlgmr.msra.gmra.mxu1 %vm1857_vm0, %v7659_v11  ;;  %v7867_v63 = vpop.permute.xlu1 %7866 }
 0xd4b   : > { %10905 = vmatpush3.xpose.msk.msra.mxu1 %vm1857_vm0, %v7766_v49  ;;  %v15241_v49 = vld [vmem:[#allocation95_spill] sm:$0xff] }
 0xd4c   : > { %10906 = vmatprep.subr.msk.mxu1 %vm1857_vm0, %v7764_v14  ;;  %v7758_v46 = vpop.permute.xlu0 %7757 }
 0xd4d   : > { %8163 = vrot.lane.b32.xlu0 %v15224_v53, %s11774_s20  ;;  %8369 = vrot.lane.b32.xlu1 %v15225_v37, %s11774_s20 }
 0xd4e   : > { %10908 = vmatprep.mubr.msk.f32.mxu1 %vm1857_vm0, %v7758_v46  ;;  %v7865_v9 = vpop.permute.xlu1 %7864 }
 0xd4f   : > { %10907 = vmatpush3.xpose.msk.msra.mxu1 %vm1857_vm0, %v7764_v14 }
 0xd50   : > { %10911 = vmatprep.subr.msk.mxu1 %vm1857_vm0, %v7867_v63  ;;  %v7760_v6 = vpop.permute.xlu0 %7759 }
 0xd51   : > { %8268 = vrot.lane.b32.xlu0 %v15226_v33, %s11774_s20  ;;  %8264 = vrot.lane.b32.xlu1 %v15227_v24, %s11774_s20 }
 0xd52   : > { %10909 = vmatmul.mubr.msk.f32.vlgmr.msra.gmra.mxu1 %vm1857_vm0, %v7760_v6  ;;  %v7968_v2 = vpop.permute.xlu1 %7967 }
 0xd53   : > { %10912 = vmatpush3.xpose.msk.msra.mxu1 %vm1857_vm0, %v7867_v63  ;;  %v15246_v63 = vld [vmem:[#allocation97_spill] sm:$0xff] }
 0xd54   : > { %10913 = vmatprep.subr.msk.mxu1 %vm1857_vm0, %v7865_v9  ;;  %v7859_v45 = vpop.permute.xlu0 %7858 }
 0xd55   : > { %8262 = vrot.lane.b32.xlu0 %v15228_v27, %s11774_s20  ;;  %8365 = vrot.lane.b32.xlu1 %v15229_v10, %s11774_s20 }
 0xd56   : > { %10915 = vmatprep.mubr.msk.f32.mxu1 %vm1857_vm0, %v7859_v45  ;;  %v7966_v54 = vpop.permute.xlu1 %7965 }
 0xd57   : > { %10914 = vmatpush3.xpose.msk.msra.mxu1 %vm1857_vm0, %v7865_v9 }
 0xd58   : > { %10918 = vmatprep.subr.msk.mxu1 %vm1857_vm0, %v7968_v2  ;;  %v7861_v47 = vpop.permute.xlu0 %7860 }
 0xd59   : > { %8363 = vrot.lane.b32.xlu0 %v15230_v7, %s11774_s20  ;;  %7668 = vrot.lane.b32.xlu1 %v15231_v0, %s11776_s29 }
 0xd5a   : > { %10916 = vmatmul.mubr.msk.f32.vlgmr.msra.gmra.mxu1 %vm1857_vm0, %v7861_v47  ;;  %v8069_v29 = vpop.permute.xlu1 %8068 }
 0xd5b   : > { %10919 = vmatpush3.xpose.msk.msra.mxu1 %vm1857_vm0, %v7968_v2  ;;  %10925 = vmatprep.subr.msk.mxu0 %vm1857_vm0, %v8069_v29 }
 0xd5c   : > { %10920 = vmatprep.subr.msk.mxu1 %vm1857_vm0, %v7966_v54  ;;  %v7960_v21 = vpop.permute.xlu0 %7959 }
 0xd5d   : > { %7666 = vrot.lane.b32.xlu0 %v15232_v35, %s11776_s29  ;;  %7769 = vrot.lane.b32.xlu1 %v15233_v48, %s11776_s29 }
 0xd5e   : > { %10922 = vmatprep.mubr.msk.f32.mxu1 %vm1857_vm0, %v7960_v21 }
 0xd5f   : > { %10921 = vmatpush3.xpose.msk.msra.mxu1 %vm1857_vm0, %v7966_v54 }
 0xd60   : > { %v7426_v44 = vpop.permute.xlu0 %7425 }
 0xd61   : > { %7767 = vrot.lane.b32.xlu0 %v15234_v61, %s11776_s29  ;;  %7870 = vrot.lane.b32.xlu1 %v15235_v12, %s11776_s29 }
 0xd62   : > { %10881 = vmatprep.mubr.msk.bf16.mxu0 %vm1857_vm0, %v7426_v44 }
 0xd64   : > { %v7962_v22 = vpop.permute.xlu0 %7961 }
 0xd65   : > { %7868 = vrot.lane.b32.xlu0 %v15236_v30, %s11776_s29  ;;  %7971 = vrot.lane.b32.xlu1 %v15237_v62, %s11776_s29 }
 0xd66   : > { %10923 = vmatmul.mubr.msk.f32.vlgmr.msra.gmra.mxu1 %vm1857_vm0, %v7962_v22 }
 0xd69   : > { %7969 = vrot.lane.b32.xlu0 %v15238_v58, %s11776_s29  ;;  %8072 = vrot.lane.b32.xlu1 %v15239_v50, %s11776_s29 }
 0xd6d   : > { %8070 = vrot.lane.b32.xlu0 %v15240_v5, %s11776_s29  ;;  %8173 = vrot.lane.b32.xlu1 %v15241_v49, %s11776_s29 }
 0xd6e   : > { %v7428_v15 = vpop.permute.xlu1 %7427 }
 0xd6f   : > { %10882 = vmatmul.mubr.msk.bf16.vlgmr.msra.gmra.mxu0 %vm1857_vm0, %v7428_v15 }
 0xd70   : > { %10926 = vmatpush3.xpose.msk.msra.mxu0 %vm1857_vm0, %v8069_v29 }
 0xd71   : > { %8171 = vrot.lane.b32.xlu0 %v15242_v19, %s11776_s29  ;;  %8274 = vrot.lane.b32.xlu1 %v15243_v57, %s11776_s29 }
 0xd72   : > { %v8170_v14 = vpop.permute.xlu1 %8169  ;;  %v7430_v11 = vpop.permute.xlu0 %7429 }
 0xd73   : > { %10885 = vmatprep.mubr.msk.bf16.mxu0 %vm1857_vm0, %v7430_v11  ;;  %10932 = vmatprep.subr.msk.mxu1 %vm1857_vm0, %v8170_v14 }
 0xd74   : > { %10933 = vmatpush3.xpose.msk.msra.mxu1 %vm1857_vm0, %v8170_v14 }
 0xd75   : > { %8272 = vrot.lane.b32.xlu0 %v15244_v43, %s11776_s29  ;;  %8375 = vrot.lane.b32.xlu1 %v15245_v38, %s11776_s29 }
 0xd79   : > { %8373 = vrot.lane.b32.xlu0 %v15246_v63, %s11776_s29 }
 0xda3   : > { %v7432_v46 = vpop.permute.xlu1 %7431 }
 0xda4   : > { %10886 = vmatmul.mubr.msk.bf16.gmra.mxu0 %vm1857_vm0, %v7432_v46 }
 0xda7   : > { %v8168_v53 = vpop.permute.xlu1 %8167  ;;  %v7434_v37 = vpop.permute.xlu0 %7433 }
 0xda8   : > { %10889 = vmatprep.mubr.msk.bf16.mxu0 %vm1857_vm0, %v7434_v37  ;;  %10934 = vmatprep.subr.msk.mxu1 %vm1857_vm0, %v8168_v53 }
 0xda9   : > { %10935 = vmatpush3.xpose.msk.msra.mxu1 %vm1857_vm0, %v8168_v53 }
 0xdab   : > { %v7436_v9 = vpop.permute.xlu1 %7435 }
 0xdac   : > { %10890 = vmatmul.mubr.msk.bf16.gmra.mxu0 %vm1857_vm0, %v7436_v9 }
 0xdaf   : > { %v8063_v6 = vpop.permute.xlu1 %8062  ;;  %v7438_v33 = vpop.permute.xlu0 %7437 }
 0xdb0   : > { %10893 = vmatprep.mubr.msk.bf16.mxu0 %vm1857_vm0, %v7438_v33 }
 0xdb3   : > { %v7440_v24 = vpop.permute.xlu1 %7439  ;;  %v8067_v2 = vpop.permute.xlu0 %8066 }
 0xdb4   : > { %10894 = vmatmul.mubr.msk.bf16.gmra.mxu0 %vm1857_vm0, %v7440_v24  ;;  %10927 = vmatprep.subr.msk.mxu0 %vm1857_vm0, %v8067_v2 }
 0xdb5   : > { %10928 = vmatpush3.xpose.msk.msra.mxu0 %vm1857_vm0, %v8067_v2 }
 0xdb7   : > { %v8271_v45 = vpop.permute.xlu1 %8270  ;;  %v8061_v27 = vpop.permute.xlu0 %8060 }
 0xdb8   : > { %10929 = vmatprep.mubr.msk.f32.mxu0 %vm1857_vm0, %v8061_v27  ;;  %10939 = vmatprep.subr.msk.mxu0 %vm1857_vm0, %v8271_v45 }
 0xdbb   : > { %v8372_v10 = vpop.permute.xlu1 %8371  ;;  %v8162_v54 = vpop.permute.xlu0 %8161 }
 0xdbc   : > { %10930 = vmatmul.mubr.msk.f32.vlgmr.msra.gmra.mxu0 %vm1857_vm0, %v8063_v6  ;;  %10936 = vmatprep.mubr.msk.f32.mxu1 %vm1857_vm0, %v8162_v54 }
 0xdbd   : > { %10940 = vmatpush3.xpose.msk.msra.mxu0 %vm1857_vm0, %v8271_v45  ;;  %10946 = vmatprep.subr.msk.mxu1 %vm1857_vm0, %v8372_v10 }
 0xdbf   : > { %v8370_v47 = vpop.permute.xlu1 %8369  ;;  %v8164_v7 = vpop.permute.xlu0 %8163 }
 0xdc0   : > { %10937 = vmatmul.mubr.msk.f32.vlgmr.msra.gmra.mxu1 %vm1857_vm0, %v8164_v7 }
 0xdc1   : > { %10947 = vmatpush3.xpose.msk.msra.mxu1 %vm1857_vm0, %v8372_v10 }
 0xdc2   : > { %10948 = vmatprep.subr.msk.mxu1 %vm1857_vm0, %v8370_v47 }
 0xdc3   : > { %v8269_v0 = vpop.permute.xlu0 %8268  ;;  %v8265_v29 = vpop.permute.xlu1 %8264 }
 0xdc4   : > { %10941 = vmatprep.subr.msk.mxu0 %vm1857_vm0, %v8269_v0 }
 0xdc5   : > { %10949 = vmatpush3.xpose.msk.msra.mxu1 %vm1857_vm0, %v8370_v47  ;;  %10942 = vmatpush3.xpose.msk.msra.mxu0 %vm1857_vm0, %v8269_v0 }
 0xdc7   : > { %v8263_v21 = vpop.permute.xlu0 %8262  ;;  %v8366_v48 = vpop.permute.xlu1 %8365 }
 0xdc8   : > { %10943 = vmatprep.mubr.msk.f32.mxu0 %vm1857_vm0, %v8263_v21 }
 0xdc9   : > { %10944 = vmatmul.mubr.msk.f32.vlgmr.msra.gmra.mxu0 %vm1857_vm0, %v8265_v29  ;;  %v15247_v29 = vld [vmem:[#allocation26_spill] sm:$0xff] }
 0xdcb   : > { %v8364_v35 = vpop.permute.xlu0 %8363  ;;  %v7669_v44 = vpop.permute.xlu1 %7668 }
 0xdcc   : > { %10950 = vmatprep.mubr.msk.f32.mxu1 %vm1857_vm0, %v8364_v35 }
 0xdcd   : > { %10951 = vmatmul.mubr.msk.f32.vlgmr.msra.gmra.mxu1 %vm1857_vm0, %v8366_v48 }
 0xdcf   : > { %v7667_v22 = vpop.permute.xlu0 %7666  ;;  %v7770_v49 = vpop.permute.xlu1 %7769 }
 0xdd3   : > { %v7768_v15 = vpop.permute.xlu0 %7767  ;;  %v7871_v43 = vpop.permute.xlu1 %7870 }
 0xdd7   : > { %v7869_v53 = vpop.permute.xlu0 %7868  ;;  %v7972_v24 = vpop.permute.xlu1 %7971 }
 0xddb   : > { %v7970_v27 = vpop.permute.xlu0 %7969 }
 0xe0a   : > { %v10903_v61 = vpop.f32.mrf.mxu1 }
 0xe0b   : > { %v14325_v12 = vadd.f32 %v10903_v61, %v7669_v44 }
 0xe0c   : > { %v7746_v30 = vpop.f32.mrf.mxu1 }
 0xe0d   : > { %v14327_v62 = vadd.f32 %v7746_v30, %v7667_v22  ;;  %v8465_v58 = vsel %vm2554_vm1, %v14325_v12, -inf }
 0xe0e   : > { %8466 = vmax.xlane.f32.xlu1 %v8465_v58 }
 0xe0f   : > { %v8462_v50 = vsel %vm2554_vm1, %v14327_v62, -inf }
 0xe10   : > { %8463 = vmax.xlane.f32.xlu0 %v8462_v50  ;;  %v15248_v50 = vld [vmem:[#allocation23_spill] sm:$0xff] }
 0xe12   : > { %v10910_v5 = vpop.f32.mrf.mxu1 }
 0xe13   : > { %v14335_v14 = vadd.f32 %v10910_v5, %v7770_v49 }
 0xe14   : > { %v7847_v19 = vpop.f32.mrf.mxu1 }
 0xe15   : > { %v14333_v57 = vadd.f32 %v7847_v19, %v7768_v15  ;;  %v8471_v46 = vsel %vm2554_vm1, %v14335_v14, -inf }
 0xe17   : > { %v8468_v11 = vsel %vm2554_vm1, %v14333_v57, -inf }
 0xe18   : > { %8469 = vmax.xlane.f32.xlu0 %v8468_v11 }
 0xe1a   : > { %v10917_v38 = vpop.f32.mrf.mxu1 }
 0xe1b   : > { %v14339_v63 = vadd.f32 %v10917_v38, %v7871_v43 }
 0xe1c   : > { %v7948_v37 = vpop.f32.mrf.mxu1  ;;  %8472 = vmax.xlane.f32.xlu0 %v8471_v46 }
 0xe1d   : > { %v14343_v9 = vadd.f32 %v7948_v37, %v7869_v53  ;;  %v8477_v6 = vsel %vm2554_vm1, %v14339_v63, -inf }
 0xe1e   : > { %8478 = vmax.xlane.f32.xlu1 %v8477_v6  ;;  %v15249_v6 = vld [vmem:[#allocation37_spill] sm:$0xff] }
 0xe1f   : > { %v8474_v33 = vsel %vm2554_vm1, %v14343_v9, -inf }
 0xe20   : > { %8475 = vmax.xlane.f32.xlu0 %v8474_v33 }
 0xe26   : > { %v10924_v2 = vpop.f32.mrf.mxu1 }
 0xe27   : > { %v14349_v45 = vadd.f32 %v10924_v2, %v7972_v24  ;;  %v15250_v24 = vld [vmem:[#allocation21_spill] sm:$0xff] }
 0xe28   : > { %v8049_v10 = vpop.f32.mrf.mxu1 }
 0xe29   : > { %v14351_v54 = vadd.f32 %v8049_v10, %v7970_v27  ;;  %v8483_v47 = vsel %vm2554_vm1, %v14349_v45, -inf  ;;  %v15252_v27 = vld [vmem:[#allocation30_spill] sm:$0xff] }
 0xe2a   : > { %8484 = vmax.xlane.f32.xlu1 %v8483_v47  ;;  %v15254_v47 = vld [vmem:[#allocation27_spill] sm:$0xff] }
 0xe2b   : > { %v8480_v7 = vsel %vm2554_vm1, %v14351_v54, -inf }
 0xe2c   : > { %8481 = vmax.xlane.f32.xlu0 %v8480_v7  ;;  %v14402_v7 = vpop.permute.xlu1 %8072 }
 0xe2f   : > { %v10883_v0 = vpop.f32.mrf.mxu0 }
 0xe30   : > { %v14358_v21 = vadd.f32 %v10883_v0, %v15247_v29  ;;  %v15256_v0 = vld [vmem:[#allocation24_spill] sm:$0xff] }
 0xe31   : > { %v7511_v35 = vpop.f32.mrf.mxu0 }
 0xe32   : > { %v14361_v48 = vadd.f32 %v7511_v35, %v13879_v40  ;;  %v14407_v35 = vpop.permute.xlu0 %8070 }
 0xe33   : > { %v10884_v44 = vpop.f32.mrf.mxu0 }
 0xe34   : > { %v14364_v61 = vadd.f32 %v10884_v44, %v13881_v4  ;;  %v8174_v44 = vpop.permute.xlu1 %8173 }
 0xe35   : > { %v7514_v22 = vpop.f32.mrf.mxu0 }
 0xe36   : > { %v14367_v30 = vadd.f32 %v7514_v22, %v13885_v26 }
 0xe64   : > { %v10887_v58 = vpop.f32.mrf.mxu0 }
 0xe65   : > { %v14370_v5 = vadd.f32 %v10887_v58, %v15248_v50  ;;  %v8172_v50 = vpop.permute.xlu0 %8171 }
 0xe66   : > { %v7527_v49 = vpop.f32.mrf.mxu0 }
 0xe67   : > { %v14373_v15 = vadd.f32 %v7527_v49, %v13895_v8 }
 0xe68   : > { %v10888_v19 = vpop.f32.mrf.mxu0 }
 0xe69   : > { %v14376_v40 = vadd.f32 %v10888_v19, %v13897_v13 }
 0xe6a   : > { %v7530_v11 = vpop.f32.mrf.mxu0 }
 0xe6b   : > { %v14379_v4 = vadd.f32 %v7530_v11, %v13899_v42 }
 0xe6c   : > { %v10891_v43 = vpop.f32.mrf.mxu0 }
 0xe6d   : > { %v14382_v26 = vadd.f32 %v10891_v43, %v13901_v32 }
 0xe6e   : > { %v7543_v38 = vpop.f32.mrf.mxu0 }
 0xe6f   : > { %v14385_v46 = vadd.f32 %v7543_v38, %v13903_v28  ;;  %v14417_v38 = vpop.permute.xlu1 %8274 }
 0xe70   : > { %v10892_v53 = vpop.f32.mrf.mxu0 }
 0xe71   : > { %v14388_v8 = vadd.f32 %v10892_v53, %v13905_v3  ;;  %v14419_v53 = vpop.permute.xlu0 %8272 }
 0xe72   : > { %v7546_v37 = vpop.f32.mrf.mxu0 }
 0xe73   : > { %v14391_v13 = vadd.f32 %v7546_v37, %v15249_v6  ;;  %v8376_v37 = vpop.permute.xlu1 %8375 }
 0xe74   : > { %v10895_v33 = vpop.f32.mrf.mxu0 }
 0xe75   : > { %v14394_v42 = vadd.f32 %v10895_v33, %v15250_v24  ;;  %v8374_v24 = vpop.permute.xlu0 %8373 }
 0xe76   : > { %v7559_v2 = vpop.f32.mrf.mxu0 }
 0xe77   : > { %15251 = vst [vmem:[#allocation33_spill] sm:$0xff] %v14394_v42  ;;  %v14397_v32 = vadd.f32 %v7559_v2, %v15252_v27 }
 0xe78   : > { %v10896_v10 = vpop.f32.mrf.mxu0 }
 0xe79   : > { %15253 = vst [vmem:[#allocation39_spill] sm:$0xff] %v14397_v32  ;;  %v14400_v28 = vadd.f32 %v10896_v10, %v15254_v47 }
 0xe7a   : > { %v7562_v3 = vpop.f32.mrf.mxu0 }
 0xe7b   : > { %15255 = vst [vmem:[#allocation40_spill] sm:$0xff] %v14400_v28  ;;  %v14405_v29 = vadd.f32 %v7562_v3, %v15256_v0 }
 0xe7d   : > { %15257 = vst [vmem:[#allocation47_spill] sm:$0xff] %v14405_v29 }
 0xe80   : > { %v10938_v22 = vpop.f32.mrf.mxu1 }
 0xe81   : > { %v14409_v58 = vadd.f32 %v10938_v22, %v8174_v44 }
 0xe82   : > { %v8251_v49 = vpop.f32.mrf.mxu1 }
 0xe83   : > { %v14411_v19 = vadd.f32 %v8251_v49, %v8172_v50  ;;  %v8495_v11 = vsel %vm2554_vm1, %v14409_v58, -inf }
 0xe84   : > { %8496 = vmax.xlane.f32.xlu1 %v8495_v11 }
 0xe85   : > { %v8492_v43 = vsel %vm2554_vm1, %v14411_v19, -inf }
 0xe86   : > { %8493 = vmax.xlane.f32.xlu0 %v8492_v43 }
 0xe8d   : > { %v10952_v6 = vpop.f32.mrf.mxu1 }
 0xe8e   : > { %v14421_v33 = vadd.f32 %v10952_v6, %v8376_v37 }
 0xe8f   : > { %v8453_v2 = vpop.f32.mrf.mxu1 }
 0xe90   : > { %v14423_v27 = vadd.f32 %v8453_v2, %v8374_v24  ;;  %v8507_v10 = vsel %vm2554_vm1, %v14421_v33, -inf }
 0xe91   : > { %8508 = vmax.xlane.f32.xlu1 %v8507_v10 }
 0xe92   : > { %v8504_v47 = vsel %vm2554_vm1, %v14423_v27, -inf }
 0xe93   : > { %8505 = vmax.xlane.f32.xlu0 %v8504_v47 }
 0xe97   : > { %v8467_v3 = vpop.xlane.xlu1 %8466 }
 0xe98   : > { %v8511_v0 = vsub.f32 %v14325_v12, %v8467_v3 }
 0xe99   : > { %v8464_v44 = vpop.xlane.xlu0 %8463 }
 0xe9a   : > { %v8528_v22 = vmul.f32 1.442695, %v8511_v0  ;;  %v8510_v50 = vsub.f32 %v14327_v62, %v8464_v44 }
 0xe9c   : > { %11511 = vpow2.f32 %v8528_v22  ;;  %v8526_v49 = vmul.f32 1.442695, %v8510_v50 }
 0xe9e   : > { %11513 = vpow2.f32 %v8526_v49 }
 0xea1   : > { %v8470_v11 = vpop.xlane.xlu0 %8469 }
 0xea2   : > { %v8512_v43 = vsub.f32 %v14333_v57, %v8470_v11  ;;  %v10931_v11 = vpop.f32.mrf.mxu0 }
 0xea4   : > { %v8530_v37 = vmul.f32 1.442695, %v8512_v43 }
 0xea5   : > { %v8473_v6 = vpop.xlane.xlu0 %8472 }
 0xea6   : > { %11515 = vpow2.f32 %v8530_v37  ;;  %v8513_v24 = vsub.f32 %v14335_v14, %v8473_v6 }
 0xea7   : > { %v8479_v2 = vpop.xlane.xlu1 %8478 }
 0xea8   : > { %v8532_v10 = vmul.f32 1.442695, %v8513_v24  ;;  %v8515_v47 = vsub.f32 %v14339_v63, %v8479_v2 }
 0xea9   : > { %v14434_v12 = vpop.eup %11511  ;;  %v8476_v3 = vpop.xlane.xlu0 %8475 }
 0xeaa   : > { %11517 = vpow2.f32 %v8532_v10  ;;  %v8536_v62 = vmul.f32 1.442695, %v8515_v47  ;;  %v8514_v0 = vsub.f32 %v14343_v9, %v8476_v3  ;;  %v8561_v44 = vsel %vm2554_vm1, %v14434_v12, 0.0  ;;  %v8150_v3 = vpop.f32.mrf.mxu0 }
 0xeab   : > { %v14439_v57 = vpop.eup %11513  ;;  %8562 = vadd.xlane.f32.xlu1 %v8561_v44 }
 0xeac   : > { %11519 = vpow2.f32 %v8536_v62  ;;  %v8534_v22 = vmul.f32 1.442695, %v8514_v0  ;;  %v8558_v14 = vsel %vm2554_vm1, %v14439_v57, 0.0  ;;  %v14458_v62 = vadd.f32 %v10931_v11, %v14402_v7 }
 0xead   : > { %8559 = vadd.xlane.f32.xlu0 %v8558_v14  ;;  %v14461_v0 = vadd.f32 %v8150_v3, %v14407_v35 }
 0xeae   : > { %11521 = vpow2.f32 %v8534_v22  ;;  %v8489_v22 = vsel %vm2554_vm1, %v14458_v62, -inf }
 0xeaf   : > { %v8486_v14 = vsel %vm2554_vm1, %v14461_v0, -inf }
 0xeb3   : > { %v14443_v63 = vpop.eup %11515  ;;  %v8485_v50 = vpop.xlane.xlu1 %8484 }
 0xeb4   : > { %v8517_v49 = vsub.f32 %v14349_v45, %v8485_v50  ;;  %v8564_v9 = vsel %vm2554_vm1, %v14443_v63, 0.0  ;;  %v10945_v50 = vpop.f32.mrf.mxu0 }
 0xeb5   : > { %8565 = vadd.xlane.f32.xlu0 %v8564_v9  ;;  %v8482_v43 = vpop.xlane.xlu0 %8481 }
 0xeb6   : > { %v8540_v37 = vmul.f32 1.442695, %v8517_v49  ;;  %v8516_v6 = vsub.f32 %v14351_v54, %v8482_v43  ;;  %v8352_v35 = vpop.f32.mrf.mxu0  ;;  %v14474_v49 = vadd.f32 %v10945_v50, %v14417_v38 }
 0xeb7   : > { %v14449_v24 = vpop.eup %11517  ;;  %v14481_v43 = vadd.f32 %v8352_v35, %v14419_v53 }
 0xeb8   : > { %11523 = vpow2.f32 %v8540_v37  ;;  %v8538_v2 = vmul.f32 1.442695, %v8516_v6  ;;  %v8567_v10 = vsel %vm2554_vm1, %v14449_v24, 0.0  ;;  %v8501_v6 = vsel %vm2554_vm1, %v14474_v49, -inf }
 0xeb9   : > { %v14453_v47 = vpop.eup %11519  ;;  %8568 = vadd.xlane.f32.xlu1 %v8567_v10  ;;  %v8498_v38 = vsel %vm2554_vm1, %v14481_v43, -inf }
 0xeba   : > { %11525 = vpow2.f32 %v8538_v2  ;;  %v8573_v54 = vsel %vm2554_vm1, %v14453_v47, 0.0 }
 0xebb   : > { %v14455_v45 = vpop.eup %11521 }
 0xebc   : > { %v8570_v44 = vsel %vm2554_vm1, %v14455_v45, 0.0 }
 0xebd   : > { %8574 = vadd.xlane.f32.xlu1 %v8573_v54  ;;  %8571 = vadd.xlane.f32.xlu0 %v8570_v44 }
 0xec1   : > { %8490 = vmax.xlane.f32.xlu1 %v8489_v22  ;;  %8487 = vmax.xlane.f32.xlu0 %v8486_v14 }
 0xec5   : > { %v14471_v7 = vpop.eup %11523 }
 0xec6   : > { %v8579_v9 = vsel %vm2554_vm1, %v14471_v7, 0.0 }
 0xec7   : > { %v14478_v11 = vpop.eup %11525  ;;  %8580 = vadd.xlane.f32.xlu1 %v8579_v9 }
 0xec8   : > { %v8576_v37 = vsel %vm2554_vm1, %v14478_v11, 0.0 }
 0xec9   : > { %8577 = vadd.xlane.f32.xlu0 %v8576_v37 }
 0xecb   : > { %8502 = vmax.xlane.f32.xlu1 %v8501_v6 }
 0xecd   : > { %8499 = vmax.xlane.f32.xlu0 %v8498_v38 }
 0xf0d   : > { %v8497_v2 = vpop.xlane.xlu1 %8496 }
 0xf0e   : > { %v8521_v10 = vsub.f32 %v14409_v58, %v8497_v2 }
 0xf0f   : > { %v8494_v3 = vpop.xlane.xlu0 %8493 }
 0xf10   : > { %v8548_v54 = vmul.f32 1.442695, %v8521_v10  ;;  %v8520_v53 = vsub.f32 %v14411_v19, %v8494_v3  ;;  %v15258_v10 = vld [vmem:[#allocation74_spill] sm:$0xff] }
 0xf12   : > { %11527 = vpow2.f32 %v8548_v54  ;;  %v8546_v44 = vmul.f32 1.442695, %v8520_v53  ;;  %v15259_v53 = vld [vmem:[#allocation78_spill] sm:$0xff] }
 0xf14   : > { %11529 = vpow2.f32 %v8546_v44  ;;  %v15260_v44 = vld [vmem:[#allocation28_spill] sm:$0xff] }
 0xf1a   : > { %v8509_v22 = vpop.xlane.xlu1 %8508 }
 0xf1b   : > { %v8525_v14 = vsub.f32 %v14421_v33, %v8509_v22 }
 0xf1c   : > { %v8506_v50 = vpop.xlane.xlu0 %8505 }
 0xf1d   : > { %v8524_v35 = vsub.f32 %v14423_v27, %v8506_v50  ;;  %v8556_v37 = vmul.f32 1.442695, %v8525_v14  ;;  %v15261_v14 = vld [vmem:[#allocation79_spill] sm:$0xff] }
 0xf1e   : > { %v15262_v50 = vld [vmem:[#allocation83_spill] sm:$0xff] }
 0xf1f   : > { %v14493_v9 = vpop.eup %11527  ;;  %v8554_v6 = vmul.f32 1.442695, %v8524_v35 }
 0xf20   : > { %v8591_v58 = vsel %vm2554_vm1, %v14493_v9, 0.0 }
 0xf21   : > { %v14497_v38 = vpop.eup %11529  ;;  %11531 = vpow2.f32 %v8554_v6  ;;  %8592 = vadd.xlane.f32.xlu1 %v8591_v58  ;;  %v15263_v58 = vld [vmem:[#allocation42_spill] sm:$0xff] }
 0xf22   : > { %v8588_v19 = vsel %vm2554_vm1, %v14497_v38, 0.0  ;;  %11533 = vpow2.f32 %v8556_v37 }
 0xf23   : > { %8589 = vadd.xlane.f32.xlu0 %v8588_v19 }
 0xf2e   : > { %v14501_v33 = vpop.eup %11531 }
 0xf2f   : > { %v8600_v27 = vsel %vm2554_vm1, %v14501_v33, 0.0  ;;  %v14505_v2 = vpop.eup %11533 }
 0xf30   : > { %8601 = vadd.xlane.f32.xlu0 %v8600_v27  ;;  %v8603_v3 = vsel %vm2554_vm1, %v14505_v2, 0.0  ;;  %v15264_v27 = vld [vmem:[#allocation60_spill] sm:$0xff] }
 0xf32   : > { %8642 = vrot.lane.b32.xlu1 %v15258_v10, %s11774_s20  ;;  %v15265_v10 = vld [vmem:[#allocation31_spill] sm:$0xff] }
 0xf34   : > { %8604 = vadd.xlane.f32.xlu0 %v8603_v3  ;;  %v8563_v37 = vpop.xlane.xlu1 %8562 }
 0xf36   : > { %v8560_v54 = vpop.xlane.xlu0 %8559  ;;  %8640 = vrot.lane.b32.xlu1 %v15259_v53, %s11774_s20 }
 0xf37   : > { %11535 = vrcp.f32 %v8560_v54 }
 0xf3a   : > { %8729 = vrot.lane.b32.xlu1 %v15260_v44, %s11774_s20  ;;  %v15266_v44 = vld [vmem:[#allocation56_spill] sm:$0xff] }
 0xf3e   : > { %v8566_v22 = vpop.xlane.xlu0 %8565  ;;  %8820 = vrot.lane.b32.xlu1 %v15261_v14, %s11774_s20  ;;  %v15268_v14 = vld [vmem:[#allocation76_spill] sm:$0xff] }
 0xf3f   : > { %11537 = vrcp.f32 %v8566_v22 }
 0xf42   : > { %8909 = vrot.lane.b32.xlu1 %v15262_v50, %s11774_s20  ;;  %v8569_v19 = vpop.xlane.xlu1 %8568  ;;  %v15269_v50 = vld [vmem:[#allocation51_spill] sm:$0xff] }
 0xf44   : > { %v11536_v35 = vpop.eup %11535 }
 0xf45   : > { %v8622_v6 = vmul.f32 %v11536_v35, %v14439_v57  ;;  %v15267_v57 = vld [vmem:[#allocation35_spill] sm:$0xff] }
 0xf46   : > { %8907 = vrot.lane.b32.xlu1 %v15263_v58, %s11774_s20  ;;  %v8575_v53 = vpop.xlane.xlu1 %8574  ;;  %v8572_v22 = vpop.xlane.xlu0 %8571 }
 0xf47   : > { %10957 = vmatprep.mubr.msk.f32.mxu0 %vm2554_vm1, %v8622_v6  ;;  %v15270_v6 = vld [vmem:[#allocation49_spill] sm:$0xff] }
 0xf4a   : > { %9087 = vrot.lane.b32.xlu1 %v15264_v27, %s11774_s20  ;;  %8731 = vrot.lane.b32.xlu0 %v15265_v10, %s11774_s20  ;;  %v8491_v35 = vpop.xlane.xlu1 %8490  ;;  %v15271_v27 = vld [vmem:[#allocation66_spill] sm:$0xff] }
 0xf4c   : > { %v11538_v3 = vpop.eup %11537 }
 0xf4d   : > { %v8624_v54 = vmul.f32 %v11538_v3, %v14443_v63  ;;  %v8488_v63 = vpop.xlane.xlu0 %8487  ;;  %v8519_v3 = vsub.f32 %v14458_v62, %v8491_v35 }
 0xf4e   : > { %9085 = vrot.lane.b32.xlu1 %v15266_v44, %s11774_s20  ;;  %8818 = vrot.lane.b32.xlu0 %v15267_v57, %s11774_s20  ;;  %v8518_v44 = vsub.f32 %v14461_v0, %v8488_v63 }
 0xf4f   : > { %10964 = vmatprep.mubr.msk.f32.mxu1 %vm2554_vm1, %v8624_v54  ;;  %v8544_v57 = vmul.f32 1.442695, %v8519_v3 }
 0xf50   : > { %v8581_v58 = vpop.xlane.xlu1 %8580 }
 0xf51   : > { %11539 = vpow2.f32 %v8544_v57 }
 0xf52   : > { %9265 = vrot.lane.b32.xlu1 %v15268_v14, %s11774_s20  ;;  %8998 = vrot.lane.b32.xlu0 %v15269_v50, %s11774_s20  ;;  %v8578_v10 = vpop.xlane.xlu0 %8577  ;;  %v8542_v50 = vmul.f32 1.442695, %v8518_v44 }
 0xf54   : > { %v8503_v54 = vpop.xlane.xlu1 %8502  ;;  %11541 = vpow2.f32 %v8542_v50 }
 0xf55   : > { %v8523_v14 = vsub.f32 %v14474_v49, %v8503_v54 }
 0xf56   : > { %8996 = vrot.lane.b32.xlu0 %v15270_v6, %s11774_s20  ;;  %v8500_v29 = vpop.xlane.xlu0 %8499 }
 0xf57   : > { %v8522_v28 = vsub.f32 %v14481_v43, %v8500_v29  ;;  %v8552_v6 = vmul.f32 1.442695, %v8523_v14 }
 0xf59   : > { %v8550_v32 = vmul.f32 1.442695, %v8522_v28  ;;  %11543 = vpow2.f32 %v8552_v6 }
 0xf5a   : > { %9176 = vrot.lane.b32.xlu0 %v15271_v27, %s11774_s20 }
 0xf5b   : > { %11545 = vpow2.f32 %v8550_v32 }
 0xf5c   : > { %11547 = vrcp.f32 %v8563_v37 }
 0xf5d   : > { %11549 = vrcp.f32 %v8572_v22 }
 0xf5e   : > { %v14545_v27 = vpop.eup %11539  ;;  %11551 = vrcp.f32 %v8569_v19 }
 0xf5f   : > { %v8585_v62 = vsel %vm2554_vm1, %v14545_v27, 0.0  ;;  %11553 = vrcp.f32 %v8578_v10 }
 0xf60   : > { %11555 = vrcp.f32 %v8575_v53 }
 0xf61   : > { %v14547_v42 = vpop.eup %11541  ;;  %11557 = vrcp.f32 %v8581_v58 }
 0xf62   : > { %v8582_v49 = vsel %vm2554_vm1, %v14547_v42, 0.0 }
 0xf66   : > { %v14551_v0 = vpop.eup %11543 }
 0xf67   : > { %v8597_v28 = vsel %vm2554_vm1, %v14551_v0, 0.0 }
 0xf68   : > { %v14555_v29 = vpop.eup %11545 }
 0xf69   : > { %v8594_v32 = vsel %vm2554_vm1, %v14555_v29, 0.0  ;;  %v11548_v63 = vpop.eup %11547 }
 0xf6a   : > { %v11550_v3 = vpop.eup %11549  ;;  %v8623_v44 = vmul.f32 %v11548_v63, %v14434_v12 }
 0xf6b   : > { %v8626_v57 = vmul.f32 %v11550_v3, %v14455_v45  ;;  %v11552_v14 = vpop.eup %11551 }
 0xf6c   : > { %v11554_v6 = vpop.eup %11553 }
 0xf6d   : > { %v11556_v10 = vpop.eup %11555 }
 0xf6e   : > { %v11558_v58 = vpop.eup %11557 }
 0xf76   : > { %8586 = vadd.xlane.f32.xlu1 %v8585_v62  ;;  %v8625_v62 = vmul.f32 %v11552_v14, %v14449_v24  ;;  %v8629_v24 = vmul.f32 %v11558_v58, %v14471_v7 }
 0xf79   : > { %8583 = vadd.xlane.f32.xlu0 %v8582_v49 }
 0xf7a   : > { %8598 = vadd.xlane.f32.xlu1 %v8597_v28  ;;  %v8628_v28 = vmul.f32 %v11554_v6, %v14478_v11 }
 0xf7d   : > { %8595 = vadd.xlane.f32.xlu0 %v8594_v32  ;;  %v8627_v32 = vmul.f32 %v11556_v10, %v14453_v47 }
 0xf8b   : > { %9263 = vrot.lane.b32.xlu1 %v15199_v36, %s11774_s20 }
 0xf93   : > { %9174 = vrot.lane.b32.xlu0 %v15200_v18, %s11774_s20 }
 0xfaa   : > { %v8593_v43 = vpop.xlane.xlu1 %8592 }
 0xfac   : > { %v8590_v36 = vpop.xlane.xlu0 %8589 }
 0xfad   : > { %11559 = vrcp.f32 %v8590_v36 }
 0xfae   : > { %v8643_v35 = vpop.permute.xlu1 %8642  ;;  %11561 = vrcp.f32 %v8593_v43 }
 0xfaf   : > { %10953 = vmatprep.subr.mxu0 %v8643_v35 }
 0xfb0   : > { %10954 = vmatpush3.msra.mxu0 %v8643_v35 }
 0xfb2   : > { %v8641_v54 = vpop.permute.xlu1 %8640 }
 0xfb3   : > { %10955 = vmatprep.subr.mxu0 %v8641_v54 }
 0xfb4   : > { %10956 = vmatpush3.msra.mxu0 %v8641_v54 }
 0xfb5   : > { %10958 = vmatmul.mubr.msk.f32.vlgmr.msra.gmra.mxu0 %vm2554_vm1, %v8623_v44 }
 0xfb6   : > { %v8730_v18 = vpop.permute.xlu1 %8729  ;;  %10971 = vmatprep.mubr.msk.f32.mxu0 %vm2554_vm1, %v8626_v57 }
 0xfb9   : > { %v8602_v37 = vpop.xlane.xlu0 %8601 }
 0xfba   : > { %v8821_v22 = vpop.permute.xlu1 %8820  ;;  %11563 = vrcp.f32 %v8602_v37  ;;  %v11560_v43 = vpop.eup %11559 }
 0xfbb   : > { %10967 = vmatprep.subr.mxu0 %v8821_v22  ;;  %v11562_v63 = vpop.eup %11561  ;;  %v8632_v47 = vmul.f32 %v11560_v43, %v14497_v38 }
 0xfbc   : > { %10968 = vmatpush3.msra.mxu0 %v8821_v22  ;;  %v8633_v11 = vmul.f32 %v11562_v63, %v14493_v9 }
 0xfbd   : > { %v8605_v12 = vpop.xlane.xlu0 %8604 }
 0xfbe   : > { %v8910_v19 = vpop.permute.xlu1 %8909  ;;  %11565 = vrcp.f32 %v8605_v12 }
 0xfc1   : > { %v8732_v45 = vpop.permute.xlu0 %8731 }
 0xfc2   : > { %v8908_v50 = vpop.permute.xlu1 %8907  ;;  %10960 = vmatprep.subr.mxu1 %v8732_v45 }
 0xfc3   : > { %10961 = vmatpush3.msra.mxu1 %v8732_v45 }
 0xfc4   : > { %10962 = vmatprep.subr.mxu1 %v8730_v18 }
 0xfc5   : > { %10963 = vmatpush3.msra.mxu1 %v8730_v18  ;;  %v8819_v53 = vpop.permute.xlu0 %8818 }
 0xfc6   : > { %v9088_v49 = vpop.permute.xlu1 %9087  ;;  %10965 = vmatmul.mubr.msk.f32.vlgmr.msra.gmra.mxu1 %vm2554_vm1, %v8625_v62  ;;  %10969 = vmatprep.subr.mxu0 %v8819_v53 }
 0xfc7   : > { %10974 = vmatprep.subr.mxu1 %v8910_v19  ;;  %10970 = vmatpush3.msra.mxu0 %v8819_v53  ;;  %v11564_v54 = vpop.eup %11563 }
 0xfc8   : > { %10975 = vmatpush3.msra.mxu1 %v8910_v19  ;;  %10978 = vmatprep.mubr.msk.f32.mxu1 %vm2554_vm1, %v8628_v28  ;;  %v8636_v57 = vmul.f32 %v11564_v54, %v14501_v33 }
 0xfc9   : > { %10972 = vmatmul.mubr.msk.f32.vlgmr.msra.gmra.mxu0 %vm2554_vm1, %v8627_v32  ;;  %10976 = vmatprep.subr.mxu1 %v8908_v50  ;;  %v8999_v35 = vpop.permute.xlu0 %8998 }
 0xfca   : > { %10977 = vmatpush3.msra.mxu1 %v8908_v50  ;;  %v9086_v3 = vpop.permute.xlu1 %9085  ;;  %10981 = vmatprep.subr.mxu0 %v8999_v35 }
 0xfcb   : > { %10979 = vmatmul.mubr.msk.f32.vlgmr.msra.gmra.mxu1 %vm2554_vm1, %v8629_v24  ;;  %10988 = vmatprep.subr.mxu1 %v9088_v49  ;;  %v11566_v37 = vpop.eup %11565 }
 0xfcc   : > { %10982 = vmatpush3.msra.mxu0 %v8999_v35  ;;  %10989 = vmatpush3.msra.mxu1 %v9088_v49  ;;  %v8637_v19 = vmul.f32 %v11566_v37, %v14505_v2 }
 0xfcd   : > { %10992 = vmatprep.mubr.msk.f32.mxu1 %vm2554_vm1, %v8632_v47  ;;  %10990 = vmatprep.subr.mxu1 %v9086_v3  ;;  %v8997_v7 = vpop.permute.xlu0 %8996 }
 0xfce   : > { %10991 = vmatpush3.msra.mxu1 %v9086_v3  ;;  %v9266_v44 = vpop.permute.xlu1 %9265  ;;  %10983 = vmatprep.subr.mxu0 %v8997_v7 }
 0xfcf   : > { %10993 = vmatmul.mubr.msk.f32.vlgmr.msra.gmra.mxu1 %vm2554_vm1, %v8633_v11  ;;  %10984 = vmatpush3.msra.mxu0 %v8997_v7  ;;  %v11189_v7 = vld [vmem:[#allocation9 + $0x38] sm:$0xff]  }
 0xfd0   : > { %11002 = vmatprep.subr.mxu1 %v9266_v44  ;;  %11006 = vmatprep.mubr.msk.f32.mxu1 %vm2554_vm1, %v8636_v57 }
 0xfd1   : > { %11003 = vmatpush3.msra.mxu1 %v9266_v44  ;;  %v9177_v38 = vpop.permute.xlu0 %9176  ;;  %v11190_v44 = vld [vmem:[#allocation9 + $0x30] sm:$0xff]  }
 0xfd2   : > { %10995 = vmatprep.subr.mxu0 %v9177_v38 }
 0xfff   : > { %v8587_v9 = vpop.xlane.xlu1 %8586 }
0x1000   : > { %11567 = vrcp.f32 %v8587_v9 }
0x1002   : > { %v8584_v36 = vpop.xlane.xlu0 %8583 }
0x1003   : > { %11569 = vrcp.f32 %v8584_v36  ;;  %v8599_v18 = vpop.xlane.xlu1 %8598 }
0x1004   : > { %11571 = vrcp.f32 %v8599_v18 }
0x1006   : > { %v8596_v22 = vpop.xlane.xlu0 %8595 }
0x1007   : > { %11573 = vrcp.f32 %v8596_v22  ;;  %v9264_v33 = vpop.permute.xlu1 %9263 }
0x1008   : > { %11004 = vmatprep.subr.mxu1 %v9264_v33 }
0x1009   : > { %11005 = vmatpush3.msra.mxu1 %v9264_v33 }
0x100a   : > { %11007 = vmatmul.mubr.msk.f32.vlgmr.msra.gmra.mxu1 %vm2554_vm1, %v8637_v19  ;;  %v9175_v62 = vpop.permute.xlu0 %9174 }
0x100d   : > { %v11568_v14 = vpop.eup %11567 }
0x100e   : > { %v8631_v50 = vmul.f32 %v11568_v14, %v14545_v27 }
0x1010   : > { %v11570_v45 = vpop.eup %11569 }
0x1011   : > { %v8630_v12 = vmul.f32 %v11570_v45, %v14547_v42  ;;  %v11572_v6 = vpop.eup %11571 }
0x1012   : > { %v8635_v53 = vmul.f32 %v11572_v6, %v14551_v0 }
0x1013   : > { %10985 = vmatprep.mubr.msk.f32.mxu0 %vm2554_vm1, %v8630_v12 }
0x1014   : > { %v11574_v10 = vpop.eup %11573  ;;  %10986 = vmatmul.mubr.msk.f32.vlgmr.msra.gmra.mxu0 %vm2554_vm1, %v8631_v50 }
0x1015   : > { %10996 = vmatpush3.msra.mxu0 %v9177_v38  ;;  %v8634_v2 = vmul.f32 %v11574_v10, %v14555_v29 }
0x1016   : > { %10997 = vmatprep.subr.mxu0 %v9175_v62 }
0x1017   : > { %10998 = vmatpush3.msra.mxu0 %v9175_v62  ;;  %10999 = vmatprep.mubr.msk.f32.mxu0 %vm2554_vm1, %v8634_v2 }
0x1018   : > { %11000 = vmatmul.mubr.msk.f32.vlgmr.msra.gmra.mxu0 %vm2554_vm1, %v8635_v53  ;;  %11009 = vmatprep.subr.bf16.mxu0 %v11189_v7 }
0x1019   : > { %11010 = vmatpush3.bf16.msra.mxu0 %v11189_v7 }
0x101a   : > { %11011 = vmatprep.subr.bf16.mxu0 %v11190_v44 }
0x101d   : > { %11012 = vmatpush3.bf16.msra.mxu0 %v11190_v44 }
0x1075   : > { %v10959_v42 = vpop.f32.mrf.mxu0 }
0x1076   : > { %9368 = vrot.lane.b32.xlu1 %v10959_v42, %s11772_s7 }
0x1077   : > { %v8718_v27 = vpop.f32.mrf.mxu0 }
0x1078   : > { %9366 = vrot.lane.b32.xlu0 %v8718_v27, %s11772_s7 }
0x1086   : > { %v10966_v58 = vpop.f32.mrf.mxu1 }
0x1087   : > { %9372 = vrot.lane.b32.xlu1 %v10966_v58, %s11772_s7 }
0x1088   : > { %v8807_v49 = vpop.f32.mrf.mxu1 }
0x1089   : > { %v10973_v28 = vpop.f32.mrf.mxu0  ;;  %9370 = vrot.lane.b32.xlu0 %v8807_v49, %s11772_s7 }
0x108b   : > { %9376 = vrot.lane.b32.xlu1 %v10973_v28, %s11772_s7  ;;  %v8896_v0 = vpop.f32.mrf.mxu0  ;;  %v10980_v29 = vpop.f32.mrf.mxu1 }
0x108d   : > { %9374 = vrot.lane.b32.xlu0 %v8896_v0, %s11772_s7  ;;  %v8985_v32 = vpop.f32.mrf.mxu1 }
0x108f   : > { %9380 = vrot.lane.b32.xlu1 %v10980_v29, %s11772_s7  ;;  %v10994_v24 = vpop.f32.mrf.mxu1 }
0x1091   : > { %9378 = vrot.lane.b32.xlu0 %v8985_v32, %s11772_s7  ;;  %v9163_v63 = vpop.f32.mrf.mxu1 }
0x10ca   : > { %v11008_v54 = vpop.f32.mrf.mxu1 }
0x10cc   : > { %v9341_v11 = vpop.f32.mrf.mxu1 }
0x10d4   : > { %v10987_v43 = vpop.f32.mrf.mxu0 }
0x10d5   : > { %9384 = vrot.lane.b32.xlu1 %v10987_v43, %s11772_s7 }
0x10d6   : > { %v9074_v35 = vpop.f32.mrf.mxu0 }
0x10d7   : > { %9382 = vrot.lane.b32.xlu0 %v9074_v35, %s11772_s7 }
0x10d8   : > { %v11001_v3 = vpop.f32.mrf.mxu0 }
0x10d9   : > { %9388 = vrot.lane.b32.xlu1 %v10994_v24, %s11772_s7 }
0x10da   : > { %v9252_v47 = vpop.f32.mrf.mxu0 }
0x10db   : > { %9386 = vrot.lane.b32.xlu0 %v9163_v63, %s11772_s7 }
0x10dd   : > { %9392 = vrot.lane.b32.xlu1 %v11001_v3, %s11772_s7 }
0x10df   : > { %9390 = vrot.lane.b32.xlu0 %v9252_v47, %s11772_s7 }
0x10e1   : > { %9396 = vrot.lane.b32.xlu1 %v11008_v54, %s11772_s7 }
0x10e3   : > { %9394 = vrot.lane.b32.xlu0 %v9341_v11, %s11772_s7  ;;  %v14644_v11 = vld [vmem:[%s14755_s8] ss:$0 sm:$0xff] }
0x10e8   : > { %v9369_v57 = vpop.permute.xlu1 %9368 }
0x10e9   : > { %v9415_v9 = vmul.f32 %v13264_v60, %v9369_v57 }
0x10ea   : > { %v9367_v38 = vpop.permute.xlu0 %9366 }
0x10eb   : > { %v9414_v36 = vmul.f32 %v13262_v39, %v9367_v38 }
0x10ed   : > { %v9430_v18 = vpack.c.bf16 %v9415_v9, %v9414_v36 }
0x10ef   : > { %9450 = vrot.lane.b32.xlu0 %v9430_v18, %s11774_s20 }
0x10f9   : > { %v9373_v37 = vpop.permute.xlu1 %9372 }
0x10fa   : > { %v9417_v33 = vmul.f32 %v15202_v34, %v9373_v37 }
0x10fb   : > { %v9371_v22 = vpop.permute.xlu0 %9370 }
0x10fc   : > { %v9416_v19 = vmul.f32 %v15203_v56, %v9371_v22 }
0x10fd   : > { %v9377_v14 = vpop.permute.xlu1 %9376 }
0x10fe   : > { %v9431_v45 = vpack.c.bf16 %v9417_v33, %v9416_v19  ;;  %v9419_v50 = vmul.f32 %v15204_v51, %v9377_v14 }
0x10ff   : > { %v9375_v12 = vpop.permute.xlu0 %9374 }
0x1100   : > { %v9418_v6 = vmul.f32 %v15205_v52, %v9375_v12  ;;  %9452 = vrot.lane.b32.xlu1 %v9431_v45, %s11774_s20 }
0x1101   : > { %v9381_v60 = vpop.permute.xlu1 %9380 }
0x1102   : > { %v9432_v39 = vpack.c.bf16 %v9419_v50, %v9418_v6  ;;  %v9421_v62 = vmul.f32 %v15207_v25, %v9381_v60 }
0x1103   : > { %v9379_v10 = vpop.permute.xlu0 %9378 }
0x1104   : > { %v9420_v2 = vmul.f32 %v15208_v55, %v9379_v10  ;;  %9454 = vrot.lane.b32.xlu0 %v9432_v39, %s11774_s20 }
0x1106   : > { %v9433_v34 = vpack.c.bf16 %v9421_v62, %v9420_v2 }
0x1108   : > { %9456 = vrot.lane.b32.xlu1 %v9433_v34, %s11774_s20 }
0x1147   : > { %v9385_v56 = vpop.permute.xlu1 %9384 }
0x1148   : > { %v9423_v51 = vmul.f32 %v15209_v1, %v9385_v56 }
0x1149   : > { %v9383_v53 = vpop.permute.xlu0 %9382 }
0x114a   : > { %v9422_v52 = vmul.f32 %v15210_v41, %v9383_v53 }
0x114b   : > { %v9389_v42 = vpop.permute.xlu1 %9388 }
0x114c   : > { %v9434_v27 = vpack.c.bf16 %v9423_v51, %v9422_v52  ;;  %v9425_v49 = vmul.f32 %v15211_v23, %v9389_v42  ;;  %v15272_v42 = vld [vmem:[#allocation33_spill] sm:$0xff] }
0x114d   : > { %v9387_v58 = vpop.permute.xlu0 %9386 }
0x114e   : > { %v9424_v25 = vmul.f32 %v15212_v59, %v9387_v58  ;;  %9458 = vrot.lane.b32.xlu0 %v9434_v27, %s11774_s20 }
0x114f   : > { %v9393_v55 = vpop.permute.xlu1 %9392 }
0x1150   : > { %v9435_v28 = vpack.c.bf16 %v9425_v49, %v9424_v25  ;;  %v9427_v29 = vmul.f32 %v15214_v20, %v9393_v55  ;;  %v15273_v49 = vld [vmem:[#allocation39_spill] sm:$0xff] }
0x1151   : > { %v9391_v0 = vpop.permute.xlu0 %9390 }
0x1152   : > { %v9426_v32 = vmul.f32 %v15215_v17, %v9391_v0  ;;  %9460 = vrot.lane.b32.xlu1 %v9435_v28, %s11774_s20  ;;  %v15274_v28 = vld [vmem:[#allocation40_spill] sm:$0xff] }
0x1153   : > { %v9397_v1 = vpop.permute.xlu1 %9396 }
0x1154   : > { %v9436_v41 = vpack.c.bf16 %v9427_v29, %v9426_v32  ;;  %v9429_v24 = vmul.f32 %v15216_v31, %v9397_v1  ;;  %v15275_v1 = vld [vmem:[#allocation47_spill] sm:$0xff] }
0x1155   : > { %v9395_v43 = vpop.permute.xlu0 %9394 }
0x1156   : > { %v9428_v23 = vmul.f32 %v15217_v16, %v9395_v43  ;;  %9462 = vrot.lane.b32.xlu0 %v9436_v41, %s11774_s20 }
0x1158   : > { %v9437_v59 = vpack.c.bf16 %v9429_v24, %v9428_v23 }
0x115a   : > { %9464 = vrot.lane.b32.xlu1 %v9437_v59, %s11774_s20 }
0x1161   : > { %v9451_v35 = vpop.permute.xlu0 %9450 }
0x1162   : > { %11013 = vmatprep.mubr.msk.bf16.mxu0 %vm1857_vm0, %v9451_v35 }
0x1172   : > { %v9453_v20 = vpop.permute.xlu1 %9452 }
0x1173   : > { %11014 = vmatmul.mubr.msk.bf16.vlgmr.msra.gmra.mxu0 %vm1857_vm0, %v9453_v20 }
0x1176   : > { %v9455_v17 = vpop.permute.xlu0 %9454 }
0x1177   : > { %11017 = vmatprep.mubr.msk.bf16.mxu0 %vm1857_vm0, %v9455_v17 }
0x117a   : > { %v9457_v63 = vpop.permute.xlu1 %9456 }
0x117b   : > { %11018 = vmatmul.mubr.msk.bf16.gmra.mxu0 %vm1857_vm0, %v9457_v63 }
0x11c0   : > { %v9459_v31 = vpop.permute.xlu0 %9458 }
0x11c1   : > { %11021 = vmatprep.mubr.msk.bf16.mxu0 %vm1857_vm0, %v9459_v31 }
0x11c4   : > { %v9461_v16 = vpop.permute.xlu1 %9460 }
0x11c5   : > { %11022 = vmatmul.mubr.msk.bf16.gmra.mxu0 %vm1857_vm0, %v9461_v16 }
0x11c8   : > { %v9463_v3 = vpop.permute.xlu0 %9462 }
0x11c9   : > { %11025 = vmatprep.mubr.msk.bf16.mxu0 %vm1857_vm0, %v9463_v3 }
0x11cc   : > { %v9465_v54 = vpop.permute.xlu1 %9464 }
0x11cd   : > { %11026 = vmatmul.mubr.msk.bf16.gmra.mxu0 %vm1857_vm0, %v9465_v54 }
0x1233   : > { %v11015_v47 = vpop.f32.mrf.mxu0 }
0x1234   : > { %v9601_v7 = vadd.f32 %v11015_v47, %v14358_v21 }
0x1235   : > { %v9536_v44 = vpop.f32.mrf.mxu0 }
0x1236   : > { %v9624_v57 = vadd.f32 %v14644_v11, %v9601_v7  ;;  %v9599_v38 = vadd.f32 %v9536_v44, %v14361_v48 }
0x1237   : > { %v11016_v9 = vpop.f32.mrf.mxu0 }
0x1238   : > { %9640 = vst [vmem:[%s14650_s18 + $0x10] sm:$0xff] %v9624_v57  ;;  %v9622_v36 = vadd.f32 %v14644_v11, %v9599_v38  ;;  %v9602_v18 = vadd.f32 %v11016_v9, %v14364_v61 }
0x1239   : > { %v9539_v37 = vpop.f32.mrf.mxu0 }
0x123a   : > { %9638 = vst [vmem:[%s14650_s18] sm:$0xff] %v9622_v36  ;;  %v9625_v21 = vadd.f32 %v14644_v11, %v9602_v18  ;;  %v9600_v48 = vadd.f32 %v9539_v37, %v14367_v30 }
0x123b   : > { %v11019_v22 = vpop.f32.mrf.mxu0 }
0x123c   : > { %9641 = vst [vmem:[%s14650_s18 + $0x18] sm:$0xff] %v9625_v21  ;;  %v9623_v33 = vadd.f32 %v14644_v11, %v9600_v48  ;;  %v9605_v19 = vadd.f32 %v11019_v22, %v14370_v5 }
0x123d   : > { %v9552_v14 = vpop.f32.mrf.mxu0 }
0x123e   : > { %9639 = vst [vmem:[%s14650_s18 + $0x8] sm:$0xff] %v9623_v33  ;;  %v9628_v45 = vadd.f32 %v14644_v11, %v9605_v19  ;;  %v9603_v61 = vadd.f32 %v9552_v14, %v14373_v15 }
0x123f   : > { %v11020_v12 = vpop.f32.mrf.mxu0 }
0x1240   : > { %9644 = vst [vmem:[%s14650_s18 + $0x30] sm:$0xff] %v9628_v45  ;;  %v9626_v50 = vadd.f32 %v14644_v11, %v9603_v61  ;;  %v9606_v30 = vadd.f32 %v11020_v12, %v14376_v40 }
0x1241   : > { %v9555_v6 = vpop.f32.mrf.mxu0 }
0x1242   : > { %9642 = vst [vmem:[%s14650_s18 + $0x20] sm:$0xff] %v9626_v50  ;;  %v9629_v60 = vadd.f32 %v14644_v11, %v9606_v30  ;;  %v9604_v5 = vadd.f32 %v9555_v6, %v14379_v4 }
0x1244   : > { %9645 = vst [vmem:[%s14650_s18 + $0x38] sm:$0xff] %v9629_v60  ;;  %v9627_v39 = vadd.f32 %v14644_v11, %v9604_v5 }
0x1246   : > { %9643 = vst [vmem:[%s14650_s18 + $0x28] sm:$0xff] %v9627_v39 }
0x1285   : > { %v11023_v15 = vpop.f32.mrf.mxu0 }
0x1286   : > { %v9609_v10 = vadd.f32 %v11023_v15, %v14382_v26 }
0x1287   : > { %v9568_v62 = vpop.f32.mrf.mxu0 }
0x1288   : > { %v9632_v2 = vadd.f32 %v14644_v11, %v9609_v10  ;;  %v9607_v40 = vadd.f32 %v9568_v62, %v14385_v46 }
0x1289   : > { %v11024_v34 = vpop.f32.mrf.mxu0 }
0x128a   : > { %9648 = vst [vmem:[%s14650_s18 + $0x50] sm:$0xff] %v9632_v2  ;;  %v9630_v56 = vadd.f32 %v14644_v11, %v9607_v40  ;;  %v9610_v4 = vadd.f32 %v11024_v34, %v14388_v8 }
0x128b   : > { %v9571_v53 = vpop.f32.mrf.mxu0 }
0x128c   : > { %9646 = vst [vmem:[%s14650_s18 + $0x40] sm:$0xff] %v9630_v56  ;;  %v9633_v51 = vadd.f32 %v14644_v11, %v9610_v4  ;;  %v9608_v26 = vadd.f32 %v9571_v53, %v14391_v13 }
0x128d   : > { %v11027_v52 = vpop.f32.mrf.mxu0 }
0x128e   : > { %9649 = vst [vmem:[%s14650_s18 + $0x58] sm:$0xff] %v9633_v51  ;;  %v9631_v46 = vadd.f32 %v14644_v11, %v9608_v26  ;;  %v9613_v27 = vadd.f32 %v11027_v52, %v15272_v42 }
0x128f   : > { %v9584_v58 = vpop.f32.mrf.mxu0 }
0x1290   : > { %9647 = vst [vmem:[%s14650_s18 + $0x48] sm:$0xff] %v9631_v46  ;;  %v9636_v8 = vadd.f32 %v14644_v11, %v9613_v27  ;;  %v9611_v25 = vadd.f32 %v9584_v58, %v15273_v49 }
0x1291   : > { %v11028_v55 = vpop.f32.mrf.mxu0 }
0x1292   : > { %9652 = vst [vmem:[%s14650_s18 + $0x70] sm:$0xff] %v9636_v8  ;;  %v9634_v13 = vadd.f32 %v14644_v11, %v9611_v25  ;;  %v9614_v0 = vadd.f32 %v11028_v55, %v15274_v28 }
0x1293   : > { %v9587_v29 = vpop.f32.mrf.mxu0 }
0x1294   : > { %9650 = vst [vmem:[%s14650_s18 + $0x60] sm:$0xff] %v9634_v13  ;;  %v9637_v32 = vadd.f32 %v14644_v11, %v9614_v0  ;;  %v9612_v41 = vadd.f32 %v9587_v29, %v15275_v1 }
0x1296   : > { %9653 = vst [vmem:[%s14650_s18 + $0x78] sm:$0xff] %v9637_v32  ;;  %v9635_v43 = vadd.f32 %v14644_v11, %v9612_v41 }
0x1298   : > { %9651 = vst [vmem:[%s14650_s18 + $0x68] sm:$0xff] %v9635_v43 }
0x1299   : > { %11696 = shalt.err (!%p11693_p6)
}
0x129a   : > { %s11697_s14 = scalar_lea.hbm %s14699_s17, 2048  ;;  %s11701_s22 = scalar_lea.hbm %s14756_s9, 4096 }
0x129b   : > { %p11698_p7 = scmp.ne.s32.totalorder %s14699_s17, %s11697_s14  ;;  %p11702_p2 = scmp.lt.s32.totalorder %s14699_s17, %s14756_s9 }
0x129c   : > { %p11703_p0 = scmp.lt.s32.totalorder %s11701_s22, %s11697_s14 }
0x129d   : > { %p11699_p10 = pnand %p11698_p7, %p15276_p13 }
0x129e   : > { %p11704_p12 = por %p11703_p0, %p11702_p2 }
0x129f   : > { %p11700_p8 = pneg %p11699_p10 }
0x12a1   : > { %p11705_p9 = pnand %p11704_p12, %p11700_p8 }
0x12a3   : > { %11708 = shalt.err (!%p11705_p9)
}
0x12a4   : > { %s11778_s21 = smov 128   ;;  %s11779_s18 = smov 8  }
0x12a5   : > { %11045 = dma.vmem_to_hbm [thread:$0]  (%p15276_p13), %s14701_s25, 2048, %s14699_s17, %s9655_s13, %s11778_s21, %s11778_s21, %s11779_s18  }
0x12a6 PF: > { %s9684_s28 = sand.u32 1, %s11747_s30   ;;  %p15277_p5 = scmp.ne.s32.totalorder %s14941_s16, 0 }
0x12a7   : > { %p15278_p11 = scmp.ge.s32.totalorder %s11759_s12, 2  ;;  %s9685_s0 = scalar_lea.sflag [#allocation5], %s9684_s28 }
0x12a9   : > { %p11062_p3 = pnand %p15278_p11, %p15277_p5 }
0x12ab   : > { %p11063_p1 = pneg %p11062_p3 }
0x12ad   : > { %11742 = dma.done.wait (%p11063_p1), %s9685_s0, 2048  }
0x12ae   : > { %11744 = vsyncadd (%p11063_p1), %s9685_s0, 4294965248  ;;  %s15279_s12 = sld [smem:[#allocation18_spill]]  ;;  %s15282_s30 = smov %s11751_s10 }
0x12af   : > { %s15280_s11 = sld [smem:[#allocation17_spill]] }
0x12b0   : > { %s15281_s15 = sld [smem:[#allocation19_spill]] }
0x12b4   : > { %p26_p4 = scmp.ge.s32.totalorder %s15279_s12, 4  }
0x12b5   : > { %s15283_s10 = smov %s15280_s11 }
0x12b6   : > { %s15284_s11 = smov %s15281_s15  ;;  %28 = sbr.rel (!%p26_p4) target bundleno = 12 (0xc), region = 122 }
0x12bb   :  { %9690 = vsyncpa [#allocation4], 1 }
0x12bc   :  { %9692 = vsyncpa [#allocation4 + $0x1], 1 }
0x12bd   :  { %9693 = vsyncpa [#allocation7], 1 }
0x12be   :  { %9695 = vsyncpa [#allocation7 + $0x1], 1 }
0x12bf   :  { %9696 = vsyncpa [#allocation10], 1 }
0x12c0   :  { %9697 = vsyncpa [#allocation5], 1 }
0x12c1   :  { %9699 = vsyncpa [#allocation5 + $0x1], 1 }

</bundles_post_ra>
